<compile_context>
chip_gen: v7x
topology: tpu7x:2x2x1
jax: 0.10.0
libtpu: 0.0.40
codegen_flags: <defaults>
</compile_context>

<pallas_src>
import functools

import numpy as np

import jax
import jax.numpy as jnp
from jax.experimental import pallas as pl
from jax.experimental.pallas import tpu as pltpu


def _round_up(n, m):
    return (n + m - 1) // m * m


# ----------------------------------------------------------------------------
# Pallas kernel A: conv1+IF1 -> pool -> conv2+IF2 -> pool  (one call, grid=(T,))
# ----------------------------------------------------------------------------

def _snn_body_kernel(p1_ref, w1_ref, b1_ref, w2_ref, b2_ref, valid_ref, sel_ref,
                     out_ref, v1_ref, v2_ref, qpad_ref, *, Wpp, M2P, OUTP, QL):
    """One SNN time step, fully fused.

    Layouts (lanes are the last dim, all multiples of 128):
      p1_ref[0] : (9, 4*M2P)   conv1 patches, 4 pooling phases side by side,
                               per-phase columns ordered (b, y2, x2) on a
                               zero-padded (Hp+2, Wp+2) pooled grid.
      out_ref[0]: (Ch, OUTP)   pooled conv2 spikes, columns (b, y3, x3).
    IF neurons (v_th=1, hard reset to 0) keep their membranes in VMEM scratch
    across the T grid steps.
    """
    t = pl.program_id(0)
    Ch = w1_ref.shape[0]

    @pl.when(t == 0)
    def _():
        v1_ref[...] = jnp.zeros_like(v1_ref)
        v2_ref[...] = jnp.zeros_like(v2_ref)
        qpad_ref[...] = jnp.zeros_like(qpad_ref)   # margins must stay zero

    # ---- conv1 (+BN folded) over the 4 pooling phases at once, then IF1 ----
    cur1 = jnp.dot(w1_ref[...], p1_ref[0],
                   preferred_element_type=jnp.float32) + b1_ref[...]
    v1 = v1_ref[...] + cur1
    s1 = (v1 >= 1.0).astype(jnp.float32)
    v1_ref[...] = v1 * (1.0 - s1)                  # hard reset

    # ---- 2x2 maxpool == elementwise max over the 4 phase blocks -----------
    q1 = jnp.maximum(jnp.maximum(s1[:, 0:M2P], s1[:, M2P:2 * M2P]),
                     jnp.maximum(s1[:, 2 * M2P:3 * M2P], s1[:, 3 * M2P:4 * M2P]))
    q1 = q1 * valid_ref[...]                       # zero the grid-pad columns
    qpad_ref[:, QL:QL + M2P] = q1                  # zero-margin staging copy

    # ---- conv2 (+BN folded): im2col via 9 statically shifted lane reads ----
    cur2 = jnp.zeros((Ch, M2P), jnp.float32)
    for k in range(9):                             # tap (dy, dx) in {-1,0,1}^2
        dy, dx = k // 3 - 1, k % 3 - 1
        off = QL + dy * Wpp + dx                   # shift on the padded grid
        tap = qpad_ref[:, off:off + M2P]
        cur2 = cur2 + jnp.dot(w2_ref[k], tap.astype(jnp.bfloat16),
                              preferred_element_type=jnp.float32)
    cur2 = cur2 + b2_ref[...]

    # ---- IF2 ----------------------------------------------------------------
    v2 = v2_ref[...] + cur2
    s2 = (v2 >= 1.0).astype(jnp.float32)
    v2_ref[...] = v2 * (1.0 - s2)

    # ---- 2x2 maxpool + (b, y, x) reorder via 0/1 gather matmul -------------
    views = jnp.dot(s2.astype(jnp.bfloat16), sel_ref[...],
                    preferred_element_type=jnp.float32)          # (Ch, 4*OUTP)
    pooled = jnp.maximum(
        jnp.maximum(views[:, 0:OUTP], views[:, OUTP:2 * OUTP]),
        jnp.maximum(views[:, 2 * OUTP:3 * OUTP], views[:, 3 * OUTP:4 * OUTP]))
    out_ref[0] = pooled.astype(out_ref.dtype)


def snn_body(p1, w1, b1, w2t, b2, valid, sel, *, Wpp):
    """p1: (T, 9, 4*M2P) bf16 -> pooled conv2 spikes (T, Ch, OUTP) bf16."""
    T, _, M4 = p1.shape
    Ch = w1.shape[0]
    M2P = M4 // 4
    NSEL = sel.shape[1]
    OUTP = NSEL // 4
    QL = 128                                        # lane-aligned zero margin
    kernel = functools.partial(_snn_body_kernel, Wpp=Wpp, M2P=M2P,
                               OUTP=OUTP, QL=QL)
    return pl.pallas_call(
        kernel,
        out_shape=jax.ShapeDtypeStruct((T, Ch, OUTP), jnp.bfloat16),
        grid=(T,),
        in_specs=[
            pl.BlockSpec((1, 9, M4), lambda t: (t, 0, 0)),    # per-step patches
            pl.BlockSpec((Ch, 9), lambda t: (0, 0)),          # conv1+BN weight
            pl.BlockSpec((Ch, 1), lambda t: (0, 0)),          # conv1 BN bias
            pl.BlockSpec((9, Ch, Ch), lambda t: (0, 0, 0)),   # conv2+BN per-tap
            pl.BlockSpec((Ch, 1), lambda t: (0, 0)),          # conv2 BN bias
            pl.BlockSpec((1, M2P), lambda t: (0, 0)),         # valid-column mask
            pl.BlockSpec((M2P, NSEL), lambda t: (0, 0)),      # pool2 gather mat
        ],
        out_specs=pl.BlockSpec((1, Ch, OUTP), lambda t: (t, 0, 0)),
        scratch_shapes=[
            pltpu.VMEM((Ch, M4), jnp.float32),                # IF1 membrane
            pltpu.VMEM((Ch, M2P), jnp.float32),               # IF2 membrane
            pltpu.VMEM((Ch, M2P + 2 * QL), jnp.float32),      # zero-margin q1
        ],
        compiler_params=pltpu.CompilerParams(dimension_semantics=("arbitrary",)),
    )(p1, w1.astype(jnp.bfloat16), b1.reshape(Ch, 1).astype(jnp.float32),
      w2t.astype(jnp.bfloat16), b2.reshape(Ch, 1).astype(jnp.float32),
      valid, sel)


# ----------------------------------------------------------------------------
# Pallas kernel B: fc1+IF3 -> fc2+IF4 -> mean over T
# ----------------------------------------------------------------------------

def _fc_head_kernel(x_ref, w1_ref, w2_ref, o_ref, v1_ref, v2_ref, *, inv_t):
    t = pl.program_id(0)

    @pl.when(t == 0)
    def _():
        v1_ref[...] = jnp.zeros_like(v1_ref)
        v2_ref[...] = jnp.zeros_like(v2_ref)
        o_ref[...] = jnp.zeros_like(o_ref)

    cur1 = jnp.dot(x_ref[0], w1_ref[...], preferred_element_type=jnp.float32)
    v1 = v1_ref[...] + cur1
    s1 = (v1 >= 1.0).astype(jnp.float32)
    v1_ref[...] = v1 * (1.0 - s1)

    cur2 = jnp.dot(s1.astype(w2_ref.dtype), w2_ref[...],
                   preferred_element_type=jnp.float32)
    v2 = v2_ref[...] + cur2
    s2 = (v2 >= 1.0).astype(jnp.float32)
    v2_ref[...] = v2 * (1.0 - s2)

    o_ref[...] += s2                                # accumulate into output

    @pl.when(t == pl.num_programs(0) - 1)
    def _():
        o_ref[...] = o_ref[...] * inv_t             # mean over T


def fc_head(x_t, wfc1, wfc2):
    """x_t: (T, B, F) -> (B, num_classes)."""
    T, B, F = x_t.shape
    H1 = wfc1.shape[1]
    C = wfc2.shape[1]
    kernel = functools.partial(_fc_head_kernel, inv_t=1.0 / T)
    return pl.pallas_call(
        kernel,
        out_shape=jax.ShapeDtypeStruct((B, C), jnp.float32),
        grid=(T,),
        in_specs=[
            pl.BlockSpec((1, B, F), lambda t: (t, 0, 0)),
            pl.BlockSpec((F, H1), lambda t: (0, 0)),          # resident fc1 W
            pl.BlockSpec((H1, C), lambda t: (0, 0)),          # resident fc2 W
        ],
        out_specs=pl.BlockSpec((B, C), lambda t: (0, 0)),     # resident output
        scratch_shapes=[pltpu.VMEM((B, H1), jnp.float32),     # IF3 membrane
                        pltpu.VMEM((B, C), jnp.float32)],     # IF4 membrane
        compiler_params=pltpu.CompilerParams(dimension_semantics=("arbitrary",)),
    )(x_t.astype(jnp.bfloat16), wfc1.astype(jnp.bfloat16),
      wfc2.astype(jnp.bfloat16))


# ----------------------------------------------------------------------------
# XLA glue + trace-time constants + parameters
# ----------------------------------------------------------------------------

def phase_split_im2col(spk, Hpp, Wpp, M2P):
    """3x3/pad-1 conv patches for conv1, pre-split by 2x2 pooling phase.

    spk: (T, B, H, W) -> (T, 9, 4*M2P) bf16 where per-phase columns are
    (b, y2, x2) on a zero-padded (Hpp, Wpp) pooled grid and K-rows are (dy, dx).
    """
    T, B, H, W = spk.shape
    Hp, Wp = H // 2, W // 2
    xp = jnp.pad(spk, ((0, 0), (0, 0), (1, 1), (1, 1)))
    taps = jnp.stack([xp[:, :, dy:dy + H, dx:dx + W]
                      for dy in range(3) for dx in range(3)], axis=1)
    t6 = taps.reshape(T, 9, B, Hp, 2, Wp, 2)
    t7 = jnp.transpose(t6, (0, 1, 4, 6, 2, 3, 5))           # (T,9,yo,xo,B,Hp,Wp)
    t7 = jnp.pad(t7, ((0, 0),) * 5 + ((0, Hpp - Hp), (0, Wpp - Wp)))
    p = t7.reshape(T, 9, 4, B * Hpp * Wpp)
    p = jnp.pad(p, ((0, 0), (0, 0), (0, 0), (0, M2P - B * Hpp * Wpp)))
    return p.reshape(T, 9, 4 * M2P).astype(jnp.bfloat16)


def build_valid_mask(B, Hp, Wp, Hpp, Wpp, M2P):
    """1.0 at real pooled-grid columns, 0.0 at spatial/tail pad columns."""
    v = np.zeros((1, M2P), np.float32)
    for b in range(B):
        for y in range(Hp):
            for x in range(Wp):
                v[0, b * Hpp * Wpp + y * Wpp + x] = 1.0
    return jnp.asarray(v)


def build_pool2_selection(B, Hp, Wp, Hpp, Wpp, M2P, OUTP):
    """0/1 gather matrix: 4 pooling-phase views of the conv2 spike map,
    output columns ordered (b, y3, x3) (phase-major blocks of width OUTP)."""
    H4, W4 = Hp // 2, Wp // 2
    s = np.zeros((M2P, 4 * OUTP), np.float32)
    for p in range(4):
        yo, xo = p // 2, p % 2
        for b in range(B):
            for y3 in range(H4):
                for x3 in range(W4):
                    in_col = b * Hpp * Wpp + (2 * y3 + yo) * Wpp + (2 * x3 + xo)
                    out_col = p * OUTP + b * H4 * W4 + y3 * W4 + x3
                    s[in_col, out_col] = 1.0
    return jnp.asarray(s, dtype=jnp.bfloat16)


def fold_bn_conv1(w, gamma, beta, mean, var, eps=1e-5):
    """Fold eval BN into the bias-free 3x3 conv1. w: (Cout, Cin=1, 3, 3)."""
    scale = gamma / jnp.sqrt(var + eps)
    wf = w * scale[:, None, None, None]
    b = beta - mean * scale
    w_t = wf.transpose(0, 2, 3, 1).reshape(w.shape[0], 9 * w.shape[1])
    return w_t.astype(jnp.float32), b.astype(jnp.float32)


def fold_bn_conv2_taps(w, gamma, beta, mean, var, eps=1e-5):
    """Fold eval BN into conv2 and split per tap. w: (Cout, Cin, 3, 3) ->
    (9, Cout, Cin) with k = dy*3 + dx, plus (Cout,) bias."""
    scale = gamma / jnp.sqrt(var + eps)
    wf = w * scale[:, None, None, None]
    b = beta - mean * scale
    w_taps = wf.transpose(2, 3, 0, 1).reshape(9, w.shape[0], w.shape[1])
    return w_taps.astype(jnp.float32), b.astype(jnp.float32)


def init_params(key, hidden_channels=32, num_classes=10):
    Ch = hidden_channels
    ks = jax.random.split(key, 12)
    w1 = jax.random.normal(ks[0], (Ch, 1, 3, 3), jnp.float32) * 0.3
    w2 = jax.random.normal(ks[1], (Ch, Ch, 3, 3), jnp.float32) * 0.1
    g1 = 1.0 + 0.1 * jax.random.normal(ks[2], (Ch,), jnp.float32)
    bt1 = 0.1 * jax.random.normal(ks[3], (Ch,), jnp.float32)
    m1 = 0.1 * jax.random.normal(ks[4], (Ch,), jnp.float32)
    v1 = 1.0 + 0.1 * jnp.abs(jax.random.normal(ks[5], (Ch,), jnp.float32))
    g2 = 1.0 + 0.1 * jax.random.normal(ks[6], (Ch,), jnp.float32)
    bt2 = 0.1 * jax.random.normal(ks[7], (Ch,), jnp.float32)
    m2 = 0.1 * jax.random.normal(ks[8], (Ch,), jnp.float32)
    v2 = 1.0 + 0.1 * jnp.abs(jax.random.normal(ks[9], (Ch,), jnp.float32))

    w1t, b1 = fold_bn_conv1(w1, g1, bt1, m1, v1)
    w2t, b2 = fold_bn_conv2_taps(w2, g2, bt2, m2, v2)

    # Linear weights (no bias), stored as (in_features, out_features).
    # Synthetic weights are generated directly in the (c, y, x) flatten order.
    wfc1 = jax.random.normal(ks[10], (Ch * 7 * 7, Ch * 4 * 4), jnp.float32) * 0.05
    wfc2 = jax.random.normal(ks[11], (Ch * 4 * 4, num_classes), jnp.float32) * 0.05
    return {"w1": w1t, "b1": b1, "w2t": w2t, "b2": b2,
            "wfc1": wfc1, "wfc2": wfc2}


# ----------------------------------------------------------------------------
# Full forward pass
# ----------------------------------------------------------------------------

def recurrent_stal_classifier_forward(x, params, num_steps, enc_key):
    """x: (B, 1, H, W) NCHW, values in [0,1] -> (B, num_classes)."""
    B, Cin, H, W = x.shape
    assert Cin == 1 and H % 4 == 0 and W % 4 == 0
    T = num_steps
    Ch = params["w1"].shape[0]
    Hp, Wp = H // 2, W // 2
    H4, W4 = Hp // 2, Wp // 2
    Hpp, Wpp = Hp + 2, Wp + 2                       # zero-padded pooled grid
    M2P = _round_up(B * Hpp * Wpp, 128)             # conv2 lane width
    OUTP = _round_up(B * H4 * W4, 128)              # pooled-output lane width
    assert params["wfc1"].shape[0] == Ch * H4 * W4

    # --- encoder ('poisson' branch): spikes[t, b] = (rand <= pixel) ---------
    u = jax.random.uniform(enc_key, (T, B, H, W), jnp.float32)
    spk = (u <= x[:, 0][None]).astype(jnp.float32)

    # --- conv1 patches, phase-split & lane-padded (tiny XLA glue, ~150 KB) --
    p1 = phase_split_im2col(spk, Hpp, Wpp, M2P)     # (T, 9, 4*M2P) bf16

    # --- trace-time constants ------------------------------------------------
    valid = build_valid_mask(B, Hp, Wp, Hpp, Wpp, M2P)
    sel = build_pool2_selection(B, Hp, Wp, Hpp, Wpp, M2P, OUTP)

    # --- fused conv1+IF1 -> pool -> conv2+IF2 -> pool  (single Pallas call) --
    pooled = snn_body(p1, params["w1"], params["b1"], params["w2t"],
                      params["b2"], valid, sel, Wpp=Wpp)  # (T, Ch, OUTP) bf16

    # --- flatten to torch (c, y, x) order per sample (tiny XLA transpose) ----
    F = Ch * H4 * W4
    feat = pooled[:, :, :B * H4 * W4].reshape(T, Ch, B, H4 * W4)
    feat = feat.transpose(0, 2, 1, 3).reshape(T, B, F)

    # --- fc1 -> IF -> fc2 -> IF -> mean over T  (single Pallas call) ---------
    return fc_head(feat, params["wfc1"], params["wfc2"])


if __name__ == "__main__":
    key = jax.random.PRNGKey(0)
    k_x, k_p, k_enc = jax.random.split(key, 3)

    # 28x28 input is implied by Linear(hidden_channels*7*7, ...) after two pools.
    B, H, W = 2, 28, 28
    num_steps = 4
    hidden_channels = 32
    num_classes = 10

    x = jax.random.uniform(k_x, (B, 1, H, W), jnp.float32)    # pixel intensities
    params = init_params(k_p, hidden_channels=hidden_channels,
                         num_classes=num_classes)

    fwd = jax.jit(recurrent_stal_classifier_forward,
                  static_argnames=("num_steps",))
    out = fwd(x, params, num_steps=num_steps, enc_key=k_enc)
    out = jax.block_until_ready(out)

    assert out.shape == (B, num_classes), out.shape
    assert bool(jnp.all(jnp.isfinite(out)))
    print("KERNEL_OK")
</pallas_src>

<mosaic_0001>
module attributes {stable_mosaic.version = 11 : i64} {
  func.func @_snn_body_kernel(%arg0: i32, %arg1: memref<1x9x2048xbf16, #tpu.memory_space<vmem>>, %arg2: memref<32x9xbf16, #tpu.memory_space<vmem>>, %arg3: memref<32x1xf32, #tpu.memory_space<vmem>>, %arg4: memref<9x32x32xbf16, #tpu.memory_space<vmem>>, %arg5: memref<32x1xf32, #tpu.memory_space<vmem>>, %arg6: memref<1x512xf32, #tpu.memory_space<vmem>>, %arg7: memref<512x512xbf16, #tpu.memory_space<vmem>>, %arg8: memref<1x32x128xbf16, #tpu.memory_space<vmem>>, %arg9: memref<32x2048xf32, #tpu.memory_space<vmem>>, %arg10: memref<32x512xf32, #tpu.memory_space<vmem>>, %arg11: memref<32x768xf32, #tpu.memory_space<vmem>>) attributes {dimension_semantics = [#tpu.dimension_semantics<arbitrary>], iteration_bounds = array<i64: 4>, scalar_prefetch = 0 : i64, scratch_operands = 3 : i64, tpu.core_type = #tpu.core_type<tc>, window_params = [{transform_indices = @transform_0, window_bounds = array<i64: 1, 9, 2048>}, {pipeline_mode = #tpu.pipeline_mode<synchronous>, transform_indices = @transform_1, window_bounds = array<i64: 32, 9>}, {pipeline_mode = #tpu.pipeline_mode<synchronous>, transform_indices = @transform_2, window_bounds = array<i64: 32, 1>}, {pipeline_mode = #tpu.pipeline_mode<synchronous>, transform_indices = @transform_3, window_bounds = array<i64: 9, 32, 32>}, {pipeline_mode = #tpu.pipeline_mode<synchronous>, transform_indices = @transform_4, window_bounds = array<i64: 32, 1>}, {pipeline_mode = #tpu.pipeline_mode<synchronous>, transform_indices = @transform_5, window_bounds = array<i64: 1, 512>}, {pipeline_mode = #tpu.pipeline_mode<synchronous>, transform_indices = @transform_6, window_bounds = array<i64: 512, 512>}, {transform_indices = @transform_7, window_bounds = array<i64: 1, 32, 128>}]} {
    %c0_i32 = arith.constant 0 : i32
    %0 = arith.cmpi eq, %arg0, %c0_i32 : i32
    %1 = arith.extui %0 : i1 to i32
    %c0_i32_0 = arith.constant 0 : i32
    %2 = arith.cmpi ne, %1, %c0_i32_0 : i32
    scf.if %2 {
      %cst_69 = arith.constant 0.000000e+00 : f32
      %113 = vector.broadcast %cst_69 : f32 to vector<32x2048xf32>
      %c0_70 = arith.constant 0 : index
      %c0_71 = arith.constant 0 : index
      %114 = vector.load %arg9[%c0_70, %c0_71] : memref<32x2048xf32, #tpu.memory_space<vmem>>, vector<32x2048xf32>
      tpu.vector_store %arg9[%c0_70, %c0_71], %113 {strides = array<i32>} : memref<32x2048xf32, #tpu.memory_space<vmem>>, vector<32x2048xf32>,
      %cst_72 = arith.constant 0.000000e+00 : f32
      %115 = vector.broadcast %cst_72 : f32 to vector<32x512xf32>
      %c0_73 = arith.constant 0 : index
      %c0_74 = arith.constant 0 : index
      %116 = vector.load %arg10[%c0_73, %c0_74] : memref<32x512xf32, #tpu.memory_space<vmem>>, vector<32x512xf32>
      tpu.vector_store %arg10[%c0_73, %c0_74], %115 {strides = array<i32>} : memref<32x512xf32, #tpu.memory_space<vmem>>, vector<32x512xf32>,
      %cst_75 = arith.constant 0.000000e+00 : f32
      %117 = vector.broadcast %cst_75 : f32 to vector<32x768xf32>
      %c0_76 = arith.constant 0 : index
      %c0_77 = arith.constant 0 : index
      %118 = vector.load %arg11[%c0_76, %c0_77] : memref<32x768xf32, #tpu.memory_space<vmem>>, vector<32x768xf32>
      tpu.vector_store %arg11[%c0_76, %c0_77], %117 {strides = array<i32>} : memref<32x768xf32, #tpu.memory_space<vmem>>, vector<32x768xf32>,
    } else {
    }
    %c0 = arith.constant 0 : index
    %c0_1 = arith.constant 0 : index
    %3 = vector.load %arg2[%c0, %c0_1] : memref<32x9xbf16, #tpu.memory_space<vmem>>, vector<32x9xbf16>
    %c0_2 = arith.constant 0 : index
    %c0_3 = arith.constant 0 : index
    %c0_4 = arith.constant 0 : index
    %4 = vector.load %arg1[%c0_2, %c0_3, %c0_4] : memref<1x9x2048xbf16, #tpu.memory_space<vmem>>, vector<1x9x2048xbf16>
    %5 = vector.shape_cast %4 : vector<1x9x2048xbf16> to vector<9x2048xbf16>
    %cst = arith.constant dense<0.000000e+00> : vector<32x2048xf32>
    %6 = tpu.matmul %3, %5, %cst {dimension_numbers = #tpu.dot_dimension_numbers<[1], [0], [0], [1], [0, 0, 1, 1], [], []>} : vector<32x9xbf16>, vector<9x2048xbf16>, vector<32x2048xf32> -> vector<32x2048xf32>
    %c0_5 = arith.constant 0 : index
    %c0_6 = arith.constant 0 : index
    %7 = vector.load %arg3[%c0_5, %c0_6] : memref<32x1xf32, #tpu.memory_space<vmem>>, vector<32x1xf32>
    %8 = vector.broadcast %7 : vector<32x1xf32> to vector<32x2048xf32>
    %9 = arith.addf %6, %8 : vector<32x2048xf32>
    %c0_7 = arith.constant 0 : index
    %c0_8 = arith.constant 0 : index
    %10 = vector.load %arg9[%c0_7, %c0_8] : memref<32x2048xf32, #tpu.memory_space<vmem>>, vector<32x2048xf32>
    %11 = arith.addf %10, %9 : vector<32x2048xf32>
    %cst_9 = arith.constant 1.000000e+00 : f32
    %12 = vector.broadcast %cst_9 : f32 to vector<32x2048xf32>
    %13 = arith.cmpf oge, %11, %12 : vector<32x2048xf32>
    %14 = arith.extui %13 : vector<32x2048xi1> to vector<32x2048xi32>
    %15 = arith.sitofp %14 : vector<32x2048xi32> to vector<32x2048xf32>
    %cst_10 = arith.constant 1.000000e+00 : f32
    %16 = vector.broadcast %cst_10 : f32 to vector<32x2048xf32>
    %17 = arith.subf %16, %15 : vector<32x2048xf32>
    %18 = arith.mulf %11, %17 : vector<32x2048xf32>
    %c0_11 = arith.constant 0 : index
    %c0_12 = arith.constant 0 : index
    %19 = vector.load %arg9[%c0_11, %c0_12] : memref<32x2048xf32, #tpu.memory_space<vmem>>, vector<32x2048xf32>
    tpu.vector_store %arg9[%c0_11, %c0_12], %18 {strides = array<i32>} : memref<32x2048xf32, #tpu.memory_space<vmem>>, vector<32x2048xf32>,
    %20 = vector.extract_strided_slice %15 {offsets = [0, 0], sizes = [32, 512], strides = [1, 1]} : vector<32x2048xf32> to vector<32x512xf32>
    %21 = vector.extract_strided_slice %15 {offsets = [0, 512], sizes = [32, 512], strides = [1, 1]} : vector<32x2048xf32> to vector<32x512xf32>
    %22 = arith.maximumf %20, %21 : vector<32x512xf32>
    %23 = vector.extract_strided_slice %15 {offsets = [0, 1024], sizes = [32, 512], strides = [1, 1]} : vector<32x2048xf32> to vector<32x512xf32>
    %24 = vector.extract_strided_slice %15 {offsets = [0, 1536], sizes = [32, 512], strides = [1, 1]} : vector<32x2048xf32> to vector<32x512xf32>
    %25 = arith.maximumf %23, %24 : vector<32x512xf32>
    %26 = arith.maximumf %22, %25 : vector<32x512xf32>
    %c0_13 = arith.constant 0 : index
    %c0_14 = arith.constant 0 : index
    %27 = vector.load %arg6[%c0_13, %c0_14] : memref<1x512xf32, #tpu.memory_space<vmem>>, vector<1x512xf32>
    %28 = vector.broadcast %27 : vector<1x512xf32> to vector<32x512xf32>
    %29 = arith.mulf %26, %28 : vector<32x512xf32>
    %c0_15 = arith.constant 0 : index
    %c128 = arith.constant 128 : index
    %30 = vector.load %arg11[%c0_15, %c128] : memref<32x768xf32, #tpu.memory_space<vmem>>, vector<32x512xf32>
    tpu.vector_store %arg11[%c0_15, %c128], %29 {strides = array<i32>} : memref<32x768xf32, #tpu.memory_space<vmem>>, vector<32x512xf32>,
    %cst_16 = arith.constant 0.000000e+00 : f32
    %31 = vector.broadcast %cst_16 : f32 to vector<32x512xf32>
    %c0_17 = arith.constant 0 : index
    %c111 = arith.constant 111 : index
    %32 = vector.load %arg11[%c0_17, %c111] : memref<32x768xf32, #tpu.memory_space<vmem>>, vector<32x512xf32>
    %c0_18 = arith.constant 0 : index
    %c0_19 = arith.constant 0 : index
    %c0_20 = arith.constant 0 : index
    %33 = vector.load %arg4[%c0_18, %c0_19, %c0_20] : memref<9x32x32xbf16, #tpu.memory_space<vmem>>, vector<1x32x32xbf16>
    %34 = vector.shape_cast %33 : vector<1x32x32xbf16> to vector<32x32xbf16>
    %35 = arith.truncf %32 : vector<32x512xf32> to vector<32x512xbf16>
    %cst_21 = arith.constant dense<0.000000e+00> : vector<32x512xf32>
    %36 = tpu.matmul %34, %35, %cst_21 {dimension_numbers = #tpu.dot_dimension_numbers<[1], [0], [0], [1], [0, 0, 1, 1], [], []>} : vector<32x32xbf16>, vector<32x512xbf16>, vector<32x512xf32> -> vector<32x512xf32>
    %37 = arith.addf %31, %36 : vector<32x512xf32>
    %c0_22 = arith.constant 0 : index
    %c112 = arith.constant 112 : index
    %38 = vector.load %arg11[%c0_22, %c112] : memref<32x768xf32, #tpu.memory_space<vmem>>, vector<32x512xf32>
    %c1 = arith.constant 1 : index
    %c0_23 = arith.constant 0 : index
    %c0_24 = arith.constant 0 : index
    %39 = vector.load %arg4[%c1, %c0_23, %c0_24] : memref<9x32x32xbf16, #tpu.memory_space<vmem>>, vector<1x32x32xbf16>
    %40 = vector.shape_cast %39 : vector<1x32x32xbf16> to vector<32x32xbf16>
    %41 = arith.truncf %38 : vector<32x512xf32> to vector<32x512xbf16>
    %cst_25 = arith.constant dense<0.000000e+00> : vector<32x512xf32>
    %42 = tpu.matmul %40, %41, %cst_25 {dimension_numbers = #tpu.dot_dimension_numbers<[1], [0], [0], [1], [0, 0, 1, 1], [], []>} : vector<32x32xbf16>, vector<32x512xbf16>, vector<32x512xf32> -> vector<32x512xf32>
    %43 = arith.addf %37, %42 : vector<32x512xf32>
    %c0_26 = arith.constant 0 : index
    %c113 = arith.constant 113 : index
    %44 = vector.load %arg11[%c0_26, %c113] : memref<32x768xf32, #tpu.memory_space<vmem>>, vector<32x512xf32>
    %c2 = arith.constant 2 : index
    %c0_27 = arith.constant 0 : index
    %c0_28 = arith.constant 0 : index
    %45 = vector.load %arg4[%c2, %c0_27, %c0_28] : memref<9x32x32xbf16, #tpu.memory_space<vmem>>, vector<1x32x32xbf16>
    %46 = vector.shape_cast %45 : vector<1x32x32xbf16> to vector<32x32xbf16>
    %47 = arith.truncf %44 : vector<32x512xf32> to vector<32x512xbf16>
    %cst_29 = arith.constant dense<0.000000e+00> : vector<32x512xf32>
    %48 = tpu.matmul %46, %47, %cst_29 {dimension_numbers = #tpu.dot_dimension_numbers<[1], [0], [0], [1], [0, 0, 1, 1], [], []>} : vector<32x32xbf16>, vector<32x512xbf16>, vector<32x512xf32> -> vector<32x512xf32>
    %49 = arith.addf %43, %48 : vector<32x512xf32>
    %c0_30 = arith.constant 0 : index
    %c127 = arith.constant 127 : index
    %50 = vector.load %arg11[%c0_30, %c127] : memref<32x768xf32, #tpu.memory_space<vmem>>, vector<32x512xf32>
    %c3 = arith.constant 3 : index
    %c0_31 = arith.constant 0 : index
    %c0_32 = arith.constant 0 : index
    %51 = vector.load %arg4[%c3, %c0_31, %c0_32] : memref<9x32x32xbf16, #tpu.memory_space<vmem>>, vector<1x32x32xbf16>
    %52 = vector.shape_cast %51 : vector<1x32x32xbf16> to vector<32x32xbf16>
    %53 = arith.truncf %50 : vector<32x512xf32> to vector<32x512xbf16>
    %cst_33 = arith.constant dense<0.000000e+00> : vector<32x512xf32>
    %54 = tpu.matmul %52, %53, %cst_33 {dimension_numbers = #tpu.dot_dimension_numbers<[1], [0], [0], [1], [0, 0, 1, 1], [], []>} : vector<32x32xbf16>, vector<32x512xbf16>, vector<32x512xf32> -> vector<32x512xf32>
    %55 = arith.addf %49, %54 : vector<32x512xf32>
    %c0_34 = arith.constant 0 : index
    %c128_35 = arith.constant 128 : index
    %56 = vector.load %arg11[%c0_34, %c128_35] : memref<32x768xf32, #tpu.memory_space<vmem>>, vector<32x512xf32>
    %c4 = arith.constant 4 : index
    %c0_36 = arith.constant 0 : index
    %c0_37 = arith.constant 0 : index
    %57 = vector.load %arg4[%c4, %c0_36, %c0_37] : memref<9x32x32xbf16, #tpu.memory_space<vmem>>, vector<1x32x32xbf16>
    %58 = vector.shape_cast %57 : vector<1x32x32xbf16> to vector<32x32xbf16>
    %59 = arith.truncf %56 : vector<32x512xf32> to vector<32x512xbf16>
    %cst_38 = arith.constant dense<0.000000e+00> : vector<32x512xf32>
    %60 = tpu.matmul %58, %59, %cst_38 {dimension_numbers = #tpu.dot_dimension_numbers<[1], [0], [0], [1], [0, 0, 1, 1], [], []>} : vector<32x32xbf16>, vector<32x512xbf16>, vector<32x512xf32> -> vector<32x512xf32>
    %61 = arith.addf %55, %60 : vector<32x512xf32>
    %c0_39 = arith.constant 0 : index
    %c129 = arith.constant 129 : index
    %62 = vector.load %arg11[%c0_39, %c129] : memref<32x768xf32, #tpu.memory_space<vmem>>, vector<32x512xf32>
    %c5 = arith.constant 5 : index
    %c0_40 = arith.constant 0 : index
    %c0_41 = arith.constant 0 : index
    %63 = vector.load %arg4[%c5, %c0_40, %c0_41] : memref<9x32x32xbf16, #tpu.memory_space<vmem>>, vector<1x32x32xbf16>
    %64 = vector.shape_cast %63 : vector<1x32x32xbf16> to vector<32x32xbf16>
    %65 = arith.truncf %62 : vector<32x512xf32> to vector<32x512xbf16>
    %cst_42 = arith.constant dense<0.000000e+00> : vector<32x512xf32>
    %66 = tpu.matmul %64, %65, %cst_42 {dimension_numbers = #tpu.dot_dimension_numbers<[1], [0], [0], [1], [0, 0, 1, 1], [], []>} : vector<32x32xbf16>, vector<32x512xbf16>, vector<32x512xf32> -> vector<32x512xf32>
    %67 = arith.addf %61, %66 : vector<32x512xf32>
    %c0_43 = arith.constant 0 : index
    %c143 = arith.constant 143 : index
    %68 = vector.load %arg11[%c0_43, %c143] : memref<32x768xf32, #tpu.memory_space<vmem>>, vector<32x512xf32>
    %c6 = arith.constant 6 : index
    %c0_44 = arith.constant 0 : index
    %c0_45 = arith.constant 0 : index
    %69 = vector.load %arg4[%c6, %c0_44, %c0_45] : memref<9x32x32xbf16, #tpu.memory_space<vmem>>, vector<1x32x32xbf16>
    %70 = vector.shape_cast %69 : vector<1x32x32xbf16> to vector<32x32xbf16>
    %71 = arith.truncf %68 : vector<32x512xf32> to vector<32x512xbf16>
    %cst_46 = arith.constant dense<0.000000e+00> : vector<32x512xf32>
    %72 = tpu.matmul %70, %71, %cst_46 {dimension_numbers = #tpu.dot_dimension_numbers<[1], [0], [0], [1], [0, 0, 1, 1], [], []>} : vector<32x32xbf16>, vector<32x512xbf16>, vector<32x512xf32> -> vector<32x512xf32>
    %73 = arith.addf %67, %72 : vector<32x512xf32>
    %c0_47 = arith.constant 0 : index
    %c144 = arith.constant 144 : index
    %74 = vector.load %arg11[%c0_47, %c144] : memref<32x768xf32, #tpu.memory_space<vmem>>, vector<32x512xf32>
    %c7 = arith.constant 7 : index
    %c0_48 = arith.constant 0 : index
    %c0_49 = arith.constant 0 : index
    %75 = vector.load %arg4[%c7, %c0_48, %c0_49] : memref<9x32x32xbf16, #tpu.memory_space<vmem>>, vector<1x32x32xbf16>
    %76 = vector.shape_cast %75 : vector<1x32x32xbf16> to vector<32x32xbf16>
    %77 = arith.truncf %74 : vector<32x512xf32> to vector<32x512xbf16>
    %cst_50 = arith.constant dense<0.000000e+00> : vector<32x512xf32>
    %78 = tpu.matmul %76, %77, %cst_50 {dimension_numbers = #tpu.dot_dimension_numbers<[1], [0], [0], [1], [0, 0, 1, 1], [], []>} : vector<32x32xbf16>, vector<32x512xbf16>, vector<32x512xf32> -> vector<32x512xf32>
    %79 = arith.addf %73, %78 : vector<32x512xf32>
    %c0_51 = arith.constant 0 : index
    %c145 = arith.constant 145 : index
    %80 = vector.load %arg11[%c0_51, %c145] : memref<32x768xf32, #tpu.memory_space<vmem>>, vector<32x512xf32>
    %c8 = arith.constant 8 : index
    %c0_52 = arith.constant 0 : index
    %c0_53 = arith.constant 0 : index
    %81 = vector.load %arg4[%c8, %c0_52, %c0_53] : memref<9x32x32xbf16, #tpu.memory_space<vmem>>, vector<1x32x32xbf16>
    %82 = vector.shape_cast %81 : vector<1x32x32xbf16> to vector<32x32xbf16>
    %83 = arith.truncf %80 : vector<32x512xf32> to vector<32x512xbf16>
    %cst_54 = arith.constant dense<0.000000e+00> : vector<32x512xf32>
    %84 = tpu.matmul %82, %83, %cst_54 {dimension_numbers = #tpu.dot_dimension_numbers<[1], [0], [0], [1], [0, 0, 1, 1], [], []>} : vector<32x32xbf16>, vector<32x512xbf16>, vector<32x512xf32> -> vector<32x512xf32>
    %85 = arith.addf %79, %84 : vector<32x512xf32>
    %c0_55 = arith.constant 0 : index
    %c0_56 = arith.constant 0 : index
    %86 = vector.load %arg5[%c0_55, %c0_56] : memref<32x1xf32, #tpu.memory_space<vmem>>, vector<32x1xf32>
    %87 = vector.broadcast %86 : vector<32x1xf32> to vector<32x512xf32>
    %88 = arith.addf %85, %87 : vector<32x512xf32>
    %c0_57 = arith.constant 0 : index
    %c0_58 = arith.constant 0 : index
    %89 = vector.load %arg10[%c0_57, %c0_58] : memref<32x512xf32, #tpu.memory_space<vmem>>, vector<32x512xf32>
    %90 = arith.addf %89, %88 : vector<32x512xf32>
    %cst_59 = arith.constant 1.000000e+00 : f32
    %91 = vector.broadcast %cst_59 : f32 to vector<32x512xf32>
    %92 = arith.cmpf oge, %90, %91 : vector<32x512xf32>
    %93 = arith.extui %92 : vector<32x512xi1> to vector<32x512xi32>
    %94 = arith.sitofp %93 : vector<32x512xi32> to vector<32x512xf32>
    %cst_60 = arith.constant 1.000000e+00 : f32
    %95 = vector.broadcast %cst_60 : f32 to vector<32x512xf32>
    %96 = arith.subf %95, %94 : vector<32x512xf32>
    %97 = arith.mulf %90, %96 : vector<32x512xf32>
    %c0_61 = arith.constant 0 : index
    %c0_62 = arith.constant 0 : index
    %98 = vector.load %arg10[%c0_61, %c0_62] : memref<32x512xf32, #tpu.memory_space<vmem>>, vector<32x512xf32>
    tpu.vector_store %arg10[%c0_61, %c0_62], %97 {strides = array<i32>} : memref<32x512xf32, #tpu.memory_space<vmem>>, vector<32x512xf32>,
    %99 = arith.truncf %94 : vector<32x512xf32> to vector<32x512xbf16>
    %c0_63 = arith.constant 0 : index
    %c0_64 = arith.constant 0 : index
    %100 = vector.load %arg7[%c0_63, %c0_64] : memref<512x512xbf16, #tpu.memory_space<vmem>>, vector<512x512xbf16>
    %cst_65 = arith.constant dense<0.000000e+00> : vector<32x512xf32>
    %101 = tpu.matmul %99, %100, %cst_65 {dimension_numbers = #tpu.dot_dimension_numbers<[1], [0], [0], [1], [0, 0, 1, 1], [], []>} : vector<32x512xbf16>, vector<512x512xbf16>, vector<32x512xf32> -> vector<32x512xf32>
    %102 = vector.extract_strided_slice %101 {offsets = [0, 0], sizes = [32, 128], strides = [1, 1]} : vector<32x512xf32> to vector<32x128xf32>
    %103 = vector.extract_strided_slice %101 {offsets = [0, 128], sizes = [32, 128], strides = [1, 1]} : vector<32x512xf32> to vector<32x128xf32>
    %104 = arith.maximumf %102, %103 : vector<32x128xf32>
    %105 = vector.extract_strided_slice %101 {offsets = [0, 256], sizes = [32, 128], strides = [1, 1]} : vector<32x512xf32> to vector<32x128xf32>
    %106 = vector.extract_strided_slice %101 {offsets = [0, 384], sizes = [32, 128], strides = [1, 1]} : vector<32x512xf32> to vector<32x128xf32>
    %107 = arith.maximumf %105, %106 : vector<32x128xf32>
    %108 = arith.maximumf %104, %107 : vector<32x128xf32>
    %109 = arith.truncf %108 : vector<32x128xf32> to vector<32x128xbf16>
    %c0_66 = arith.constant 0 : index
    %c0_67 = arith.constant 0 : index
    %c0_68 = arith.constant 0 : index
    %110 = vector.load %arg8[%c0_66, %c0_67, %c0_68] : memref<1x32x128xbf16, #tpu.memory_space<vmem>>, vector<1x32x128xbf16>
    %111 = vector.shape_cast %110 : vector<1x32x128xbf16> to vector<32x128xbf16>
    %112 = vector.shape_cast %109 : vector<32x128xbf16> to vector<1x32x128xbf16>
    tpu.vector_store %arg8[%c0_66, %c0_67, %c0_68], %112 {strides = array<i32>} : memref<1x32x128xbf16, #tpu.memory_space<vmem>>, vector<1x32x128xbf16>,
    return
  }
  func.func @transform_0(%arg0: i32) -> (i32, i32, i32) {
    %c0_i32 = arith.constant 0 : i32
    %c0_i32_0 = arith.constant 0 : i32
    %c0_i32_1 = arith.constant 0 : i32
    return %arg0, %c0_i32, %c0_i32_0 : i32, i32, i32
  }
  func.func @transform_1(%arg0: i32) -> (i32, i32) {
    %c0_i32 = arith.constant 0 : i32
    %c0_i32_0 = arith.constant 0 : i32
    %c0_i32_1 = arith.constant 0 : i32
    return %c0_i32, %c0_i32_0 : i32, i32
  }
  func.func @transform_2(%arg0: i32) -> (i32, i32) {
    %c0_i32 = arith.constant 0 : i32
    %c0_i32_0 = arith.constant 0 : i32
    %c0_i32_1 = arith.constant 0 : i32
    return %c0_i32, %c0_i32_0 : i32, i32
  }
  func.func @transform_3(%arg0: i32) -> (i32, i32, i32) {
    %c0_i32 = arith.constant 0 : i32
    %c0_i32_0 = arith.constant 0 : i32
    %c0_i32_1 = arith.constant 0 : i32
    %c0_i32_2 = arith.constant 0 : i32
    return %c0_i32, %c0_i32_0, %c0_i32_1 : i32, i32, i32
  }
  func.func @transform_4(%arg0: i32) -> (i32, i32) {
    %c0_i32 = arith.constant 0 : i32
    %c0_i32_0 = arith.constant 0 : i32
    %c0_i32_1 = arith.constant 0 : i32
    return %c0_i32, %c0_i32_0 : i32, i32
  }
  func.func @transform_5(%arg0: i32) -> (i32, i32) {
    %c0_i32 = arith.constant 0 : i32
    %c0_i32_0 = arith.constant 0 : i32
    %c0_i32_1 = arith.constant 0 : i32
    return %c0_i32, %c0_i32_0 : i32, i32
  }
  func.func @transform_6(%arg0: i32) -> (i32, i32) {
    %c0_i32 = arith.constant 0 : i32
    %c0_i32_0 = arith.constant 0 : i32
    %c0_i32_1 = arith.constant 0 : i32
    return %c0_i32, %c0_i32_0 : i32, i32
  }
  func.func @transform_7(%arg0: i32) -> (i32, i32, i32) {
    %c0_i32 = arith.constant 0 : i32
    %c0_i32_0 = arith.constant 0 : i32
    %c0_i32_1 = arith.constant 0 : i32
    return %arg0, %c0_i32, %c0_i32_0 : i32, i32, i32
  }
}

module attributes {stable_mosaic.version = 11 : i64} {
  func.func @_fc_head_kernel(%arg0: i32, %arg1: memref<1x2x1568xbf16, #tpu.memory_space<vmem>>, %arg2: memref<1568x512xbf16, #tpu.memory_space<vmem>>, %arg3: memref<512x10xbf16, #tpu.memory_space<vmem>>, %arg4: memref<2x10xf32, #tpu.memory_space<vmem>>, %arg5: memref<2x512xf32, #tpu.memory_space<vmem>>, %arg6: memref<2x10xf32, #tpu.memory_space<vmem>>) attributes {dimension_semantics = [#tpu.dimension_semantics<arbitrary>], iteration_bounds = array<i64: 4>, scalar_prefetch = 0 : i64, scratch_operands = 2 : i64, tpu.core_type = #tpu.core_type<tc>, window_params = [{transform_indices = @transform_0, window_bounds = array<i64: 1, 2, 1568>}, {pipeline_mode = #tpu.pipeline_mode<synchronous>, transform_indices = @transform_1, window_bounds = array<i64: 1568, 512>}, {pipeline_mode = #tpu.pipeline_mode<synchronous>, transform_indices = @transform_2, window_bounds = array<i64: 512, 10>}, {pipeline_mode = #tpu.pipeline_mode<synchronous>, transform_indices = @transform_3, window_bounds = array<i64: 2, 10>}]} {
    %c0_i32 = arith.constant 0 : i32
    %0 = arith.cmpi eq, %arg0, %c0_i32 : i32
    %1 = arith.extui %0 : i1 to i32
    %c0_i32_0 = arith.constant 0 : i32
    %2 = arith.cmpi ne, %1, %c0_i32_0 : i32
    scf.if %2 {
      %cst_25 = arith.constant 0.000000e+00 : f32
      %36 = vector.broadcast %cst_25 : f32 to vector<2x512xf32>
      %c0_26 = arith.constant 0 : index
      %c0_27 = arith.constant 0 : index
      %37 = vector.load %arg5[%c0_26, %c0_27] : memref<2x512xf32, #tpu.memory_space<vmem>>, vector<2x512xf32>
      tpu.vector_store %arg5[%c0_26, %c0_27], %36 {strides = array<i32>} : memref<2x512xf32, #tpu.memory_space<vmem>>, vector<2x512xf32>,
      %cst_28 = arith.constant 0.000000e+00 : f32
      %38 = vector.broadcast %cst_28 : f32 to vector<2x10xf32>
      %c0_29 = arith.constant 0 : index
      %c0_30 = arith.constant 0 : index
      %39 = vector.load %arg6[%c0_29, %c0_30] : memref<2x10xf32, #tpu.memory_space<vmem>>, vector<2x10xf32>
      tpu.vector_store %arg6[%c0_29, %c0_30], %38 {strides = array<i32>} : memref<2x10xf32, #tpu.memory_space<vmem>>, vector<2x10xf32>,
      %cst_31 = arith.constant 0.000000e+00 : f32
      %40 = vector.broadcast %cst_31 : f32 to vector<2x10xf32>
      %c0_32 = arith.constant 0 : index
      %c0_33 = arith.constant 0 : index
      %41 = vector.load %arg4[%c0_32, %c0_33] : memref<2x10xf32, #tpu.memory_space<vmem>>, vector<2x10xf32>
      tpu.vector_store %arg4[%c0_32, %c0_33], %40 {strides = array<i32>} : memref<2x10xf32, #tpu.memory_space<vmem>>, vector<2x10xf32>,
    } else {
    }
    %c0 = arith.constant 0 : index
    %c0_1 = arith.constant 0 : index
    %c0_2 = arith.constant 0 : index
    %3 = vector.load %arg1[%c0, %c0_1, %c0_2] : memref<1x2x1568xbf16, #tpu.memory_space<vmem>>, vector<1x2x1568xbf16>
    %4 = vector.shape_cast %3 : vector<1x2x1568xbf16> to vector<2x1568xbf16>
    %c0_3 = arith.constant 0 : index
    %c0_4 = arith.constant 0 : index
    %5 = vector.load %arg2[%c0_3, %c0_4] : memref<1568x512xbf16, #tpu.memory_space<vmem>>, vector<1568x512xbf16>
    %cst = arith.constant dense<0.000000e+00> : vector<2x512xf32>
    %6 = tpu.matmul %4, %5, %cst {dimension_numbers = #tpu.dot_dimension_numbers<[1], [0], [0], [1], [0, 0, 1, 1], [], []>} : vector<2x1568xbf16>, vector<1568x512xbf16>, vector<2x512xf32> -> vector<2x512xf32>
    %c0_5 = arith.constant 0 : index
    %c0_6 = arith.constant 0 : index
    %7 = vector.load %arg5[%c0_5, %c0_6] : memref<2x512xf32, #tpu.memory_space<vmem>>, vector<2x512xf32>
    %8 = arith.addf %7, %6 : vector<2x512xf32>
    %cst_7 = arith.constant 1.000000e+00 : f32
    %9 = vector.broadcast %cst_7 : f32 to vector<2x512xf32>
    %10 = arith.cmpf oge, %8, %9 : vector<2x512xf32>
    %11 = arith.extui %10 : vector<2x512xi1> to vector<2x512xi32>
    %12 = arith.sitofp %11 : vector<2x512xi32> to vector<2x512xf32>
    %cst_8 = arith.constant 1.000000e+00 : f32
    %13 = vector.broadcast %cst_8 : f32 to vector<2x512xf32>
    %14 = arith.subf %13, %12 : vector<2x512xf32>
    %15 = arith.mulf %8, %14 : vector<2x512xf32>
    %c0_9 = arith.constant 0 : index
    %c0_10 = arith.constant 0 : index
    %16 = vector.load %arg5[%c0_9, %c0_10] : memref<2x512xf32, #tpu.memory_space<vmem>>, vector<2x512xf32>
    tpu.vector_store %arg5[%c0_9, %c0_10], %15 {strides = array<i32>} : memref<2x512xf32, #tpu.memory_space<vmem>>, vector<2x512xf32>,
    %17 = arith.truncf %12 : vector<2x512xf32> to vector<2x512xbf16>
    %c0_11 = arith.constant 0 : index
    %c0_12 = arith.constant 0 : index
    %18 = vector.load %arg3[%c0_11, %c0_12] : memref<512x10xbf16, #tpu.memory_space<vmem>>, vector<512x10xbf16>
    %cst_13 = arith.constant dense<0.000000e+00> : vector<2x10xf32>
    %19 = tpu.matmul %17, %18, %cst_13 {dimension_numbers = #tpu.dot_dimension_numbers<[1], [0], [0], [1], [0, 0, 1, 1], [], []>} : vector<2x512xbf16>, vector<512x10xbf16>, vector<2x10xf32> -> vector<2x10xf32>
    %c0_14 = arith.constant 0 : index
    %c0_15 = arith.constant 0 : index
    %20 = vector.load %arg6[%c0_14, %c0_15] : memref<2x10xf32, #tpu.memory_space<vmem>>, vector<2x10xf32>
    %21 = arith.addf %20, %19 : vector<2x10xf32>
    %cst_16 = arith.constant 1.000000e+00 : f32
    %22 = vector.broadcast %cst_16 : f32 to vector<2x10xf32>
    %23 = arith.cmpf oge, %21, %22 : vector<2x10xf32>
    %24 = arith.extui %23 : vector<2x10xi1> to vector<2x10xi32>
    %25 = arith.sitofp %24 : vector<2x10xi32> to vector<2x10xf32>
    %cst_17 = arith.constant 1.000000e+00 : f32
    %26 = vector.broadcast %cst_17 : f32 to vector<2x10xf32>
    %27 = arith.subf %26, %25 : vector<2x10xf32>
    %28 = arith.mulf %21, %27 : vector<2x10xf32>
    %c0_18 = arith.constant 0 : index
    %c0_19 = arith.constant 0 : index
    %29 = vector.load %arg6[%c0_18, %c0_19] : memref<2x10xf32, #tpu.memory_space<vmem>>, vector<2x10xf32>
    tpu.vector_store %arg6[%c0_18, %c0_19], %28 {strides = array<i32>} : memref<2x10xf32, #tpu.memory_space<vmem>>, vector<2x10xf32>,
    %c0_20 = arith.constant 0 : index
    %c0_21 = arith.constant 0 : index
    %30 = vector.load %arg4[%c0_20, %c0_21] : memref<2x10xf32, #tpu.memory_space<vmem>>, vector<2x10xf32>
    %31 = arith.addf %30, %25 : vector<2x10xf32>
    %c0_22 = arith.constant 0 : index
    %c0_23 = arith.constant 0 : index
    %32 = vector.load %arg4[%c0_22, %c0_23] : memref<2x10xf32, #tpu.memory_space<vmem>>, vector<2x10xf32>
    tpu.vector_store %arg4[%c0_22, %c0_23], %31 {strides = array<i32>} : memref<2x10xf32, #tpu.memory_space<vmem>>, vector<2x10xf32>,
    %c3_i32 = arith.constant 3 : i32
    %33 = arith.cmpi eq, %arg0, %c3_i32 : i32
    %34 = arith.extui %33 : i1 to i32
    %c0_i32_24 = arith.constant 0 : i32
    %35 = arith.cmpi ne, %34, %c0_i32_24 : i32
    scf.if %35 {
      %c0_25 = arith.constant 0 : index
      %c0_26 = arith.constant 0 : index
      %36 = vector.load %arg4[%c0_25, %c0_26] : memref<2x10xf32, #tpu.memory_space<vmem>>, vector<2x10xf32>
      %cst_27 = arith.constant 2.500000e-01 : f32
      %37 = vector.broadcast %cst_27 : f32 to vector<2x10xf32>
      %38 = arith.mulf %36, %37 : vector<2x10xf32>
      %c0_28 = arith.constant 0 : index
      %c0_29 = arith.constant 0 : index
      %39 = vector.load %arg4[%c0_28, %c0_29] : memref<2x10xf32, #tpu.memory_space<vmem>>, vector<2x10xf32>
      tpu.vector_store %arg4[%c0_28, %c0_29], %38 {strides = array<i32>} : memref<2x10xf32, #tpu.memory_space<vmem>>, vector<2x10xf32>,
    } else {
    }
    return
  }
  func.func @transform_0(%arg0: i32) -> (i32, i32, i32) {
    %c0_i32 = arith.constant 0 : i32
    %c0_i32_0 = arith.constant 0 : i32
    %c0_i32_1 = arith.constant 0 : i32
    return %arg0, %c0_i32, %c0_i32_0 : i32, i32, i32
  }
  func.func @transform_1(%arg0: i32) -> (i32, i32) {
    %c0_i32 = arith.constant 0 : i32
    %c0_i32_0 = arith.constant 0 : i32
    %c0_i32_1 = arith.constant 0 : i32
    return %c0_i32, %c0_i32_0 : i32, i32
  }
  func.func @transform_2(%arg0: i32) -> (i32, i32) {
    %c0_i32 = arith.constant 0 : i32
    %c0_i32_0 = arith.constant 0 : i32
    %c0_i32_1 = arith.constant 0 : i32
    return %c0_i32, %c0_i32_0 : i32, i32
  }
  func.func @transform_3(%arg0: i32) -> (i32, i32) {
    %c0_i32 = arith.constant 0 : i32
    %c0_i32_0 = arith.constant 0 : i32
    %c0_i32_1 = arith.constant 0 : i32
    return %c0_i32, %c0_i32_0 : i32, i32
  }
}

</mosaic_0001>

<bundles_post_ra>
// kernel: recurrent_stal_classifier_forward.2
= control target key start
LH: loop header
LB: loop body
LE: loop exit
PB: predicated region body
PF: predicated region fallthrough
CT: control target
= control target key end

     0   :  { %s5310_s24 = smov 0   ;;  %s7080_s0 = inlined_call_operand.vmem [shape: bf16[4,9,2048], index: 0, kind: input, shape index: {}]   ;;  %s7081_s1 = inlined_call_operand.vmem [shape: bf16[32,9], index: 1, kind: input, shape index: {}]   ;;  %s7082_s2 = inlined_call_operand.vmem [shape: f32[32,1], index: 2, kind: input, shape index: {}]   ;;  %s7083_s3 = inlined_call_operand.vmem [shape: bf16[9,32,32], index: 3, kind: input, shape index: {}]   ;;  %s7084_s4 = inlined_call_operand.vmem [shape: f32[32,1], index: 4, kind: input, shape index: {}]   ;;  %s7085_s5 = inlined_call_operand.vmem [shape: f32[1,512], index: 5, kind: input, shape index: {}]   ;;  %s7086_s6 = inlined_call_operand.vmem [shape: bf16[512,512], index: 6, kind: input, shape index: {}]   ;;  %s7087_s7 = inlined_call_operand.vmem [shape: bf16[4,32,128], index: 7, kind: output, shape index: {}]  }
   0x1 LB: > { %s4477_s25 = sadd.s32 4294967295, %s5255_s24   ;;  %p4481_p0 = scmp.ge.s32.totalorder %s5255_s24, 1  ;;  %s5255_s24 = sphi %s5310_s24, %s17_s24  }
   0x2   : > { %p237_p1 = scmp.lt.s32.totalorder %s5255_s24, 5 }
   0x4   : > { %p238_p2 = pnand %p4481_p0, %p237_p1 }
   0x6   : > { %241 = sbr.rel (%p238_p2) target bundleno = 1170 (0x492), region = 48 }
   0xd   : > { %p269_p3 = scmp.lt.s32.totalorder %s4477_s25, 3  ;;  %p4486_p4 = scmp.ne.s32.totalorder %s4477_s25, 0 }
   0xe   : > { %v5257_v0 = vmov (!%p4486_p4), 0.0  }
   0xf   : > { %s270_s26 = scalar_select %p269_p3, %s4477_s25, 3 }
  0x10   : > { %283 = sbr.rel (%p4486_p4) target bundleno = 60 (0x3c), region = 52  ;;  %284 = vst [vmem:[#allocation2] sm:$0xff] (!%p4486_p4), %v5257_v0  ;;  %285 = vst [vmem:[#allocation2 + $0x8] sm:$0xff] (!%p4486_p4), %v5257_v0 }
  0x11   : > { %s4853_s27 = sshll.u32 %s270_s26, 7  ;;  %s4854_s28 = sshll.u32 %s270_s26, 4  ;;  %286 = vst [vmem:[#allocation2 + $0x10] sm:$0xff] (!%p4486_p4), %v5257_v0  ;;  %287 = vst [vmem:[#allocation2 + $0x18] sm:$0xff] (!%p4486_p4), %v5257_v0 }
  0x12   : > { %s5321_s8 = scalar_lea.vmem %s7080_s0, %s4853_s27  ;;  %s5326_s11 = scalar_lea.vmem %s7087_s7, %s4854_s28  ;;  %288 = vst [vmem:[#allocation2 + $0x20] sm:$0xff] (!%p4486_p4), %v5257_v0  ;;  %289 = vst [vmem:[#allocation2 + $0x28] sm:$0xff] (!%p4486_p4), %v5257_v0 }
  0x13   : > { %290 = vst [vmem:[#allocation2 + $0x30] sm:$0xff] (!%p4486_p4), %v5257_v0  ;;  %291 = vst [vmem:[#allocation2 + $0x38] sm:$0xff] (!%p4486_p4), %v5257_v0 }
  0x14   : > { %292 = vst [vmem:[#allocation2 + $0x40] sm:$0xff] (!%p4486_p4), %v5257_v0  ;;  %293 = vst [vmem:[#allocation2 + $0x48] sm:$0xff] (!%p4486_p4), %v5257_v0 }
  0x15   : > { %294 = vst [vmem:[#allocation2 + $0x50] sm:$0xff] (!%p4486_p4), %v5257_v0  ;;  %295 = vst [vmem:[#allocation2 + $0x58] sm:$0xff] (!%p4486_p4), %v5257_v0 }
  0x16   : > { %296 = vst [vmem:[#allocation2 + $0x60] sm:$0xff] (!%p4486_p4), %v5257_v0  ;;  %297 = vst [vmem:[#allocation2 + $0x68] sm:$0xff] (!%p4486_p4), %v5257_v0 }
  0x17   : > { %298 = vst [vmem:[#allocation2 + $0x70] sm:$0xff] %v5257_v0  ;;  %299 = vst [vmem:[#allocation2 + $0x78] sm:$0xff] %v5257_v0 }
  0x18   : > { %300 = vst [vmem:[#allocation2 + $0x80] sm:$0xff] %v5257_v0  ;;  %301 = vst [vmem:[#allocation2 + $0x88] sm:$0xff] %v5257_v0 }
  0x19   : > { %302 = vst [vmem:[#allocation2 + $0x90] sm:$0xff] %v5257_v0  ;;  %303 = vst [vmem:[#allocation2 + $0x98] sm:$0xff] %v5257_v0 }
  0x1a   : > { %304 = vst [vmem:[#allocation2 + $0xa0] sm:$0xff] %v5257_v0  ;;  %305 = vst [vmem:[#allocation2 + $0xa8] sm:$0xff] %v5257_v0 }
  0x1b   : > { %306 = vst [vmem:[#allocation2 + $0xb0] sm:$0xff] %v5257_v0  ;;  %307 = vst [vmem:[#allocation2 + $0xb8] sm:$0xff] %v5257_v0 }
  0x1c   : > { %308 = vst [vmem:[#allocation2 + $0xc0] sm:$0xff] %v5257_v0  ;;  %309 = vst [vmem:[#allocation2 + $0xc8] sm:$0xff] %v5257_v0 }
  0x1d   : > { %310 = vst [vmem:[#allocation2 + $0xd0] sm:$0xff] %v5257_v0  ;;  %311 = vst [vmem:[#allocation2 + $0xd8] sm:$0xff] %v5257_v0 }
  0x1e   : > { %312 = vst [vmem:[#allocation2 + $0xe0] sm:$0xff] %v5257_v0  ;;  %313 = vst [vmem:[#allocation2 + $0xe8] sm:$0xff] %v5257_v0 }
  0x1f   : > { %314 = vst [vmem:[#allocation2 + $0xf0] sm:$0xff] %v5257_v0  ;;  %315 = vst [vmem:[#allocation2 + $0xf8] sm:$0xff] %v5257_v0 }
  0x20   : > { %316 = vst [vmem:[#allocation2 + $0x100] sm:$0xff] %v5257_v0  ;;  %317 = vst [vmem:[#allocation2 + $0x108] sm:$0xff] %v5257_v0 }
  0x21   : > { %318 = vst [vmem:[#allocation2 + $0x110] sm:$0xff] %v5257_v0  ;;  %319 = vst [vmem:[#allocation2 + $0x118] sm:$0xff] %v5257_v0 }
  0x22   : > { %320 = vst [vmem:[#allocation2 + $0x120] sm:$0xff] %v5257_v0  ;;  %321 = vst [vmem:[#allocation2 + $0x128] sm:$0xff] %v5257_v0 }
  0x23   : > { %322 = vst [vmem:[#allocation2 + $0x130] sm:$0xff] %v5257_v0  ;;  %323 = vst [vmem:[#allocation2 + $0x138] sm:$0xff] %v5257_v0 }
  0x24   : > { %324 = vst [vmem:[#allocation2 + $0x140] sm:$0xff] %v5257_v0  ;;  %325 = vst [vmem:[#allocation2 + $0x148] sm:$0xff] %v5257_v0 }
  0x25   : > { %326 = vst [vmem:[#allocation2 + $0x150] sm:$0xff] %v5257_v0  ;;  %327 = vst [vmem:[#allocation2 + $0x158] sm:$0xff] %v5257_v0 }
  0x26   : > { %328 = vst [vmem:[#allocation2 + $0x160] sm:$0xff] %v5257_v0  ;;  %329 = vst [vmem:[#allocation2 + $0x168] sm:$0xff] %v5257_v0 }
  0x27   : > { %330 = vst [vmem:[#allocation2 + $0x170] sm:$0xff] %v5257_v0  ;;  %331 = vst [vmem:[#allocation2 + $0x178] sm:$0xff] %v5257_v0 }
  0x28   : > { %332 = vst [vmem:[#allocation2 + $0x180] sm:$0xff] %v5257_v0  ;;  %333 = vst [vmem:[#allocation2 + $0x188] sm:$0xff] %v5257_v0 }
  0x29   : > { %334 = vst [vmem:[#allocation2 + $0x190] sm:$0xff] %v5257_v0  ;;  %335 = vst [vmem:[#allocation2 + $0x198] sm:$0xff] %v5257_v0 }
  0x2a   : > { %336 = vst [vmem:[#allocation2 + $0x1a0] sm:$0xff] %v5257_v0  ;;  %337 = vst [vmem:[#allocation2 + $0x1a8] sm:$0xff] %v5257_v0 }
  0x2b   : > { %338 = vst [vmem:[#allocation2 + $0x1b0] sm:$0xff] %v5257_v0  ;;  %339 = vst [vmem:[#allocation2 + $0x1b8] sm:$0xff] %v5257_v0 }
  0x2c   : > { %340 = vst [vmem:[#allocation2 + $0x1c0] sm:$0xff] %v5257_v0  ;;  %341 = vst [vmem:[#allocation2 + $0x1c8] sm:$0xff] %v5257_v0 }
  0x2d   : > { %342 = vst [vmem:[#allocation2 + $0x1d0] sm:$0xff] %v5257_v0  ;;  %343 = vst [vmem:[#allocation2 + $0x1d8] sm:$0xff] %v5257_v0 }
  0x2e   : > { %344 = vst [vmem:[#allocation2 + $0x1e0] sm:$0xff] %v5257_v0  ;;  %345 = vst [vmem:[#allocation2 + $0x1e8] sm:$0xff] %v5257_v0 }
  0x2f   : > { %346 = vst [vmem:[#allocation2 + $0x1f0] sm:$0xff] %v5257_v0  ;;  %347 = vst [vmem:[#allocation2 + $0x1f8] sm:$0xff] %v5257_v0 }
  0x30   : > { %348 = vst [vmem:[#allocation3] sm:$0xff] %v5257_v0  ;;  %349 = vst [vmem:[#allocation3 + $0x8] sm:$0xff] %v5257_v0 }
  0x31   : > { %350 = vst [vmem:[#allocation3 + $0x10] sm:$0xff] %v5257_v0  ;;  %351 = vst [vmem:[#allocation3 + $0x18] sm:$0xff] %v5257_v0 }
  0x32   : > { %352 = vst [vmem:[#allocation3 + $0x20] sm:$0xff] %v5257_v0  ;;  %353 = vst [vmem:[#allocation3 + $0x28] sm:$0xff] %v5257_v0 }
  0x33   : > { %354 = vst [vmem:[#allocation3 + $0x30] sm:$0xff] %v5257_v0  ;;  %355 = vst [vmem:[#allocation3 + $0x38] sm:$0xff] %v5257_v0 }
  0x34   : > { %356 = vst [vmem:[#allocation3 + $0x40] sm:$0xff] %v5257_v0  ;;  %357 = vst [vmem:[#allocation3 + $0x48] sm:$0xff] %v5257_v0 }
  0x35   : > { %358 = vst [vmem:[#allocation3 + $0x50] sm:$0xff] %v5257_v0  ;;  %359 = vst [vmem:[#allocation3 + $0x58] sm:$0xff] %v5257_v0 }
  0x36   : > { %360 = vst [vmem:[#allocation3 + $0x60] sm:$0xff] %v5257_v0  ;;  %361 = vst [vmem:[#allocation3 + $0x68] sm:$0xff] %v5257_v0 }
  0x37   : > { %362 = vst [vmem:[#allocation3 + $0x70] sm:$0xff] %v5257_v0  ;;  %363 = vst [vmem:[#allocation3 + $0x78] sm:$0xff] %v5257_v0 }
  0x38   : > { %364 = vst [vmem:[#allocation4] sm:$0xff] %v5257_v0  ;;  %369 = vst [vmem:[#allocation4 + $0x28] sm:$0xff] %v5257_v0 }
  0x39   : > { %370 = vst [vmem:[#allocation4 + $0x30] sm:$0xff] %v5257_v0  ;;  %375 = vst [vmem:[#allocation4 + $0x58] sm:$0xff] %v5257_v0 }
  0x3a   : > { %376 = vst [vmem:[#allocation4 + $0x60] sm:$0xff] %v5257_v0  ;;  %381 = vst [vmem:[#allocation4 + $0x88] sm:$0xff] %v5257_v0 }
  0x3b   : > { %382 = vst [vmem:[#allocation4 + $0x90] sm:$0xff] %v5257_v0  ;;  %387 = vst [vmem:[#allocation4 + $0xb8] sm:$0xff] %v5257_v0 }
  0x3c PF: > { %v392_v1 = vld [vmem:[%s5321_s8] sm:$0xff]  ;;  %vm513_vm0 = vcmask 1043456   ;;  %vm514_vm1 = vcmask 1044480   ;;  %v5258_v4 = vmov 65535   ;;  %v393_v6 = vld [vmem:[%s5321_s8 + $0x8] sm:$0xff]  ;;  %v7088_v12 = vmov 0  }
  0x3d   : > { %v400_v2 = vld [vmem:[%s5321_s8 + $0x40] sm:$0x11]  ;;  %v515_v5 = vsel %vm513_vm0, 4294967295, %v5258_v4  ;;  %v401_v7 = vld [vmem:[%s5321_s8 + $0x48] sm:$0x11]  ;;  %597 = vmatprep.mubr.bf16.mxu0 %v7088_v12  ;;  %650 = vmatprep.mubr.bf16.mxu1 %v7088_v12  ;;  %v394_v15 = vld [vmem:[%s5321_s8 + $0x10] sm:$0xff]  ;;  %v1551_v62 = vlaneseq }
  0x3e   : > { %v4490_v3 = vcombine.high %v392_v1, %v400_v2  ;;  %v4489_v8 = vcombine.low %v392_v1, %v400_v2  ;;  %v5420_v9 = vsel %vm514_vm1, %v515_v5, 0  ;;  %v4492_v10 = vcombine.high %v393_v6, %v401_v7  ;;  %v402_v16 = vld [vmem:[%s5321_s8 + $0x50] sm:$0x11]  ;;  %5035 = vset.pattern.permute.xlu0 %v7088_v12  ;;  %5036 = vset.pattern.permute.xlu1 %v7088_v12  ;;  %v5435_v19 = vld [vmem:[%s7081_s1] sm:$0xff]   ;;  %v395_v22 = vld [vmem:[%s5321_s8 + $0x18] sm:$0xff]  ;;  %s5260_s25 = smov 16  }
  0x3f   : > { %v4491_v11 = vcombine.low %v393_v6, %v401_v7  ;;  %v4493_v20 = vcombine.low %v394_v15, %v402_v16  ;;  %v4494_v21 = vcombine.high %v394_v15, %v402_v16  ;;  %v403_v23 = vld [vmem:[%s5321_s8 + $0x58] sm:$0x11]  ;;  %v396_v24 = vld [vmem:[%s5321_s8 + $0x20] sm:$0xff]  ;;  %vm506_vm2 = vcmask 72704   ;;  %v397_v29 = vld [vmem:[%s5321_s8 + $0x28] sm:$0xff]  ;;  %s5262_s28 = smov 17  }
  0x40   : > { %v521_v13 = vand.u32 %v4490_v3, %v5420_v9  ;;  %v518_v14 = vand.u32 %v4489_v8, %v5420_v9  ;;  %v527_v17 = vand.u32 %v4492_v10, %v5420_v9  ;;  %v404_v25 = vld [vmem:[%s5321_s8 + $0x60] sm:$0x11]  ;;  %v4495_v28 = vcombine.low %v395_v22, %v403_v23  ;;  %v405_v30 = vld [vmem:[%s5321_s8 + $0x68] sm:$0x11]  ;;  %v410_v38 = vld [vmem:[%s7082_s2 + $0x10] sm:$0xff]  ;;  %s5263_s29 = smov 15  }
  0x41   : > { %v524_v18 = vand.u32 %v4491_v11, %v5420_v9  ;;  %v533_v26 = vand.u32 %v4494_v21, %v5420_v9  ;;  %v530_v27 = vand.u32 %v4493_v20, %v5420_v9  ;;  %v4496_v31 = vcombine.high %v395_v22, %v403_v23  ;;  %v408_v34 = vld [vmem:[%s7082_s2] sm:$0xff]  ;;  %v5038_v40 = vld [vmem:[%s7081_s1 + $0x8] sm:$0xff]   ;;  %424 = vperm.xlu1 %5036, %v410_v38   ;;  %v411_v42 = vld [vmem:[%s7082_s2 + $0x18] sm:$0xff]  ;;  %s5264_s30 = smov 1   ;;  %s5266_s9 = smov 113  }
  0x42   : > { %565 = vmatprep.subr.bf16.mxu0 %v521_v13  ;;  %618 = vmatprep.subr.bf16.mxu1 %v527_v17  ;;  %v4498_v32 = vcombine.high %v396_v24, %v404_v25  ;;  %v4500_v33 = vcombine.high %v397_v29, %v405_v30  ;;  %v536_v36 = vand.u32 %v4495_v28, %v5420_v9  ;;  %v409_v41 = vld [vmem:[%s7082_s2 + $0x8] sm:$0xff]  ;;  %v398_v43 = vld [vmem:[%s5321_s8 + $0x30] sm:$0xff]  ;;  %v399_v45 = vld [vmem:[%s5321_s8 + $0x38] sm:$0xff]  ;;  %v1552_v63 = vshrl.u32 %v1551_v62, 7  ;;  %s5267_s10 = smov 112   ;;  %s5268_s12 = smov 111  }
  0x43   : > { %566 = vmatpush1.bf16.msra.mxu0 %v518_v14  ;;  %619 = vmatpush1.bf16.msra.mxu1 %v524_v18  ;;  %v539_v35 = vand.u32 %v4496_v31, %v5420_v9  ;;  %v406_v44 = vld [vmem:[%s5321_s8 + $0x70] sm:$0x11]  ;;  %v407_v46 = vld [vmem:[%s5321_s8 + $0x78] sm:$0x11]  ;;  %v4497_v47 = vcombine.low %v396_v24, %v404_v25  ;;  %v4499_v48 = vcombine.low %v397_v29, %v405_v30  ;;  %v1603_v59 = vld [vmem:[#allocation4] sm:$0xff]  ;;  %s5265_s8 = smov 127  }
  0x44   : > { %671 = vmatprep.subr.bf16.mxu0 %v533_v26  ;;  %v545_v37 = vand.u32 %v4498_v32, %v5420_v9  ;;  %v551_v39 = vand.u32 %v4500_v33, %v5420_v9  ;;  %414 = vperm.xlu0 %5035, %v408_v34   ;;  %v4502_v49 = vcombine.high %v398_v43, %v406_v44  ;;  %v1608_v60 = vld [vmem:[#allocation4 + $0x30] sm:$0xff]  ;;  %v1553_v1 = vsub.s32 0, %v1552_v63  ;;  %v1549_v2 = vld [vmem:[%s7085_s5] sm:$0xf]  ;;  %v990_v13 = vld [vmem:[#allocation2 + $0x8] sm:$0xff] }
  0x45   : > { %724 = vmatprep.subr.bf16.mxu1 %v539_v35  ;;  %429 = vperm.xlu1 %5036, %v411_v42   ;;  %v4504_v50 = vcombine.high %v399_v45, %v407_v46  ;;  %v542_v51 = vand.u32 %v4497_v47, %v5420_v9  ;;  %v548_v52 = vand.u32 %v4499_v48, %v5420_v9  ;;  %v1561_v3 = vsub.s32 2, %v1552_v63  ;;  %v989_v8 = vld [vmem:[#allocation2] sm:$0xff]  ;;  %v991_v15 = vld [vmem:[#allocation2 + $0x10] sm:$0xff]  ;;  %v992_v22 = vld [vmem:[#allocation2 + $0x18] sm:$0xff] }
  0x46   : > { %4505 = vmatmul.mubr.msk.bf16.vlgmr.msra.gmra.mrb[0].mxu0 %vm506_vm2, %v5435_v19  ;;  %4507 = vmatmul.mubr.msk.bf16.vlgmr.msra.gmra.mrb[0].mxu1 %vm506_vm2, %v5435_v19  ;;  %v557_v53 = vand.u32 %v4502_v49, %v5420_v9  ;;  %v4501_v55 = vcombine.low %v398_v43, %v406_v44  ;;  %v4503_v56 = vcombine.low %v399_v45, %v407_v46  ;;  %v1557_v4 = vsub.s32 1, %v1552_v63  ;;  %v1006_v28 = vld [vmem:[#allocation2 + $0x88] sm:$0xff]  ;;  %v1021_v49 = vld [vmem:[#allocation2 + $0x100] sm:$0xff] }
  0x47   : > { %672 = vmatpush1.bf16.msra.mxu0 %v530_v27  ;;  %607 = vmatprep.mubr.bf16.mxu0 %v7088_v12  ;;  %v563_v54 = vand.u32 %v4504_v50, %v5420_v9  ;;  %v5514_v61 = vpack.c.bf16 %v1608_v60, %v1603_v59  ;;  %v1565_v6 = vsub.s32 3, %v1552_v63  ;;  %v5528_v16 = vrot.slane %v1549_v2, %v1553_v1  ;;  %v1037_v1 = vld [vmem:[#allocation2 + $0x180] sm:$0xff] }
  0x48   : > { %660 = vmatprep.mubr.bf16.mxu1 %v7088_v12  ;;  %777 = vmatprep.subr.bf16.mxu0 %v545_v37  ;;  %v554_v57 = vand.u32 %v4501_v55, %v5420_v9  ;;  %v560_v58 = vand.u32 %v4503_v56, %v5420_v9  ;;  %v5532_v23 = vrot.slane %v1549_v2, %v1561_v3  ;;  %v1007_v3 = vld [vmem:[#allocation2 + $0x90] sm:$0xff] }
  0x49   : > { %725 = vmatpush1.bf16.msra.mxu1 %v536_v36  ;;  %419 = vperm.xlu0 %5035, %v409_v41   ;;  %7120 = vst [vmem:[#allocation5_spill] sm:$0xff] %v5514_v61  ;;  %v5534_v24 = vrot.slane %v1549_v2, %v1557_v4  ;;  %v5538_v31 = vrot.slane %v1549_v2, %v1565_v6 }
  0x4a   : > { %830 = vmatprep.subr.bf16.mxu1 %v551_v39 }
  0x4b   : > { %7121 = vst [vmem:[#allocation6_spill] sm:$0xff] %v5534_v24  ;;  %7122 = vst [vmem:[#allocation7_spill] sm:$0xff] %v5538_v31  ;;  %v1043_v24 = vld [vmem:[#allocation2 + $0x1b0] sm:$0xff] }
  0x4d   : > { %1662 = vrot.lane.b32.xlu0 %v5514_v61, %s5260_s25 }
  0x4e   : > { %4506 = vmatmul.mubr.msk.bf16.gmra.mrb[4].mxu0 %vm506_vm2, %v5038_v40  ;;  %4508 = vmatmul.mubr.msk.bf16.gmra.mrb[4].mxu1 %vm506_vm2, %v5038_v40 }
  0x4f   : > { %703 = vmatprep.mubr.bf16.mxu0 %v7088_v12  ;;  %756 = vmatprep.mubr.bf16.mxu1 %v7088_v12 }
  0x56   : > { %4509 = vmatmul.mubr.msk.bf16.vlgmr.msra.gmra.mrb[8].mxu0 %vm506_vm2, %v5435_v19  ;;  %4511 = vmatmul.mubr.msk.bf16.vlgmr.msra.gmra.mrb[8].mxu1 %vm506_vm2, %v5435_v19 }
  0x57   : > { %778 = vmatpush1.bf16.msra.mxu0 %v542_v51  ;;  %713 = vmatprep.mubr.bf16.mxu0 %v7088_v12 }
  0x58   : > { %766 = vmatprep.mubr.bf16.mxu1 %v7088_v12  ;;  %831 = vmatpush1.bf16.msra.mxu1 %v548_v52 }
  0x59   : > { %883 = vmatprep.subr.bf16.mxu0 %v557_v53  ;;  %936 = vmatprep.subr.bf16.mxu1 %v563_v54 }
  0x5e   : > { %4510 = vmatmul.mubr.msk.bf16.gmra.mrb[12].mxu0 %vm506_vm2, %v5038_v40  ;;  %4512 = vmatmul.mubr.msk.bf16.gmra.mrb[12].mxu1 %vm506_vm2, %v5038_v40 }
  0x5f   : > { %809 = vmatprep.mubr.bf16.mxu0 %v7088_v12  ;;  %862 = vmatprep.mubr.bf16.mxu1 %v7088_v12 }
  0x66   : > { %4513 = vmatmul.mubr.msk.bf16.vlgmr.msra.gmra.mrb[16].mxu0 %vm506_vm2, %v5435_v19  ;;  %4515 = vmatmul.mubr.msk.bf16.vlgmr.msra.gmra.mrb[16].mxu1 %vm506_vm2, %v5435_v19 }
  0x67   : > { %884 = vmatpush1.bf16.msra.mxu0 %v554_v57  ;;  %819 = vmatprep.mubr.bf16.mxu0 %v7088_v12  ;;  %v1022_v57 = vld [vmem:[#allocation2 + $0x108] sm:$0xff] }
  0x68   : > { %872 = vmatprep.mubr.bf16.mxu1 %v7088_v12  ;;  %937 = vmatpush1.bf16.msra.mxu1 %v560_v58 }
  0x6e   : > { %4514 = vmatmul.mubr.msk.bf16.gmra.mrb[20].mxu0 %vm506_vm2, %v5038_v40  ;;  %4516 = vmatmul.mubr.msk.bf16.gmra.mrb[20].mxu1 %vm506_vm2, %v5038_v40 }
  0x6f   : > { %915 = vmatprep.mubr.bf16.mxu0 %v7088_v12  ;;  %968 = vmatprep.mubr.bf16.mxu1 %v7088_v12 }
  0x76   : > { %4517 = vmatmul.mubr.msk.bf16.vlgmr.msra.gmra.mrb[24].mxu0 %vm506_vm2, %v5435_v19  ;;  %4519 = vmatmul.mubr.msk.bf16.vlgmr.msra.gmra.mrb[24].mxu1 %vm506_vm2, %v5435_v19  ;;  %v1005_v19 = vld [vmem:[#allocation2 + $0x80] sm:$0xff] }
  0x77   : > { %925 = vmatprep.mubr.bf16.mxu0 %v7088_v12  ;;  %978 = vmatprep.mubr.bf16.mxu1 %v7088_v12 }
  0x7e   : > { %4518 = vmatmul.mubr.msk.bf16.gmra.mrb[28].mxu0 %vm506_vm2, %v5038_v40  ;;  %4520 = vmatmul.mubr.msk.bf16.gmra.mrb[28].mxu1 %vm506_vm2, %v5038_v40  ;;  %v7096_v40 = vmov 0.0  }
  0x7f   : > { %1738 = vmatprep.mubr.bf16.mxu0 %v7088_v12  ;;  %1791 = vmatprep.mubr.bf16.mxu1 %v7088_v12 }
  0xc0   : > { %v5523_v5 = vpop.permute.xlu1 %424 }
  0xc3   : > { %v5518_v0 = vpop.permute.xlu0 %414 }
  0xc4   : > { %v5557_v50 = vpop.permute.xlu1 %429 }
  0xc8   : > { %v5525_v9 = vpop.permute.xlu0 %419 }
 0x119   : > { %v599_v7 = vpop.f32.mrb[0].mxu0  ;;  %v652_v14 = vpop.f32.mrb[0].mxu1 }
 0x11a   : > { %v600_v10 = vadd.f32 %v599_v7, %v5518_v0  ;;  %v601_v11 = vpop.f32.mrb[1].mxu0  ;;  %v653_v20 = vadd.f32 %v652_v14, %v5518_v0  ;;  %v654_v21 = vpop.f32.mrb[1].mxu1 }
 0x11b   : > { %v602_v17 = vadd.f32 %v601_v11, %v5518_v0  ;;  %v603_v18 = vpop.f32.mrb[2].mxu0  ;;  %v655_v29 = vadd.f32 %v654_v21, %v5518_v0  ;;  %v656_v30 = vpop.f32.mrb[2].mxu1  ;;  %v1038_v11 = vld [vmem:[#allocation2 + $0x188] sm:$0xff] }
 0x11c   : > { %v1053_v25 = vadd.f32 %v989_v8, %v600_v10  ;;  %v604_v26 = vadd.f32 %v603_v18, %v5525_v9  ;;  %v605_v27 = vpop.f32.mrb[3].mxu0  ;;  %v1055_v34 = vadd.f32 %v991_v15, %v653_v20  ;;  %v657_v35 = vadd.f32 %v656_v30, %v5525_v9  ;;  %v658_v36 = vpop.f32.mrb[3].mxu1 }
 0x11d   : > { %v1054_v32 = vadd.f32 %v990_v13, %v602_v17  ;;  %v606_v33 = vadd.f32 %v605_v27, %v5525_v9  ;;  %v1056_v38 = vadd.f32 %v992_v22, %v655_v29  ;;  %v659_v39 = vadd.f32 %v658_v36, %v5525_v9  ;;  %v1008_v13 = vld [vmem:[#allocation2 + $0x98] sm:$0xff]  ;;  %v993_v36 = vld [vmem:[#allocation2 + $0x20] sm:$0xff] }
 0x11e   : > { %vm1117_vm3 = vcmp.ge.f32.partialorder %v1053_v25, 1.0  ;;  %v1069_v37 = vadd.f32 %v1005_v19, %v604_v26  ;;  %vm1119_vm5 = vcmp.ge.f32.partialorder %v1055_v34, 1.0 }
 0x11f   : > { %v5544_v41 = vsel %vm1117_vm3, 1.0, %v7096_v40  ;;  %vm1118_vm4 = vcmp.ge.f32.partialorder %v1054_v32, 1.0  ;;  %v1070_v42 = vadd.f32 %v1006_v28, %v606_v33  ;;  %v5551_v45 = vsel %vm1119_vm5, 1.0, %v7096_v40 }
 0x120   : > { %v1309_v43 = vsub.f32 1.0, %v5544_v41  ;;  %v5548_v44 = vsel %vm1118_vm4, 1.0, %v7096_v40  ;;  %vm1133_vm6 = vcmp.ge.f32.partialorder %v1069_v37, 1.0  ;;  %v1311_v51 = vsub.f32 1.0, %v5551_v45 }
 0x121   : > { %v1310_v46 = vsub.f32 1.0, %v5548_v44  ;;  %v5555_v47 = vsel %vm1133_vm6, 1.0, %v7096_v40  ;;  %vm1134_vm7 = vcmp.ge.f32.partialorder %v1070_v42, 1.0  ;;  %v609_v48 = vpop.f32.mrb[4].mxu0  ;;  %v5565_v58 = vpop.f32.mrb[4].mxu1  ;;  %vm1120_vm8 = vcmp.ge.f32.partialorder %v1056_v38, 1.0 }
 0x122   : > { %v1373_v52 = vmul.f32 %v1309_v43, %v1053_v25  ;;  %v1325_v53 = vsub.f32 1.0, %v5555_v47  ;;  %v5562_v54 = vsel %vm1134_vm7, 1.0, %v7096_v40  ;;  %v610_v55 = vadd.f32 %v609_v48, %v5523_v5  ;;  %v611_v56 = vpop.f32.mrb[5].mxu0  ;;  %v5569_v4 = vpop.f32.mrb[5].mxu1  ;;  %v994_v48 = vld [vmem:[#allocation2 + $0x28] sm:$0xff] }
 0x123   : > { %7123 = vst [vmem:[#allocation8_spill] sm:$0xff] %v5562_v54  ;;  %v1374_v59 = vmul.f32 %v1310_v46, %v1054_v32  ;;  %v1326_v60 = vsub.f32 1.0, %v5562_v54  ;;  %v612_v62 = vadd.f32 %v611_v56, %v5523_v5  ;;  %v613_v63 = vpop.f32.mrb[6].mxu0  ;;  %v1375_v2 = vmul.f32 %v1311_v51, %v1055_v34  ;;  %v5572_v14 = vpop.f32.mrb[6].mxu1  ;;  %v1014_v54 = vld [vmem:[#allocation2 + $0xc8] sm:$0xff] }
 0x124   : > { %1437 = vst [vmem:[#allocation2] sm:$0xff] %v1373_v52  ;;  %v1389_v6 = vmul.f32 %v1325_v53, %v1069_v37  ;;  %v1085_v7 = vadd.f32 %v1021_v49, %v610_v55  ;;  %v614_v8 = vadd.f32 %v613_v63, %v5557_v50  ;;  %v615_v10 = vpop.f32.mrb[7].mxu0  ;;  %v5576_v19 = vsel %vm1120_vm8, 1.0, %v7096_v40  ;;  %v5578_v20 = vpop.f32.mrb[7].mxu1  ;;  %v1009_v55 = vld [vmem:[#allocation2 + $0xa0] sm:$0xff] }
 0x125   : > { %1438 = vst [vmem:[#allocation2 + $0x8] sm:$0xff] %v1374_v59  ;;  %v1390_v15 = vmul.f32 %v1326_v60, %v1070_v42  ;;  %v1086_v17 = vadd.f32 %v1022_v57, %v612_v62  ;;  %v616_v18 = vadd.f32 %v615_v10, %v5557_v50  ;;  %1439 = vst [vmem:[#allocation2 + $0x10] sm:$0xff] %v1375_v2  ;;  %v1312_v22 = vsub.f32 1.0, %v5576_v19 }
 0x126   : > { %1453 = vst [vmem:[#allocation2 + $0x80] sm:$0xff] %v1389_v6  ;;  %vm1149_vm9 = vcmp.ge.f32.partialorder %v1085_v7, 1.0  ;;  %v1101_v21 = vadd.f32 %v1037_v1, %v614_v8  ;;  %v1071_v25 = vadd.f32 %v1007_v3, %v657_v35  ;;  %v5584_v28 = vadd.f32 %v1008_v13, %v659_v39  ;;  %v1010_v1 = vld [vmem:[#allocation2 + $0xa8] sm:$0xff] }
 0x127   : > { %1454 = vst [vmem:[#allocation2 + $0x88] sm:$0xff] %v1390_v15  ;;  %v5582_v26 = vsel %vm1149_vm9, 1.0, %v7096_v40  ;;  %vm1150_vm10 = vcmp.ge.f32.partialorder %v1086_v17, 1.0  ;;  %v1102_v27 = vadd.f32 %v1038_v11, %v616_v18  ;;  %v1376_v32 = vmul.f32 %v1312_v22, %v1056_v38 }
 0x128   : > { %7124 = vst [vmem:[#allocation9_spill] sm:$0xff] %v5582_v26  ;;  %v1341_v29 = vsub.f32 1.0, %v5582_v26  ;;  %v5588_v30 = vsel %vm1150_vm10, 1.0, %v7096_v40  ;;  %vm1165_vm11 = vcmp.ge.f32.partialorder %v1101_v21, 1.0  ;;  %vm1135_vm13 = vcmp.ge.f32.partialorder %v1071_v25, 1.0 }
 0x129   : > { %7125 = vst [vmem:[#allocation10_spill] sm:$0xff] %v5588_v30  ;;  %v1342_v33 = vsub.f32 1.0, %v5588_v30  ;;  %v5592_v34 = vsel %vm1165_vm11, 1.0, %v7096_v40  ;;  %vm1166_vm12 = vcmp.ge.f32.partialorder %v1102_v27, 1.0  ;;  %v705_v35 = vpop.f32.mrb[8].mxu0  ;;  %1440 = vst [vmem:[#allocation2 + $0x18] sm:$0xff] %v1376_v32 }
 0x12a   : > { %7126 = vst [vmem:[#allocation11_spill] sm:$0xff] %v5592_v34  ;;  %v1405_v37 = vmul.f32 %v1341_v29, %v1085_v7  ;;  %v1357_v39 = vsub.f32 1.0, %v5592_v34  ;;  %v5596_v42 = vsel %vm1166_vm12, 1.0, %v7096_v40  ;;  %v706_v43 = vadd.f32 %v705_v35, %v5518_v0  ;;  %v707_v46 = vpop.f32.mrb[9].mxu0  ;;  %v5599_v38 = vpop.f32.mrb[8].mxu1  ;;  %v996_v34 = vld [vmem:[#allocation2 + $0x38] sm:$0xff] }
 0x12b   : > { %7127 = vst [vmem:[#allocation12_spill] sm:$0xff] %v5596_v42  ;;  %v1406_v49 = vmul.f32 %v1342_v33, %v1086_v17  ;;  %v1358_v51 = vsub.f32 1.0, %v5596_v42  ;;  %v708_v52 = vadd.f32 %v707_v46, %v5518_v0  ;;  %v709_v53 = vpop.f32.mrb[10].mxu0  ;;  %v5604_v56 = vsel %vm1135_vm13, 1.0, %v7096_v40  ;;  %v5606_v57 = vpop.f32.mrb[9].mxu1  ;;  %v1025_v46 = vld [vmem:[#allocation2 + $0x120] sm:$0xff] }
 0x12c   : > { %7128 = vst [vmem:[#allocation13_spill] sm:$0xff] %v5604_v56  ;;  %1469 = vst [vmem:[#allocation2 + $0x100] sm:$0xff] %v1405_v37  ;;  %v1421_v59 = vmul.f32 %v1357_v39, %v1101_v21  ;;  %v1057_v60 = vadd.f32 %v993_v36, %v706_v43  ;;  %v710_v62 = vadd.f32 %v709_v53, %v5525_v9  ;;  %v711_v63 = vpop.f32.mrb[11].mxu0  ;;  %v1327_v2 = vsub.f32 1.0, %v5604_v56  ;;  %v5610_v3 = vpop.f32.mrb[10].mxu1 }
 0x12d   : > { %1470 = vst [vmem:[#allocation2 + $0x108] sm:$0xff] %v1406_v49  ;;  %v1422_v6 = vmul.f32 %v1358_v51, %v1102_v27  ;;  %v1058_v7 = vadd.f32 %v994_v48, %v708_v52  ;;  %v712_v8 = vadd.f32 %v711_v63, %v5525_v9  ;;  %vm1136_vm14 = vcmp.ge.f32.partialorder %v5584_v28, 1.0  ;;  %v5614_v10 = vpop.f32.mrb[11].mxu1 }
 0x12e   : > { %1485 = vst [vmem:[#allocation2 + $0x180] sm:$0xff] %v1421_v59  ;;  %vm1121_vm15 = vcmp.ge.f32.partialorder %v1057_v60, 1.0  ;;  %v1073_v11 = vadd.f32 %v1009_v55, %v710_v62  ;;  %v1391_v13 = vmul.f32 %v1327_v2, %v1071_v25  ;;  %v5617_v15 = vsel %vm1136_vm14, 1.0, %v7096_v40  ;;  %v1026_v59 = vld [vmem:[#allocation2 + $0x128] sm:$0xff]  ;;  %v1041_v62 = vld [vmem:[#allocation2 + $0x1a0] sm:$0xff] }
 0x12f   : > { %7129 = vst [vmem:[#allocation14_spill] sm:$0xff] %v5617_v15  ;;  %1486 = vst [vmem:[#allocation2 + $0x188] sm:$0xff] %v1422_v6  ;;  %v5620_v17 = vsel %vm1121_vm15, 1.0, %v7096_v40  ;;  %vm1122_vm0 = vcmp.ge.f32.partialorder %v1058_v7, 1.0  ;;  %v1074_v18 = vadd.f32 %v1010_v1, %v712_v8  ;;  %v1328_v21 = vsub.f32 1.0, %v5617_v15 }
 0x130   : > { %v1313_v22 = vsub.f32 1.0, %v5620_v17  ;;  %v5627_v29 = vsel %vm1122_vm0, 1.0, %v7096_v40  ;;  %vm1137_vm1 = vcmp.ge.f32.partialorder %v1073_v11, 1.0  ;;  %1455 = vst [vmem:[#allocation2 + $0x90] sm:$0xff] %v1391_v13  ;;  %v1042_v13 = vld [vmem:[#allocation2 + $0x1a8] sm:$0xff] }
 0x131   : > { %v1314_v25 = vsub.f32 1.0, %v5627_v29  ;;  %v5633_v33 = vsel %vm1137_vm1, 1.0, %v7096_v40  ;;  %vm1138_vm2 = vcmp.ge.f32.partialorder %v1074_v18, 1.0  ;;  %v715_v35 = vpop.f32.mrb[12].mxu0  ;;  %v5641_v49 = vpop.f32.mrb[12].mxu1 }
 0x132   : > { %7130 = vst [vmem:[#allocation15_spill] sm:$0xff] %v5633_v33  ;;  %v1377_v36 = vmul.f32 %v1313_v22, %v1057_v60  ;;  %v1329_v37 = vsub.f32 1.0, %v5633_v33  ;;  %v5639_v43 = vsel %vm1138_vm2, 1.0, %v7096_v40  ;;  %v717_v48 = vpop.f32.mrb[13].mxu0  ;;  %v716_v55 = vadd.f32 %v715_v35, %v5523_v5  ;;  %v5647_v63 = vpop.f32.mrb[13].mxu1  ;;  %v1023_v22 = vld [vmem:[#allocation2 + $0x110] sm:$0xff] }
 0x133   : > { %7131 = vst [vmem:[#allocation16_spill] sm:$0xff] %v5639_v43  ;;  %v1378_v51 = vmul.f32 %v1314_v25, %v1058_v7  ;;  %v1330_v52 = vsub.f32 1.0, %v5639_v43  ;;  %v719_v60 = vpop.f32.mrb[14].mxu0  ;;  %v718_v2 = vadd.f32 %v717_v48, %v5523_v5  ;;  %v1392_v7 = vmul.f32 %v1328_v21, %v5584_v28  ;;  %v5652_v25 = vpop.f32.mrb[14].mxu1 }
 0x134   : > { %1441 = vst [vmem:[#allocation2 + $0x20] sm:$0xff] %v1377_v36  ;;  %v1393_v1 = vmul.f32 %v1329_v37, %v1073_v11  ;;  %v720_v6 = vadd.f32 %v719_v60, %v5557_v50  ;;  %v721_v8 = vpop.f32.mrb[15].mxu0  ;;  %v1089_v12 = vadd.f32 %v1025_v46, %v716_v55  ;;  %v663_v36 = vadd.f32 %v5565_v58, %v5523_v5  ;;  %v1024_v11 = vld [vmem:[#allocation2 + $0x118] sm:$0xff]  ;;  %v5657_v37 = vpop.f32.mrb[15].mxu1 }
 0x135   : > { %1442 = vst [vmem:[#allocation2 + $0x28] sm:$0xff] %v1378_v51  ;;  %v1394_v35 = vmul.f32 %v1330_v52, %v1074_v18  ;;  %v722_v53 = vadd.f32 %v721_v8, %v5557_v50  ;;  %v1090_v48 = vadd.f32 %v1026_v59, %v718_v2  ;;  %1456 = vst [vmem:[#allocation2 + $0x98] sm:$0xff] %v1392_v7 }
 0x136   : > { %1457 = vst [vmem:[#allocation2 + $0xa0] sm:$0xff] %v1393_v1  ;;  %v1105_v60 = vadd.f32 %v1041_v62, %v720_v6  ;;  %v665_v28 = vadd.f32 %v5569_v4, %v5523_v5  ;;  %v667_v21 = vadd.f32 %v5572_v14, %v5557_v50  ;;  %vm1153_vm3 = vcmp.ge.f32.partialorder %v1089_v12, 1.0  ;;  %v1039_v6 = vld [vmem:[#allocation2 + $0x190] sm:$0xff] }
 0x137   : > { %1458 = vst [vmem:[#allocation2 + $0xa8] sm:$0xff] %v1394_v35  ;;  %v1106_v18 = vadd.f32 %v1042_v13, %v722_v53  ;;  %v1087_v46 = vadd.f32 %v1023_v22, %v663_v36  ;;  %v669_v58 = vadd.f32 %v5578_v20, %v5557_v50  ;;  %v5666_v51 = vsel %vm1153_vm3, 1.0, %v7096_v40  ;;  %v1040_v22 = vld [vmem:[#allocation2 + $0x198] sm:$0xff] }
 0x138   : > { %7132 = vst [vmem:[#allocation17_spill] sm:$0xff] %v5666_v51  ;;  %vm1154_vm4 = vcmp.ge.f32.partialorder %v1090_v48, 1.0  ;;  %vm1169_vm5 = vcmp.ge.f32.partialorder %v1105_v60, 1.0  ;;  %v1088_v52 = vadd.f32 %v1024_v11, %v665_v28  ;;  %v1345_v55 = vsub.f32 1.0, %v5666_v51 }
 0x139   : > { %v5672_v14 = vsel %vm1154_vm4, 1.0, %v7096_v40  ;;  %v5675_v53 = vsel %vm1169_vm5, 1.0, %v7096_v40  ;;  %v811_v59 = vpop.f32.mrb[16].mxu0  ;;  %v5683_v8 = vpop.f32.mrb[16].mxu1  ;;  %vm1170_vm6 = vcmp.ge.f32.partialorder %v1106_v18, 1.0  ;;  %vm1151_vm7 = vcmp.ge.f32.partialorder %v1087_v46, 1.0 }
 0x13a   : > { %7133 = vst [vmem:[#allocation18_spill] sm:$0xff] %v5672_v14  ;;  %7134 = vst [vmem:[#allocation19_spill] sm:$0xff] %v5675_v53  ;;  %v1346_v20 = vsub.f32 1.0, %v5672_v14  ;;  %v1361_v1 = vsub.f32 1.0, %v5675_v53  ;;  %v813_v7 = vpop.f32.mrb[17].mxu0  ;;  %v1409_v13 = vmul.f32 %v1345_v55, %v1089_v12  ;;  %vm1152_vm8 = vcmp.ge.f32.partialorder %v1088_v52, 1.0 }
 0x13b   : > { %v5685_v35 = vpop.f32.mrb[18].mxu0  ;;  %v5687_v36 = vpop.f32.mrb[17].mxu1  ;;  %v5690_v62 = vsel %vm1170_vm6, 1.0, %v7096_v40  ;;  %v5693_v2 = vsel %vm1151_vm7, 1.0, %v7096_v40  ;;  %v1103_v27 = vadd.f32 %v1039_v6, %v667_v21  ;;  %v1104_v61 = vadd.f32 %v1040_v22, %v669_v58  ;;  %v997_v53 = vld [vmem:[#allocation2 + $0x40] sm:$0xff] }
 0x13c   : > { %v1410_v11 = vmul.f32 %v1346_v20, %v1090_v48  ;;  %v1425_v28 = vmul.f32 %v1361_v1, %v1105_v60  ;;  %7135 = vst [vmem:[#allocation20_spill] sm:$0xff] %v5690_v62  ;;  %7136 = vst [vmem:[#allocation21_spill] sm:$0xff] %v5693_v2  ;;  %v5695_v4 = vpop.f32.mrb[19].mxu0  ;;  %v5697_v39 = vpop.f32.mrb[18].mxu1  ;;  %v1362_v12 = vsub.f32 1.0, %v5690_v62  ;;  %v1343_v32 = vsub.f32 1.0, %v5693_v2 }
 0x13d   : > { %1473 = vst [vmem:[#allocation2 + $0x120] sm:$0xff] %v1409_v13  ;;  %v5704_v48 = vsel %vm1152_vm8, 1.0, %v7096_v40  ;;  %v995_v60 = vld [vmem:[#allocation2 + $0x30] sm:$0xff]  ;;  %v5706_v20 = vpop.f32.mrb[19].mxu1  ;;  %v759_v13 = vadd.f32 %v5599_v38, %v5518_v0  ;;  %v812_v42 = vadd.f32 %v811_v59, %v5518_v0  ;;  %v761_v40 = vadd.f32 %v5606_v57, %v5518_v0 }
 0x13e   : > { %1474 = vst [vmem:[#allocation2 + $0x128] sm:$0xff] %v1410_v11  ;;  %1489 = vst [vmem:[#allocation2 + $0x1a0] sm:$0xff] %v1425_v28  ;;  %v1344_v1 = vsub.f32 1.0, %v5704_v48  ;;  %v1426_v55 = vmul.f32 %v1362_v12, %v1106_v18  ;;  %v1407_v62 = vmul.f32 %v1343_v32, %v1087_v46  ;;  %vm1167_vm9 = vcmp.ge.f32.partialorder %v1103_v27, 1.0  ;;  %v998_v32 = vld [vmem:[#allocation2 + $0x48] sm:$0xff] }
 0x13f   : > { %vm1168_vm10 = vcmp.ge.f32.partialorder %v1104_v61, 1.0  ;;  %v1059_v11 = vadd.f32 %v995_v60, %v759_v13  ;;  %v7137_v21 = vmov 0.0   ;;  %v1061_v6 = vadd.f32 %v997_v53, %v812_v42 }
 0x140   : > { %v1408_v14 = vmul.f32 %v1344_v1, %v1088_v52  ;;  %1490 = vst [vmem:[#allocation2 + $0x1a8] sm:$0xff] %v1426_v55  ;;  %1471 = vst [vmem:[#allocation2 + $0x110] sm:$0xff] %v1407_v62  ;;  %v5715_v58 = vsel %vm1167_vm9, 1.0, %v7137_v21  ;;  %v5718_v38 = vsel %vm1168_vm10, 1.0, %v7137_v21  ;;  %v1060_v18 = vadd.f32 %v996_v34, %v761_v40  ;;  %v1011_v62 = vld [vmem:[#allocation2 + $0xb0] sm:$0xff]  ;;  %v1013_v55 = vld [vmem:[#allocation2 + $0xc0] sm:$0xff] }
 0x141   : > { %7138 = vst [vmem:[#allocation22_spill] sm:$0xff] %v5715_v58  ;;  %7139 = vst [vmem:[#allocation23_spill] sm:$0xff] %v5718_v38  ;;  %v5720_v46 = vpop.f32.mrb[20].mxu0  ;;  %v1359_v57 = vsub.f32 1.0, %v5715_v58  ;;  %v1360_v52 = vsub.f32 1.0, %v5718_v38  ;;  %vm1123_vm11 = vcmp.ge.f32.partialorder %v1059_v11, 1.0  ;;  %v814_v59 = vadd.f32 %v813_v7, %v5518_v0 }
 0x142   : > { %1472 = vst [vmem:[#allocation2 + $0x118] sm:$0xff] %v1408_v14  ;;  %v5725_v22 = vpop.f32.mrb[21].mxu0  ;;  %v5727_v28 = vpop.f32.mrb[20].mxu1  ;;  %v5730_v12 = vsel %vm1123_vm11, 1.0, %v7137_v21  ;;  %vm1125_vm12 = vcmp.ge.f32.partialorder %v1061_v6, 1.0  ;;  %vm1124_vm13 = vcmp.ge.f32.partialorder %v1060_v18, 1.0  ;;  %v763_v40 = vadd.f32 %v5610_v3, %v5525_v9 }
 0x143   : > { %v5734_v34 = vpop.f32.mrb[22].mxu0  ;;  %v5736_v42 = vpop.f32.mrb[21].mxu1  ;;  %v1423_v14 = vmul.f32 %v1359_v57, %v1103_v27  ;;  %v1424_v53 = vmul.f32 %v1360_v52, %v1104_v61  ;;  %v1315_v7 = vsub.f32 1.0, %v5730_v12  ;;  %v5746_v13 = vsel %vm1125_vm12, 1.0, %v7137_v21 }
 0x144   : > { %v5741_v60 = vpop.f32.mrb[23].mxu0  ;;  %v5743_v1 = vpop.f32.mrb[22].mxu1  ;;  %v5749_v3 = vsel %vm1124_vm13, 1.0, %v7137_v21  ;;  %v1062_v30 = vadd.f32 %v998_v32, %v814_v59  ;;  %v1075_v51 = vadd.f32 %v1011_v62, %v763_v40  ;;  %v1317_v27 = vsub.f32 1.0, %v5746_v13  ;;  %v1012_v59 = vld [vmem:[#allocation2 + $0xb8] sm:$0xff] }
 0x145   : > { %v5751_v26 = vpop.f32.mrb[23].mxu1  ;;  %1487 = vst [vmem:[#allocation2 + $0x190] sm:$0xff] %v1423_v14  ;;  %1488 = vst [vmem:[#allocation2 + $0x198] sm:$0xff] %v1424_v53  ;;  %v1379_v61 = vmul.f32 %v1315_v7, %v1059_v11  ;;  %v1316_v57 = vsub.f32 1.0, %v5749_v3  ;;  %v816_v43 = vadd.f32 %v5685_v35, %v5525_v9  ;;  %v765_v32 = vadd.f32 %v5614_v10, %v5525_v9  ;;  %v1027_v10 = vld [vmem:[#allocation2 + $0x130] sm:$0xff] }
 0x146   : > { %vm1126_vm14 = vcmp.ge.f32.partialorder %v1062_v30, 1.0  ;;  %vm1139_vm15 = vcmp.ge.f32.partialorder %v1075_v51, 1.0  ;;  %v1381_v62 = vmul.f32 %v1317_v27, %v1061_v6  ;;  %v771_v27 = vadd.f32 %v5647_v63, %v5523_v5 }
 0x147   : > { %1443 = vst [vmem:[#allocation2 + $0x30] sm:$0xff] %v1379_v61  ;;  %v1380_v11 = vmul.f32 %v1316_v57, %v1060_v18  ;;  %v5762_v40 = vsel %vm1126_vm14, 1.0, %v7137_v21  ;;  %v5765_v14 = vsel %vm1139_vm15, 1.0, %v7137_v21  ;;  %v1077_v52 = vadd.f32 %v1013_v55, %v816_v43  ;;  %v1028_v57 = vld [vmem:[#allocation2 + $0x138] sm:$0xff] }
 0x148   : > { %7140 = vst [vmem:[#allocation24_spill] sm:$0xff] %v5765_v14  ;;  %v1318_v53 = vsub.f32 1.0, %v5762_v40  ;;  %v1331_v7 = vsub.f32 1.0, %v5765_v14  ;;  %1445 = vst [vmem:[#allocation2 + $0x40] sm:$0xff] %v1381_v62  ;;  %v1076_v6 = vadd.f32 %v1012_v59, %v765_v32  ;;  %v818_v18 = vadd.f32 %v5695_v4, %v5525_v9 }
 0x149   : > { %v5771_v31 = vpop.f32.mrb[24].mxu0  ;;  %1444 = vst [vmem:[#allocation2 + $0x38] sm:$0xff] %v1380_v11  ;;  %v769_v61 = vadd.f32 %v5641_v49, %v5523_v5  ;;  %v5779_v35 = vpop.f32.mrb[24].mxu1  ;;  %vm1141_vm0 = vcmp.ge.f32.partialorder %v1077_v52, 1.0  ;;  %v773_v32 = vadd.f32 %v5652_v25, %v5557_v50  ;;  %v869_v38 = vadd.f32 %v5697_v39, %v5525_v9  ;;  %v1031_v39 = vld [vmem:[#allocation2 + $0x150] sm:$0xff] }
 0x14a   : > { %v5781_v43 = vpop.f32.mrb[25].mxu0  ;;  %v1382_v55 = vmul.f32 %v1318_v53, %v1062_v30  ;;  %v1395_v14 = vmul.f32 %v1331_v7, %v1075_v51  ;;  %v5785_v59 = vpop.f32.mrb[25].mxu1  ;;  %v5790_v49 = vsel %vm1141_vm0, 1.0, %v7137_v21  ;;  %vm1140_vm1 = vcmp.ge.f32.partialorder %v1076_v6, 1.0 }
 0x14b   : > { %v5787_v4 = vpop.f32.mrb[26].mxu0  ;;  %v1078_v63 = vadd.f32 %v1014_v54, %v818_v18  ;;  %v1091_v62 = vadd.f32 %v1027_v10, %v769_v61  ;;  %v5792_v11 = vpop.f32.mrb[26].mxu1  ;;  %v1333_v30 = vsub.f32 1.0, %v5790_v49  ;;  %v5798_v25 = vsel %vm1140_vm1, 1.0, %v7137_v21 }
 0x14c   : > { %v5794_v56 = vpop.f32.mrb[27].mxu0  ;;  %1446 = vst [vmem:[#allocation2 + $0x48] sm:$0xff] %v1382_v55  ;;  %1459 = vst [vmem:[#allocation2 + $0xb0] sm:$0xff] %v1395_v14  ;;  %v1092_v51 = vadd.f32 %v1028_v57, %v771_v27  ;;  %v1107_v53 = vadd.f32 %v1043_v24, %v773_v32  ;;  %v5800_v7 = vpop.f32.mrb[27].mxu1  ;;  %v1332_v33 = vsub.f32 1.0, %v5798_v25  ;;  %v1044_v55 = vld [vmem:[#allocation2 + $0x1b8] sm:$0xff] }
 0x14d   : > { %7141 = vst [vmem:[#allocation25_spill] sm:$0xff] %v5798_v25  ;;  %vm1142_vm2 = vcmp.ge.f32.partialorder %v1078_v63, 1.0  ;;  %vm1155_vm3 = vcmp.ge.f32.partialorder %v1091_v62, 1.0  ;;  %v1397_v10 = vmul.f32 %v1333_v30, %v1077_v52  ;;  %v1029_v32 = vld [vmem:[#allocation2 + $0x140] sm:$0xff]  ;;  %v775_v30 = vadd.f32 %v5657_v37, %v5557_v50 }
 0x14e   : > { %v5806_v18 = vsel %vm1142_vm2, 1.0, %v7137_v21  ;;  %v5809_v14 = vsel %vm1155_vm3, 1.0, %v7137_v21  ;;  %vm1156_vm4 = vcmp.ge.f32.partialorder %v1092_v51, 1.0  ;;  %v1396_v61 = vmul.f32 %v1332_v33, %v1076_v6 }
 0x14f   : > { %7142 = vst [vmem:[#allocation26_spill] sm:$0xff] %v5806_v18  ;;  %7143 = vst [vmem:[#allocation27_spill] sm:$0xff] %v5809_v14  ;;  %v1334_v24 = vsub.f32 1.0, %v5806_v18  ;;  %v1347_v27 = vsub.f32 1.0, %v5809_v14  ;;  %v5816_v52 = vsel %vm1156_vm4, 1.0, %v7137_v21  ;;  %vm1171_vm5 = vcmp.ge.f32.partialorder %v1107_v53, 1.0 }
 0x150   : > { %1461 = vst [vmem:[#allocation2 + $0xc0] sm:$0xff] %v1397_v10  ;;  %7144 = vst [vmem:[#allocation28_spill] sm:$0xff] %v5816_v52  ;;  %v822_v33 = vadd.f32 %v5720_v46, %v5523_v5  ;;  %v1348_v57 = vsub.f32 1.0, %v5816_v52  ;;  %v999_v14 = vld [vmem:[#allocation2 + $0x50] sm:$0xff]  ;;  %v5832_v37 = vsel %vm1171_vm5, 1.0, %v7137_v21  ;;  %v1108_v18 = vadd.f32 %v1044_v55, %v775_v30 }
 0x151   : > { %v5822_v6 = vpop.f32.mrb[28].mxu0  ;;  %1460 = vst [vmem:[#allocation2 + $0xb8] sm:$0xff] %v1396_v61  ;;  %v1398_v54 = vmul.f32 %v1334_v24, %v1078_v63  ;;  %v1411_v25 = vmul.f32 %v1347_v27, %v1091_v62  ;;  %v5827_v2 = vpop.f32.mrb[28].mxu1  ;;  %7145 = vst [vmem:[#allocation29_spill] sm:$0xff] %v5832_v37  ;;  %v865_v61 = vadd.f32 %v5683_v8, %v5518_v0  ;;  %v1030_v63 = vld [vmem:[#allocation2 + $0x148] sm:$0xff]  ;;  %v1363_v10 = vsub.f32 1.0, %v5832_v37 }
 0x152   : > { %v5829_v15 = vpop.f32.mrb[29].mxu0  ;;  %v1093_v46 = vadd.f32 %v1029_v32, %v822_v33  ;;  %v5836_v62 = vpop.f32.mrb[29].mxu1  ;;  %v1412_v27 = vmul.f32 %v1348_v57, %v1092_v51  ;;  %v824_v55 = vadd.f32 %v5725_v22, %v5523_v5  ;;  %vm1172_vm6 = vcmp.ge.f32.partialorder %v1108_v18, 1.0 }
 0x153   : > { %v5838_v24 = vpop.f32.mrb[30].mxu0  ;;  %1462 = vst [vmem:[#allocation2 + $0xc8] sm:$0xff] %v1398_v54  ;;  %1475 = vst [vmem:[#allocation2 + $0x130] sm:$0xff] %v1411_v25  ;;  %v5845_v32 = vpop.f32.mrb[30].mxu1  ;;  %v1063_v8 = vadd.f32 %v999_v14, %v865_v61  ;;  %v867_v54 = vadd.f32 %v5687_v36, %v5518_v0  ;;  %v1000_v25 = vld [vmem:[#allocation2 + $0x58] sm:$0xff]  ;;  %v1427_v57 = vmul.f32 %v1363_v10, %v1107_v53  ;;  %v5854_v33 = vsel %vm1172_vm6, 1.0, %v7137_v21 }
 0x154   : > { %v5847_v30 = vpop.f32.mrb[31].mxu0  ;;  %vm1157_vm7 = vcmp.ge.f32.partialorder %v1093_v46, 1.0  ;;  %v5851_v51 = vpop.f32.mrb[31].mxu1  ;;  %1476 = vst [vmem:[#allocation2 + $0x138] sm:$0xff] %v1412_v27  ;;  %7148 = vst [vmem:[#allocation32_spill] sm:$0xff] %v5854_v33  ;;  %v1094_v52 = vadd.f32 %v1030_v63, %v824_v55  ;;  %v1364_v37 = vsub.f32 1.0, %v5854_v33  ;;  %v826_v10 = vadd.f32 %v5734_v34, %v5557_v50 }
 0x155   : > { %7146 = vst [vmem:[#allocation30_spill] sm:$0xff] %v5847_v30  ;;  %7147 = vst [vmem:[#allocation31_spill] sm:$0xff] %v5851_v51  ;;  %v5857_v22 = vsel %vm1157_vm7, 1.0, %v7137_v21  ;;  %vm1127_vm8 = vcmp.ge.f32.partialorder %v1063_v8, 1.0  ;;  %v1045_v36 = vld [vmem:[#allocation2 + $0x1c0] sm:$0xff]  ;;  %v1064_v53 = vadd.f32 %v1000_v25, %v867_v54  ;;  %v1015_v14 = vld [vmem:[#allocation2 + $0xd0] sm:$0xff] }
 0x156   : > { %v1349_v61 = vsub.f32 1.0, %v5857_v22  ;;  %1491 = vst [vmem:[#allocation2 + $0x1b0] sm:$0xff] %v1427_v57  ;;  %v5864_v27 = vsel %vm1127_vm8, 1.0, %v7137_v21  ;;  %vm1158_vm9 = vcmp.ge.f32.partialorder %v1094_v52, 1.0  ;;  %v1428_v58 = vmul.f32 %v1364_v37, %v1108_v18  ;;  %v1046_v30 = vld [vmem:[#allocation2 + $0x1c8] sm:$0xff]  ;;  %v1016_v54 = vld [vmem:[#allocation2 + $0xd8] sm:$0xff] }
 0x157   : > { %v1319_v55 = vsub.f32 1.0, %v5864_v27  ;;  %v5870_v51 = vsel %vm1158_vm9, 1.0, %v7137_v21  ;;  %vm1128_vm10 = vcmp.ge.f32.partialorder %v1064_v53, 1.0  ;;  %v1109_v57 = vadd.f32 %v1045_v36, %v826_v10 }
 0x158   : > { %v1413_v63 = vmul.f32 %v1349_v61, %v1093_v46  ;;  %v1350_v33 = vsub.f32 1.0, %v5870_v51  ;;  %1492 = vst [vmem:[#allocation2 + $0x1b8] sm:$0xff] %v1428_v58  ;;  %v5876_v18 = vsel %vm1128_vm10, 1.0, %v7137_v21  ;;  %v828_v37 = vadd.f32 %v5741_v60, %v5557_v50 }
 0x159   : > { %v1383_v34 = vmul.f32 %v1319_v55, %v1063_v8  ;;  %v871_v46 = vadd.f32 %v5706_v20, %v5525_v9  ;;  %v1320_v61 = vsub.f32 1.0, %v5876_v18  ;;  %vm1173_vm11 = vcmp.ge.f32.partialorder %v1109_v57, 1.0 }
 0x15a   : > { %1477 = vst [vmem:[#allocation2 + $0x140] sm:$0xff] %v1413_v63  ;;  %v1414_v25 = vmul.f32 %v1350_v33, %v1094_v52  ;;  %v1079_v36 = vadd.f32 %v1015_v14, %v869_v38  ;;  %v5884_v58 = vsel %vm1173_vm11, 1.0, %v7137_v21  ;;  %v1110_v8 = vadd.f32 %v1046_v30, %v828_v37  ;;  %v1032_v52 = vld [vmem:[#allocation2 + $0x158] sm:$0xff]  ;;  %v1047_v37 = vld [vmem:[#allocation2 + $0x1d0] sm:$0xff] }
 0x15b   : > { %1447 = vst [vmem:[#allocation2 + $0x50] sm:$0xff] %v1383_v34  ;;  %v1080_v10 = vadd.f32 %v1016_v54, %v871_v46  ;;  %v875_v63 = vadd.f32 %v5727_v28, %v5523_v5  ;;  %v1384_v60 = vmul.f32 %v1320_v61, %v1064_v53  ;;  %v1365_v55 = vsub.f32 1.0, %v5884_v58  ;;  %v1048_v46 = vld [vmem:[#allocation2 + $0x1d8] sm:$0xff] }
 0x15c   : > { %1478 = vst [vmem:[#allocation2 + $0x148] sm:$0xff] %v1414_v25  ;;  %vm1143_vm12 = vcmp.ge.f32.partialorder %v1079_v36, 1.0  ;;  %v877_v20 = vadd.f32 %v5736_v42, %v5523_v5  ;;  %vm1174_vm13 = vcmp.ge.f32.partialorder %v1110_v8, 1.0  ;;  %v879_v61 = vadd.f32 %v5743_v1, %v5557_v50 }
 0x15d   : > { %v5892_v38 = vsel %vm1143_vm12, 1.0, %v7137_v21  ;;  %vm1144_vm14 = vcmp.ge.f32.partialorder %v1080_v10, 1.0  ;;  %v1095_v33 = vadd.f32 %v1031_v39, %v875_v63  ;;  %1448 = vst [vmem:[#allocation2 + $0x58] sm:$0xff] %v1384_v60  ;;  %v1429_v30 = vmul.f32 %v1365_v55, %v1109_v57 }
 0x15e   : > { %v1335_v14 = vsub.f32 1.0, %v5892_v38  ;;  %v5896_v28 = vsel %vm1174_vm13, 1.0, %v7137_v21  ;;  %v5899_v53 = vsel %vm1144_vm14, 1.0, %v7137_v21  ;;  %v1096_v34 = vadd.f32 %v1032_v52, %v877_v20 }
 0x15f   : > { %7149 = vst [vmem:[#allocation33_spill] sm:$0xff] %v5896_v28  ;;  %v1366_v54 = vsub.f32 1.0, %v5896_v28  ;;  %v1336_v42 = vsub.f32 1.0, %v5899_v53  ;;  %vm1159_vm15 = vcmp.ge.f32.partialorder %v1095_v33, 1.0  ;;  %1493 = vst [vmem:[#allocation2 + $0x1c0] sm:$0xff] %v1429_v30  ;;  %v881_v39 = vadd.f32 %v5751_v26, %v5557_v50  ;;  %v1001_v28 = vld [vmem:[#allocation2 + $0x60] sm:$0xff] }
 0x160   : > { %v1399_v25 = vmul.f32 %v1335_v14, %v1079_v36  ;;  %v5904_v57 = vsel %vm1159_vm15, 1.0, %v7137_v21  ;;  %vm1160_vm0 = vcmp.ge.f32.partialorder %v1096_v34, 1.0  ;;  %v1111_v36 = vadd.f32 %v1047_v37, %v879_v61  ;;  %v1003_v14 = vld [vmem:[#allocation2 + $0x70] sm:$0xff] }
 0x161   : > { %v1430_v63 = vmul.f32 %v1366_v54, %v1110_v8  ;;  %v1400_v60 = vmul.f32 %v1336_v42, %v1080_v10  ;;  %v1351_v55 = vsub.f32 1.0, %v5904_v57  ;;  %v5912_v20 = vsel %vm1160_vm0, 1.0, %v7137_v21  ;;  %v1002_v54 = vld [vmem:[#allocation2 + $0x68] sm:$0xff] }
 0x162   : > { %1463 = vst [vmem:[#allocation2 + $0xd0] sm:$0xff] %v1399_v25  ;;  %v1112_v52 = vadd.f32 %v1048_v46, %v881_v39  ;;  %v918_v30 = vadd.f32 %v5771_v31, %v5518_v0  ;;  %v1352_v26 = vsub.f32 1.0, %v5912_v20  ;;  %v971_v8 = vadd.f32 %v5779_v35, %v5518_v0  ;;  %v1004_v31 = vld [vmem:[#allocation2 + $0x78] sm:$0xff] }
 0x163   : > { %1494 = vst [vmem:[#allocation2 + $0x1c8] sm:$0xff] %v1430_v63  ;;  %1464 = vst [vmem:[#allocation2 + $0xd8] sm:$0xff] %v1400_v60  ;;  %v1415_v1 = vmul.f32 %v1351_v55, %v1095_v33  ;;  %v920_v10 = vadd.f32 %v5781_v43, %v5518_v0  ;;  %vm1175_vm1 = vcmp.ge.f32.partialorder %v1111_v36, 1.0  ;;  %v973_v37 = vadd.f32 %v5785_v59, %v5518_v0 }
 0x164   : > { %vm1176_vm2 = vcmp.ge.f32.partialorder %v1112_v52, 1.0  ;;  %v1065_v42 = vadd.f32 %v1001_v28, %v918_v30  ;;  %v1416_v46 = vmul.f32 %v1352_v26, %v1096_v34  ;;  %v5924_v33 = vsel %vm1175_vm1, 1.0, %v7137_v21  ;;  %v1017_v28 = vld [vmem:[#allocation2 + $0xe0] sm:$0xff] }
 0x165   : > { %1479 = vst [vmem:[#allocation2 + $0x150] sm:$0xff] %v1415_v1  ;;  %v5927_v25 = vsel %vm1176_vm2, 1.0, %v7137_v21  ;;  %v1067_v35 = vadd.f32 %v1003_v14, %v971_v8  ;;  %v1367_v61 = vsub.f32 1.0, %v5924_v33  ;;  %v1066_v39 = vadd.f32 %v1002_v54, %v920_v10 }
 0x166   : > { %v1368_v43 = vsub.f32 1.0, %v5927_v25  ;;  %vm1129_vm3 = vcmp.ge.f32.partialorder %v1065_v42, 1.0  ;;  %1480 = vst [vmem:[#allocation2 + $0x158] sm:$0xff] %v1416_v46  ;;  %v1068_v59 = vadd.f32 %v1004_v31, %v973_v37  ;;  %v922_v34 = vadd.f32 %v5787_v4, %v5525_v9  ;;  %v1019_v46 = vld [vmem:[#allocation2 + $0xf0] sm:$0xff] }
 0x167   : > { %v4533_v0 = vsel %vm1129_vm3, 1.0, %v7137_v21  ;;  %vm1131_vm4 = vcmp.ge.f32.partialorder %v1067_v35, 1.0  ;;  %v1431_v63 = vmul.f32 %v1367_v61, %v1111_v36  ;;  %vm1130_vm5 = vcmp.ge.f32.partialorder %v1066_v39, 1.0 }
 0x168   : > { %v1432_v60 = vmul.f32 %v1368_v43, %v1112_v52  ;;  %v1321_v55 = vsub.f32 1.0, %v4533_v0  ;;  %v1517_v30 = vmax.f32 %v5746_v13, %v4533_v0  ;;  %v4535_v14 = vsel %vm1131_vm4, 1.0, %v7137_v21 }
 0x169   : > { %vm1132_vm6 = vcmp.ge.f32.partialorder %v1068_v59, 1.0  ;;  %v1081_v1 = vadd.f32 %v1017_v28, %v922_v34  ;;  %1495 = vst [vmem:[#allocation2 + $0x1d0] sm:$0xff] %v1431_v63  ;;  %v7150_v8 = vmax.f32 %v5544_v41, %v5620_v17  ;;  %v1323_v54 = vsub.f32 1.0, %v4535_v14 }
 0x16a   : > { %1496 = vst [vmem:[#allocation2 + $0x1d8] sm:$0xff] %v1432_v60  ;;  %v1385_v26 = vmul.f32 %v1321_v55, %v1065_v42  ;;  %v1519_v4 = vmax.f32 %v5864_v27, %v4535_v14  ;;  %v4534_v36 = vsel %vm1130_vm5, 1.0, %v7137_v21  ;;  %v4536_v52 = vsel %vm1132_vm6, 1.0, %v7137_v21  ;;  %v1018_v55 = vld [vmem:[#allocation2 + $0xe8] sm:$0xff] }
 0x16b   : > { %v1533_v10 = vmax.f32 %v7150_v8, %v1517_v30  ;;  %vm1145_vm7 = vcmp.ge.f32.partialorder %v1081_v1, 1.0  ;;  %v975_v13 = vadd.f32 %v5792_v11, %v5525_v9  ;;  %v1387_v42 = vmul.f32 %v1323_v54, %v1067_v35  ;;  %v1020_v30 = vld [vmem:[#allocation2 + $0xf8] sm:$0xff] }
 0x16c   : > { %1449 = vst [vmem:[#allocation2 + $0x60] sm:$0xff] %v1385_v26  ;;  %v7151_v41 = vmax.f32 %v5551_v45, %v5730_v12  ;;  %v1322_v31 = vsub.f32 1.0, %v4534_v36  ;;  %v1518_v27 = vmax.f32 %v5762_v40, %v4534_v36  ;;  %v1324_v61 = vsub.f32 1.0, %v4536_v52  ;;  %v7154_v26 = vld [vmem:[#allocation15_spill] sm:$0xff] }
 0x16d   : > { %v5945_v37 = vmul.f32 %v5528_v16, %v1533_v10  ;;  %v1520_v43 = vmax.f32 %v5876_v18, %v4536_v52  ;;  %v4549_v28 = vsel %vm1145_vm7, 1.0, %v7137_v21  ;;  %1451 = vst [vmem:[#allocation2 + $0x70] sm:$0xff] %v1387_v42  ;;  %v7152_v45 = vmax.f32 %v5548_v44, %v5627_v29  ;;  %v1033_v29 = vld [vmem:[#allocation2 + $0x160] sm:$0xff]  ;;  %v1034_v42 = vld [vmem:[#allocation2 + $0x168] sm:$0xff] }
 0x16e   : > { %v1535_v17 = vmax.f32 %v7151_v41, %v1519_v4  ;;  %v1386_v0 = vmul.f32 %v1322_v31, %v1066_v39  ;;  %v1337_v34 = vsub.f32 1.0, %v4549_v28  ;;  %v1521_v35 = vmax.f32 %v5790_v49, %v4549_v28  ;;  %v7158_v31 = vld [vmem:[#allocation13_spill] sm:$0xff]  ;;  %v7161_v28 = vld [vmem:[#allocation26_spill] sm:$0xff] }
 0x16f   : > { %v1534_v12 = vmax.f32 %v7152_v45, %v1518_v27  ;;  %v1388_v63 = vmul.f32 %v1324_v61, %v1068_v59  ;;  %v7153_v40 = vmax.f32 %v5576_v19, %v5749_v3  ;;  %v1083_v18 = vadd.f32 %v1019_v46, %v975_v13  ;;  %v7156_v59 = vld [vmem:[#allocation6_spill] sm:$0xff]  ;;  %v7157_v19 = vld [vmem:[#allocation7_spill] sm:$0xff]  ;;  %v7159_v46 = vld [vmem:[#allocation24_spill] sm:$0xff] }
 0x170   : > { %v5954_v11 = vmul.f32 %v5532_v23, %v1535_v17  ;;  %1450 = vst [vmem:[#allocation2 + $0x68] sm:$0xff] %v1386_v0  ;;  %v1401_v14 = vmul.f32 %v1337_v34, %v1081_v1  ;;  %v7155_v39 = vmax.f32 %v5555_v47, %v7154_v26  ;;  %v924_v49 = vadd.f32 %v5794_v56, %v5525_v9  ;;  %v1035_v13 = vld [vmem:[#allocation2 + $0x170] sm:$0xff] }
 0x171   : > { %v1536_v60 = vmax.f32 %v7153_v40, %v1520_v43  ;;  %v977_v44 = vadd.f32 %v5800_v7, %v5525_v9  ;;  %v5971_v10 = vmul.f32 %v7156_v59, %v1534_v12  ;;  %1452 = vst [vmem:[#allocation2 + $0x78] sm:$0xff] %v1388_v63  ;;  %vm1147_vm8 = vcmp.ge.f32.partialorder %v1083_v18, 1.0  ;;  %v7162_v63 = vld [vmem:[#allocation8_spill] sm:$0xff] }
 0x172   : > { %v1537_v8 = vmax.f32 %v7155_v39, %v1521_v35  ;;  %v928_v1 = vadd.f32 %v5822_v6, %v5523_v5  ;;  %1465 = vst [vmem:[#allocation2 + $0xe0] sm:$0xff] %v1401_v14  ;;  %v4551_v56 = vsel %vm1147_vm8, 1.0, %v7137_v21  ;;  %v1082_v54 = vadd.f32 %v1018_v55, %v924_v49  ;;  %v7163_v40 = vld [vmem:[#allocation16_spill] sm:$0xff]  ;;  %v7166_v14 = vld [vmem:[#allocation25_spill] sm:$0xff] }
 0x173   : > { %v5974_v3 = vmul.f32 %v7157_v19, %v1536_v60  ;;  %v1084_v9 = vadd.f32 %v1020_v30, %v977_v44  ;;  %v1339_v7 = vsub.f32 1.0, %v4551_v56  ;;  %v1523_v4 = vmax.f32 %v5892_v38, %v4551_v56  ;;  %v7165_v30 = vld [vmem:[#allocation14_spill] sm:$0xff]  ;;  %v1049_v56 = vld [vmem:[#allocation2 + $0x1e0] sm:$0xff] }
 0x174   : > { %v5979_v47 = vmul.f32 %v5528_v16, %v1537_v8  ;;  %v1097_v36 = vadd.f32 %v1033_v29, %v928_v1  ;;  %v981_v52 = vadd.f32 %v5827_v2, %v5523_v5  ;;  %vm1146_vm9 = vcmp.ge.f32.partialorder %v1082_v54, 1.0 }
 0x175   : > { %vm1148_vm10 = vcmp.ge.f32.partialorder %v1084_v9, 1.0  ;;  %v930_v6 = vadd.f32 %v5829_v15, %v5523_v5  ;;  %v983_v41 = vadd.f32 %v5836_v62, %v5523_v5  ;;  %v1403_v17 = vmul.f32 %v1339_v7, %v1083_v18  ;;  %v1036_v15 = vld [vmem:[#allocation2 + $0x178] sm:$0xff] }
 0x176   : > { %v7160_v27 = vmax.f32 %v7158_v31, %v7159_v46  ;;  %v4550_v38 = vsel %vm1146_vm9, 1.0, %v7137_v21  ;;  %v4552_v43 = vsel %vm1148_vm10, 1.0, %v7137_v21  ;;  %vm1161_vm11 = vcmp.ge.f32.partialorder %v1097_v36, 1.0 }
 0x177   : > { %v1338_v2 = vsub.f32 1.0, %v4550_v38  ;;  %v1522_v0 = vmax.f32 %v7161_v28, %v4550_v38  ;;  %v1340_v34 = vsub.f32 1.0, %v4552_v43  ;;  %v1524_v35 = vmax.f32 %v5899_v53, %v4552_v43  ;;  %1467 = vst [vmem:[#allocation2 + $0xf0] sm:$0xff] %v1403_v17  ;;  %v7171_v43 = vld [vmem:[#allocation21_spill] sm:$0xff] }
 0x178   : > { %v1539_v61 = vmax.f32 %v7160_v27, %v1523_v4  ;;  %v1099_v5 = vadd.f32 %v1035_v13, %v981_v52  ;;  %v1098_v62 = vadd.f32 %v1034_v42, %v930_v6  ;;  %v7164_v60 = vmax.f32 %v7162_v63, %v7163_v40  ;;  %v7168_v52 = vld [vmem:[#allocation9_spill] sm:$0xff] }
 0x179   : > { %v1402_v12 = vmul.f32 %v1338_v2, %v1082_v54  ;;  %v1404_v55 = vmul.f32 %v1340_v34, %v1084_v9  ;;  %v7167_v26 = vmax.f32 %v7165_v30, %v7166_v14  ;;  %v4565_v53 = vsel %vm1161_vm11, 1.0, %v7137_v21  ;;  %v7169_v13 = vld [vmem:[#allocation17_spill] sm:$0xff]  ;;  %v7174_v34 = vld [vmem:[#allocation10_spill] sm:$0xff] }
 0x17a   : > { %v5997_v45 = vmul.f32 %v5532_v23, %v1539_v61  ;;  %v1538_v18 = vmax.f32 %v7164_v60, %v1522_v0  ;;  %vm1163_vm12 = vcmp.ge.f32.partialorder %v1099_v5, 1.0  ;;  %vm1162_vm13 = vcmp.ge.f32.partialorder %v1098_v62, 1.0 }
 0x17b   : > { %v1540_v39 = vmax.f32 %v7167_v26, %v1524_v35  ;;  %v1100_v8 = vadd.f32 %v1036_v15, %v983_v41  ;;  %1466 = vst [vmem:[#allocation2 + $0xe8] sm:$0xff] %v1402_v12  ;;  %1468 = vst [vmem:[#allocation2 + $0xf8] sm:$0xff] %v1404_v55  ;;  %v1353_v29 = vsub.f32 1.0, %v4565_v53  ;;  %v1525_v1 = vmax.f32 %v5857_v22, %v4565_v53  ;;  %v7175_v35 = vld [vmem:[#allocation18_spill] sm:$0xff] }
 0x17c   : > { %v1576_v49 = vmul.f32 %v7156_v59, %v1538_v18  ;;  %v4567_v54 = vsel %vm1163_vm12, 1.0, %v7137_v21  ;;  %v4566_v9 = vsel %vm1162_vm13, 1.0, %v7137_v21  ;;  %v932_v7 = vadd.f32 %v5838_v24, %v5557_v50  ;;  %v7172_v24 = vld [vmem:[#allocation27_spill] sm:$0xff]  ;;  %v7177_v18 = vld [vmem:[#allocation28_spill] sm:$0xff]  ;;  %v1050_v26 = vld [vmem:[#allocation2 + $0x1e8] sm:$0xff] }
 0x17d   : > { %v1578_v44 = vmul.f32 %v7157_v19, %v1540_v39  ;;  %vm1164_vm14 = vcmp.ge.f32.partialorder %v1100_v8, 1.0  ;;  %v1417_v4 = vmul.f32 %v1353_v29, %v1097_v36  ;;  %v7170_v6 = vmax.f32 %v7168_v52, %v7169_v13  ;;  %v1052_v39 = vld [vmem:[#allocation2 + $0x1f8] sm:$0xff] }
 0x17e   : > { %v1355_v41 = vsub.f32 1.0, %v4567_v54  ;;  %v1527_v17 = vmax.f32 %v5904_v57, %v4567_v54  ;;  %v1354_v31 = vsub.f32 1.0, %v4566_v9  ;;  %v1526_v22 = vmax.f32 %v5870_v51, %v4566_v9  ;;  %v1051_v51 = vld [vmem:[#allocation2 + $0x1f0] sm:$0xff] }
 0x17f   : > { %v1541_v42 = vmax.f32 %v7170_v6, %v1525_v1  ;;  %v4568_v46 = vsel %vm1164_vm14, 1.0, %v7137_v21  ;;  %v1113_v27 = vadd.f32 %v1049_v56, %v932_v7  ;;  %1481 = vst [vmem:[#allocation2 + $0x160] sm:$0xff] %v1417_v4  ;;  %v7173_v36 = vmax.f32 %v7171_v43, %v7172_v24  ;;  %v7180_v1 = vld [vmem:[#allocation31_spill] sm:$0xff] }
 0x180   : > { %v1419_v38 = vmul.f32 %v1355_v41, %v1099_v5  ;;  %v1356_v28 = vsub.f32 1.0, %v4568_v46  ;;  %v1418_v0 = vmul.f32 %v1354_v31, %v1098_v62  ;;  %v7176_v15 = vmax.f32 %v7174_v34, %v7175_v35  ;;  %v7181_v9 = vld [vmem:[#allocation11_spill] sm:$0xff]  ;;  %v1613_v41 = vld [vmem:[#allocation4 + $0x60] sm:$0xff] }
 0x181   : > { %v1579_v61 = vmul.f32 %v5528_v16, %v1541_v42  ;;  %v1543_v2 = vmax.f32 %v7173_v36, %v1527_v17  ;;  %v1528_v12 = vmax.f32 %v5912_v20, %v4568_v46  ;;  %vm1177_vm15 = vcmp.ge.f32.partialorder %v1113_v27, 1.0  ;;  %v7182_v7 = vld [vmem:[#allocation19_spill] sm:$0xff]  ;;  %v7185_v46 = vld [vmem:[#allocation29_spill] sm:$0xff] }
 0x182   : > { %v1542_v57 = vmax.f32 %v7176_v15, %v1526_v22  ;;  %1483 = vst [vmem:[#allocation2 + $0x170] sm:$0xff] %v1419_v38  ;;  %v1420_v40 = vmul.f32 %v1356_v28, %v1100_v8  ;;  %v4581_v5 = vsel %vm1177_vm15, 1.0, %v7137_v21  ;;  %v985_v60 = vadd.f32 %v5845_v32, %v5557_v50  ;;  %1482 = vst [vmem:[#allocation2 + $0x168] sm:$0xff] %v1418_v0  ;;  %v7179_v8 = vld [vmem:[#allocation30_spill] sm:$0xff]  ;;  %v1618_v17 = vld [vmem:[#allocation4 + $0x90] sm:$0xff] }
 0x183   : > { %v1581_v63 = vmul.f32 %v5532_v23, %v1543_v2  ;;  %v7178_v55 = vmax.f32 %v5704_v48, %v7177_v18  ;;  %v1369_v14 = vsub.f32 1.0, %v4581_v5  ;;  %v1529_v20 = vmax.f32 %v5884_v58, %v4581_v5  ;;  %v7184_v22 = vld [vmem:[#allocation22_spill] sm:$0xff]  ;;  %v7188_v28 = vld [vmem:[#allocation12_spill] sm:$0xff] }
 0x184   : > { %v1580_v62 = vmul.f32 %v7156_v59, %v1542_v57  ;;  %1484 = vst [vmem:[#allocation2 + $0x178] sm:$0xff] %v1420_v40  ;;  %v1115_v53 = vadd.f32 %v1051_v51, %v985_v60  ;;  %v934_v29 = vadd.f32 %v7179_v8, %v5557_v50  ;;  %v987_v32 = vadd.f32 %v7180_v1, %v5557_v50  ;;  %v7189_v0 = vld [vmem:[#allocation20_spill] sm:$0xff]  ;;  %v7191_v57 = vld [vmem:[#allocation23_spill] sm:$0xff]  ;;  %v2488_v1 = vld [vmem:[#allocation4 + $0x88] sm:$0xff] }
 0x185   : > { %v1544_v30 = vmax.f32 %v7178_v55, %v1528_v12  ;;  %v6042_v56 = vpack.c.bf16 %v5979_v47, %v5945_v37  ;;  %v1433_v54 = vmul.f32 %v1369_v14, %v1113_v27  ;;  %v7183_v58 = vmax.f32 %v7181_v9, %v7182_v7  ;;  %v7192_v12 = vld [vmem:[#allocation32_spill] sm:$0xff]  ;;  %v6224_v9 = vld [vmem:[%s7083_s3 + $0x10] sm:$0xff]  }
 0x186   : > { %v6049_v52 = vpack.c.bf16 %v1576_v49, %v5971_v10  ;;  %vm1179_vm0 = vcmp.ge.f32.partialorder %v1115_v53, 1.0  ;;  %v1114_v13 = vadd.f32 %v1050_v26, %v934_v29  ;;  %v1116_v6 = vadd.f32 %v1052_v39, %v987_v32  ;;  %v2483_v26 = vld [vmem:[#allocation4 + $0x58] sm:$0xff] }
 0x187   : > { %v1582_v48 = vmul.f32 %v7157_v19, %v1544_v30  ;;  %v1545_v4 = vmax.f32 %v7183_v58, %v1529_v20  ;;  %1664 = vrot.lane.b32.xlu0 %v6042_v56, %s5260_s25  ;;  %v6055_v50 = vpack.c.bf16 %v5997_v45, %v5954_v11  ;;  %1497 = vst [vmem:[#allocation2 + $0x1e0] sm:$0xff] %v1433_v54  ;;  %v4583_v47 = vsel %vm1179_vm0, 1.0, %v7137_v21  ;;  %v2478_v20 = vld [vmem:[#allocation4 + $0x28] sm:$0xff]  ;;  %v2493_v32 = vld [vmem:[#allocation4 + $0xb8] sm:$0xff] }
 0x188   : > { %1666 = vrot.lane.b32.xlu1 %v6049_v52, %s5260_s25  ;;  %v6062_v10 = vpack.c.bf16 %v1578_v44, %v5974_v3  ;;  %v1371_v49 = vsub.f32 1.0, %v4583_v47  ;;  %v1531_v42 = vmax.f32 %v5924_v33, %v4583_v47  ;;  %vm1178_vm1 = vcmp.ge.f32.partialorder %v1114_v13, 1.0  ;;  %v7187_v44 = vld [vmem:[#allocation33_spill] sm:$0xff] }
 0x189   : > { %v1583_v37 = vmul.f32 %v5528_v16, %v1545_v4  ;;  %vm1180_vm2 = vcmp.ge.f32.partialorder %v1116_v6, 1.0  ;;  %v4582_v11 = vsel %vm1178_vm1, 1.0, %v7137_v21  ;;  %v7186_v27 = vmax.f32 %v7184_v22, %v7185_v46 }
 0x18a   : > { %v4584_v45 = vsel %vm1180_vm2, 1.0, %v7137_v21  ;;  %v1435_v31 = vmul.f32 %v1371_v49, %v1115_v53  ;;  %v1370_v3 = vsub.f32 1.0, %v4582_v11  ;;  %v1530_v43 = vmax.f32 %v7187_v44, %v4582_v11 }
 0x18b   : > { %v6067_v16 = vpack.c.bf16 %v1583_v37, %v1579_v61  ;;  %v1547_v38 = vmax.f32 %v7186_v27, %v1531_v42  ;;  %v1372_v24 = vsub.f32 1.0, %v4584_v45  ;;  %v1532_v33 = vmax.f32 %v5927_v25, %v4584_v45  ;;  %v6242_v42 = vld [vmem:[%s7083_s3 + $0x18] sm:$0xff]   ;;  %v6266_v27 = vld [vmem:[%s7083_s3] sm:$0xff]  }
 0x18c   : > { %v1632_v36 = vpack.c.bf16 %v1618_v17, %v1613_v41  ;;  %1499 = vst [vmem:[#allocation2 + $0x1f0] sm:$0xff] %v1435_v31  ;;  %v1434_v61 = vmul.f32 %v1370_v3, %v1114_v13  ;;  %v7190_v34 = vmax.f32 %v7188_v28, %v7189_v0  ;;  %v7193_v51 = vmax.f32 %v7191_v57, %v7192_v12  ;;  %v3234_v57 = vld [vmem:[%s7084_s4] sm:$0xff] }
 0x18d   : > { %1674 = vrot.lane.b32.xlu1 %v6067_v16, %s5260_s25  ;;  %v1585_v2 = vmul.f32 %v5532_v23, %v1547_v38  ;;  %v1436_v15 = vmul.f32 %v1372_v24, %v1116_v6  ;;  %vm1682_vm3 = vcmask 130048   ;;  %v6210_v53 = vpack.c.bf16 %v2483_v26, %v2478_v20  ;;  %v6312_v12 = vld [vmem:[%s7083_s3 + $0x20] sm:$0xff]   ;;  %v6335_v26 = vld [vmem:[%s7083_s3 + $0x28] sm:$0xff]  }
 0x18e   : > { %v1546_v35 = vmax.f32 %v7190_v34, %v1530_v43  ;;  %v1548_v40 = vmax.f32 %v7193_v51, %v1532_v33  ;;  %1498 = vst [vmem:[#allocation2 + $0x1e8] sm:$0xff] %v1434_v61  ;;  %vm1842_vm4 = vcmask 138240   ;;  %vm1699_vm5 = vcmask 261120  }
 0x18f   : > { %v6084_v5 = vpack.c.bf16 %v1585_v2, %v1581_v63  ;;  %1500 = vst [vmem:[#allocation2 + $0x1f8] sm:$0xff] %v1436_v15  ;;  %v2508_v7 = vpack.c.bf16 %v2493_v32, %v2488_v1  ;;  %v7195_v37 = vmov 0   ;;  %vm2006_vm6 = vcmask 121856   ;;  %v6289_v2 = vld [vmem:[%s7083_s3 + $0x8] sm:$0xff]  }
 0x190   : > { %v1584_v25 = vmul.f32 %v7156_v59, %v1546_v35  ;;  %v1586_v60 = vmul.f32 %v7157_v19, %v1548_v40  ;;  %v7194_v59 = vld [vmem:[#allocation5_spill] sm:$0xff]  ;;  %v1663_v19 = vpop.permute.xlu0 %1662  ;;  %vm2186_vm7 = vcmask 7168   ;;  %v3235_v35 = vld [vmem:[%s7084_s4 + $0x8] sm:$0xff]  ;;  %v3237_v40 = vld [vmem:[%s7084_s4 + $0x18] sm:$0xff]  ;;  %vm2549_vm8 = vcmask 1039360  }
 0x191   : > { %1672 = vrot.lane.b32.xlu1 %v1632_v36, %s5260_s25  ;;  %vm2729_vm9 = vcmask 924672   ;;  %vm2909_vm10 = vcmask 916480   ;;  %vm3089_vm11 = vcmask 908288  }
 0x192   : > { %v6088_v23 = vpack.c.bf16 %v1584_v25, %v1580_v62  ;;  %v6090_v18 = vpack.c.bf16 %v1586_v60, %v1582_v48 }
 0x194   : > { %1676 = vrot.lane.b32.xlu0 %v6088_v23, %s5260_s25 }
 0x195   : > { %1826 = vrot.lane.b32.xlu1 %v6049_v52, %s5262_s28 }
 0x198   : > { %1824 = vrot.lane.b32.xlu0 %v6042_v56, %s5262_s28 }
 0x199   : > { %1834 = vrot.lane.b32.xlu1 %v6067_v16, %s5262_s28 }
 0x19c   : > { %1822 = vrot.lane.b32.xlu0 %v7194_v59, %s5262_s28 }
 0x19d   : > { %1832 = vrot.lane.b32.xlu1 %v1632_v36, %s5262_s28 }
 0x1a0   : > { %1836 = vrot.lane.b32.xlu0 %v6088_v23, %s5262_s28 }
 0x1a1   : > { %1990 = vrot.lane.b32.xlu1 %v6049_v52, %s5263_s29 }
 0x1a4   : > { %1988 = vrot.lane.b32.xlu0 %v6042_v56, %s5263_s29 }
 0x1a5   : > { %1998 = vrot.lane.b32.xlu1 %v6067_v16, %s5263_s29 }
 0x1a8   : > { %1986 = vrot.lane.b32.xlu0 %v7194_v59, %s5263_s29 }
 0x1a9   : > { %1996 = vrot.lane.b32.xlu1 %v1632_v36, %s5263_s29 }
 0x1ac   : > { %2000 = vrot.lane.b32.xlu0 %v6088_v23, %s5263_s29 }
 0x1ad   : > { %2170 = vrot.lane.b32.xlu1 %v6049_v52, %s5264_s30 }
 0x1b0   : > { %2168 = vrot.lane.b32.xlu0 %v6042_v56, %s5264_s30 }
 0x1b1   : > { %2178 = vrot.lane.b32.xlu1 %v6067_v16, %s5264_s30 }
 0x1b4   : > { %2166 = vrot.lane.b32.xlu0 %v7194_v59, %s5264_s30 }
 0x1b5   : > { %2176 = vrot.lane.b32.xlu1 %v1632_v36, %s5264_s30 }
 0x1b8   : > { %1668 = vrot.lane.b32.xlu0 %v6055_v50, %s5260_s25 }
 0x1b9   : > { %1670 = vrot.lane.b32.xlu1 %v6062_v10, %s5260_s25 }
 0x1bc   : > { %2180 = vrot.lane.b32.xlu0 %v6088_v23, %s5264_s30 }
 0x1bd   : > { %1830 = vrot.lane.b32.xlu1 %v6062_v10, %s5262_s28 }
 0x1c0   : > { %1678 = vrot.lane.b32.xlu0 %v6084_v5, %s5260_s25 }
 0x1c1   : > { %2533 = vrot.lane.b32.xlu1 %v6055_v50, %s5265_s8 }
 0x1c4   : > { %1828 = vrot.lane.b32.xlu0 %v6055_v50, %s5262_s28 }
 0x1c5   : > { %1680 = vrot.lane.b32.xlu1 %v6090_v18, %s5260_s25 }
 0x1c8   : > { %2531 = vrot.lane.b32.xlu0 %v6049_v52, %s5265_s8 }
 0x1c9   : > { %1838 = vrot.lane.b32.xlu1 %v6084_v5, %s5262_s28 }
 0x1cc   : > { %2529 = vrot.lane.b32.xlu0 %v6042_v56, %s5265_s8 }
 0x1cd   : > { %2539 = vrot.lane.b32.xlu1 %v6067_v16, %s5265_s8 }
 0x1d0   : > { %2543 = vrot.lane.b32.xlu0 %v6084_v5, %s5265_s8 }
 0x1d1   : > { %1994 = vrot.lane.b32.xlu1 %v6062_v10, %s5263_s29 }
 0x1d4   : > { %1992 = vrot.lane.b32.xlu0 %v6055_v50, %s5263_s29 }
 0x1d5   : > { %2541 = vrot.lane.b32.xlu1 %v6088_v23, %s5265_s8 }
 0x1d8   : > { %1840 = vrot.lane.b32.xlu0 %v6090_v18, %s5262_s28 }
 0x1d9   : > { %2713 = vrot.lane.b32.xlu1 %v6055_v50, %s5266_s9 }
 0x1dc   : > { %2711 = vrot.lane.b32.xlu0 %v6049_v52, %s5266_s9 }
 0x1dd   : > { %2002 = vrot.lane.b32.xlu1 %v6084_v5, %s5263_s29 }
 0x1e0   : > { %2709 = vrot.lane.b32.xlu0 %v6042_v56, %s5266_s9 }
 0x1e1   : > { %2719 = vrot.lane.b32.xlu1 %v6067_v16, %s5266_s9 }
 0x1e4   : > { %2723 = vrot.lane.b32.xlu0 %v6084_v5, %s5266_s9 }
 0x1e5   : > { %2721 = vrot.lane.b32.xlu1 %v6088_v23, %s5266_s9 }
 0x1e8   : > { %2004 = vrot.lane.b32.xlu0 %v6090_v18, %s5263_s29 }
 0x1e9   : > { %2174 = vrot.lane.b32.xlu1 %v6062_v10, %s5264_s30 }
 0x1ec   : > { %2172 = vrot.lane.b32.xlu0 %v6055_v50, %s5264_s30 }
 0x1ed   : > { %2893 = vrot.lane.b32.xlu1 %v6055_v50, %s5267_s10 }
 0x1f0   : > { %2891 = vrot.lane.b32.xlu0 %v6049_v52, %s5267_s10 }
 0x1f1   : > { %2182 = vrot.lane.b32.xlu1 %v6084_v5, %s5264_s30 }
 0x1f4   : > { %2889 = vrot.lane.b32.xlu0 %v6042_v56, %s5267_s10 }
 0x1f5   : > { %2901 = vrot.lane.b32.xlu1 %v6088_v23, %s5267_s10 }
 0x1f8   : > { %2184 = vrot.lane.b32.xlu0 %v6090_v18, %s5264_s30 }
 0x1f9   : > { %2899 = vrot.lane.b32.xlu1 %v6067_v16, %s5267_s10  ;;  %v1665_v63 = vpop.permute.xlu0 %1664 }
 0x1fa   : > { %v6193_v62 = vpop.permute.xlu1 %1666  ;;  %v1683_v30 = vsel %vm1682_vm3, %v1663_v19, %v1665_v63  ;;  %v3236_v19 = vld [vmem:[%s7084_s4 + $0x10] sm:$0xff] }
 0x1fb   : > { %v1684_v55 = vsel %vm1682_vm3, %v1665_v63, %v6193_v62 }
 0x1fc   : > { %2903 = vrot.lane.b32.xlu0 %v6084_v5, %s5267_s10  ;;  %1706 = vmatprep.subr.bf16.mxu0 %v1684_v55 }
 0x1fd   : > { %3073 = vrot.lane.b32.xlu1 %v6055_v50, %s5268_s12  ;;  %1707 = vmatpush1.bf16.msra.mxu0 %v1683_v30 }
 0x1ff   : > { %v1675_v14 = vpop.permute.xlu1 %1674 }
 0x200   : > { %3071 = vrot.lane.b32.xlu0 %v6049_v52, %s5268_s12 }
 0x201   : > { %3081 = vrot.lane.b32.xlu1 %v6088_v23, %s5268_s12 }
 0x203   : > { %v1673_v39 = vpop.permute.xlu1 %1672 }
 0x204   : > { %3069 = vrot.lane.b32.xlu0 %v6042_v56, %s5268_s12  ;;  %v1687_v29 = vsel %vm1682_vm3, %v1673_v39, %v1675_v14 }
 0x205   : > { %3079 = vrot.lane.b32.xlu1 %v6067_v16, %s5268_s12 }
 0x206   : > { %v6212_v8 = vpop.permute.xlu0 %1676 }
 0x207   : > { %v1688_v48 = vsel %vm1682_vm3, %v1675_v14, %v6212_v8  ;;  %v6217_v54 = vpop.permute.xlu1 %1826 }
 0x208   : > { %3083 = vrot.lane.b32.xlu0 %v6084_v5, %s5268_s12  ;;  %1708 = vmatprep.subr.bf16.mxu0 %v1688_v48  ;;  %v6349_v48 = vld [vmem:[%s7083_s3 + $0x30] sm:$0xff]  }
 0x209   : > { %1709 = vmatpush1.bf16.msra.mxu0 %v1687_v29  ;;  %2537 = vrot.lane.b32.xlu1 %v6210_v53, %s5265_s8 }
 0x20a   : > { %v1825_v58 = vpop.permute.xlu0 %1824 }
 0x20b   : > { %v1844_v4 = vsel %vm1842_vm4, %v1825_v58, %v6217_v54  ;;  %v1835_v13 = vpop.permute.xlu1 %1834 }
 0x20c   : > { %2535 = vrot.lane.b32.xlu0 %v6062_v10, %s5265_s8  ;;  %4591 = vmatmul.mubr.msk.bf16.vlgmr.msra.gmra.mrb[32].mxu0 %vm1699_vm5, %v6224_v9 }
 0x20d   : > { %1865 = vmatprep.subr.bf16.mxu0 %v1844_v4  ;;  %2547 = vrot.lane.b32.xlu1 %v2508_v7, %s5265_s8 }
 0x20e   : > { %v1823_v6 = vpop.permute.xlu0 %1822  ;;  %1748 = vmatprep.mubr.bf16.mxu0 %v7195_v37 }
 0x20f   : > { %v1843_v47 = vsel %vm1842_vm4, %v1823_v6, %v1825_v58  ;;  %v1833_v49 = vpop.permute.xlu1 %1832 }
 0x210   : > { %2545 = vrot.lane.b32.xlu0 %v6090_v18, %s5265_s8  ;;  %1866 = vmatpush1.bf16.msra.mxu0 %v1843_v47  ;;  %v1847_v11 = vsel %vm1842_vm4, %v1833_v49, %v1835_v13 }
 0x211   : > { %2717 = vrot.lane.b32.xlu1 %v6210_v53, %s5266_s9 }
 0x212   : > { %v6246_v41 = vpop.permute.xlu0 %1836 }
 0x213   : > { %v1848_v17 = vsel %vm1842_vm4, %v1835_v13, %v6246_v41  ;;  %v6251_v45 = vpop.permute.xlu1 %1990 }
 0x214   : > { %2715 = vrot.lane.b32.xlu0 %v6062_v10, %s5266_s9  ;;  %1867 = vmatprep.subr.bf16.mxu0 %v1848_v17 }
 0x215   : > { %4592 = vmatmul.mubr.msk.bf16.gmra.mrb[36].mxu0 %vm1699_vm5, %v6242_v42  ;;  %2727 = vrot.lane.b32.xlu1 %v2508_v7, %s5266_s9 }
 0x216   : > { %v1989_v31 = vpop.permute.xlu0 %1988  ;;  %1868 = vmatpush1.bf16.msra.mxu0 %v1847_v11  ;;  %1897 = vmatprep.mubr.bf16.mxu0 %v7195_v37 }
 0x217   : > { %v2008_v22 = vsel %vm2006_vm6, %v1989_v31, %v6251_v45  ;;  %v1999_v46 = vpop.permute.xlu1 %1998 }
 0x218   : > { %2725 = vrot.lane.b32.xlu0 %v6090_v18, %s5266_s9  ;;  %2029 = vmatprep.subr.bf16.mxu0 %v2008_v22 }
 0x219   : > { %2897 = vrot.lane.b32.xlu1 %v6210_v53, %s5267_s10 }
 0x21a   : > { %v1987_v38 = vpop.permute.xlu0 %1986 }
 0x21b   : > { %v1997_v3 = vpop.permute.xlu1 %1996  ;;  %v2007_v44 = vsel %vm2006_vm6, %v1987_v38, %v1989_v31 }
 0x21c   : > { %2895 = vrot.lane.b32.xlu0 %v6062_v10, %s5267_s10  ;;  %v2011_v33 = vsel %vm2006_vm6, %v1997_v3, %v1999_v46 }
 0x21d   : > { %4597 = vmatmul.mubr.msk.bf16.vlgmr.msra.gmra.mrb[32].mxu0 %vm1699_vm5, %v6266_v27  ;;  %2907 = vrot.lane.b32.xlu1 %v2508_v7, %s5267_s10 }
 0x21e   : > { %2030 = vmatpush1.bf16.msra.mxu0 %v2007_v44  ;;  %v6276_v43 = vpop.permute.xlu0 %2000  ;;  %1907 = vmatprep.mubr.bf16.mxu0 %v7195_v37 }
 0x21f   : > { %v2012_v24 = vsel %vm2006_vm6, %v1999_v46, %v6276_v43  ;;  %v6282_v36 = vpop.permute.xlu1 %2170 }
 0x220   : > { %2905 = vrot.lane.b32.xlu0 %v6090_v18, %s5267_s10  ;;  %2031 = vmatprep.subr.bf16.mxu0 %v2012_v24 }
 0x221   : > { %3077 = vrot.lane.b32.xlu1 %v6210_v53, %s5268_s12 }
 0x222   : > { %v2169_v61 = vpop.permute.xlu0 %2168  ;;  %2032 = vmatpush1.bf16.msra.mxu0 %v2011_v33  ;;  %v6405_v33 = vld [vmem:[%s7083_s3 + $0x48] sm:$0xff]  }
 0x223   : > { %v2188_v28 = vsel %vm2186_vm7, %v2169_v61, %v6282_v36  ;;  %v2179_v0 = vpop.permute.xlu1 %2178 }
 0x224   : > { %3075 = vrot.lane.b32.xlu0 %v6062_v10, %s5268_s12  ;;  %2209 = vmatprep.subr.bf16.mxu0 %v2188_v28 }
 0x225   : > { %4598 = vmatmul.mubr.msk.bf16.gmra.mrb[36].mxu0 %vm1699_vm5, %v6289_v2  ;;  %3087 = vrot.lane.b32.xlu1 %v2508_v7, %s5268_s12 }
 0x226   : > { %v2167_v34 = vpop.permute.xlu0 %2166  ;;  %2061 = vmatprep.mubr.bf16.mxu0 %v7195_v37 }
 0x227   : > { %v2177_v15 = vpop.permute.xlu1 %2176  ;;  %v2187_v59 = vsel %vm2186_vm7, %v2167_v34, %v2169_v61 }
 0x228   : > { %3085 = vrot.lane.b32.xlu0 %v6090_v18, %s5268_s12  ;;  %v2191_v20 = vsel %vm2186_vm7, %v2177_v15, %v2179_v0 }
 0x229   : > { %3245 = vperm.xlu1 %5036, %v3235_v35  }
 0x22a   : > { %v1669_v51 = vpop.permute.xlu0 %1668 }
 0x22b   : > { %v1671_v25 = vpop.permute.xlu1 %1670  ;;  %v1685_v63 = vsel %vm1682_vm3, %v6193_v62, %v1669_v51 }
 0x22c   : > { %3240 = vperm.xlu0 %5035, %v3234_v57   ;;  %v1686_v60 = vsel %vm1682_vm3, %v1669_v51, %v1671_v25 }
 0x22d   : > { %4607 = vmatmul.mubr.msk.bf16.vlgmr.msra.gmra.mrb[32].mxu0 %vm1699_vm5, %v6312_v12  ;;  %3255 = vperm.xlu1 %5036, %v3237_v40  }
 0x22e   : > { %2210 = vmatpush1.bf16.msra.mxu0 %v2187_v59  ;;  %v6326_v55 = vpop.permute.xlu0 %2180  ;;  %1759 = vmatprep.subr.bf16.mxu1 %v1686_v60 }
 0x22f   : > { %v2192_v30 = vsel %vm2186_vm7, %v2179_v0, %v6326_v55  ;;  %1760 = vmatpush1.bf16.msra.mxu1 %v1685_v63  ;;  %v1831_v14 = vpop.permute.xlu1 %1830  ;;  %2071 = vmatprep.mubr.bf16.mxu0 %v7195_v37  ;;  %v6418_v0 = vld [vmem:[%s7083_s3 + $0x50] sm:$0xff]  }
 0x230   : > { %3250 = vperm.xlu0 %5035, %v3236_v19   ;;  %2211 = vmatprep.subr.bf16.mxu0 %v2192_v30  ;;  %v6441_v19 = vld [vmem:[%s7083_s3 + $0x58] sm:$0xff]  }
 0x232   : > { %2212 = vmatpush1.bf16.msra.mxu0 %v2191_v20  ;;  %v1679_v62 = vpop.permute.xlu0 %1678  ;;  %v6454_v20 = vld [vmem:[%s7083_s3 + $0x60] sm:$0xff]  }
 0x233   : > { %2352 = vmatprep.subr.bf16.mxu0 %v6049_v52  ;;  %v6338_v39 = vpop.permute.xlu1 %2533  ;;  %v1689_v32 = vsel %vm1682_vm3, %v6212_v8, %v1679_v62 }
 0x235   : > { %4608 = vmatmul.mubr.msk.bf16.gmra.mrb[36].mxu0 %vm1699_vm5, %v6335_v26 }
 0x236   : > { %v1829_v53 = vpop.permute.xlu0 %1828  ;;  %2241 = vmatprep.mubr.bf16.mxu0 %v7195_v37 }
 0x237   : > { %v1681_v29 = vpop.permute.xlu1 %1680  ;;  %v1846_v7 = vsel %vm1842_vm4, %v1829_v53, %v1831_v14  ;;  %v1845_v4 = vsel %vm1842_vm4, %v6217_v54, %v1829_v53  ;;  %v6365_v54 = vld [vmem:[%s7083_s3 + $0x38] sm:$0xff]  }
 0x238   : > { %v1690_v1 = vsel %vm1682_vm3, %v1679_v62, %v1681_v29 }
 0x239   : > { %1761 = vmatprep.subr.bf16.mxu1 %v1690_v1 }
 0x23a   : > { %v2532_v52 = vpop.permute.xlu0 %2531  ;;  %1762 = vmatpush1.bf16.msra.mxu1 %v1689_v32 }
 0x23b   : > { %v1839_v58 = vpop.permute.xlu1 %1838  ;;  %1918 = vmatprep.subr.bf16.mxu1 %v1846_v7 }
 0x23c   : > { %v1849_v31 = vsel %vm1842_vm4, %v6246_v41, %v1839_v58 }
 0x23d   : > { %4617 = vmatmul.mubr.msk.bf16.vlgmr.msra.gmra.mrb[32].mxu0 %vm1699_vm5, %v6349_v48  ;;  %4593 = vmatmul.mubr.msk.bf16.vlgmr.msra.gmra.mrb[32].mxu1 %vm1699_vm5, %v6224_v9 }
 0x23e   : > { %2353 = vmatpush1.bf16.msra.mxu0 %v6042_v56  ;;  %v2530_v8 = vpop.permute.xlu0 %2529  ;;  %1919 = vmatpush1.bf16.msra.mxu1 %v1845_v4  ;;  %v2551_v56 = vsel %vm2549_vm8, %v2532_v52, %v6338_v39 }
 0x23f   : > { %2354 = vmatprep.subr.bf16.mxu0 %v6088_v23  ;;  %v2540_v13 = vpop.permute.xlu1 %2539  ;;  %2251 = vmatprep.mubr.bf16.mxu0 %v7195_v37  ;;  %v2550_v22 = vsel %vm2549_vm8, %v2530_v8, %v2532_v52 }
 0x240   : > { %1801 = vmatprep.mubr.bf16.mxu1 %v7195_v37 }
 0x242   : > { %2355 = vmatpush1.bf16.msra.mxu0 %v6067_v16  ;;  %v6368_v9 = vpop.permute.xlu0 %2543  ;;  %v6381_v16 = vld [vmem:[%s7083_s3 + $0x40] sm:$0xff]  }
 0x243   : > { %2572 = vmatprep.subr.bf16.mxu0 %v2551_v56  ;;  %v1995_v6 = vpop.permute.xlu1 %1994 }
 0x245   : > { %4618 = vmatmul.mubr.msk.bf16.gmra.mrb[36].mxu0 %vm1699_vm5, %v6365_v54  ;;  %4594 = vmatmul.mubr.msk.bf16.gmra.mrb[36].mxu1 %vm1699_vm5, %v6242_v42 }
 0x246   : > { %v1993_v23 = vpop.permute.xlu0 %1992  ;;  %2384 = vmatprep.mubr.bf16.mxu0 %v7195_v37  ;;  %1950 = vmatprep.mubr.bf16.mxu1 %v7195_v37 }
 0x247   : > { %v2542_v47 = vpop.permute.xlu1 %2541  ;;  %v2010_v46 = vsel %vm2006_vm6, %v1993_v23, %v1995_v6  ;;  %v2009_v41 = vsel %vm2006_vm6, %v6251_v45, %v1993_v23 }
 0x248   : > { %v2555_v42 = vsel %vm2549_vm8, %v2542_v47, %v6368_v9  ;;  %v2554_v24 = vsel %vm2549_vm8, %v2540_v13, %v2542_v47 }
 0x24a   : > { %v1841_v49 = vpop.permute.xlu0 %1840 }
 0x24b   : > { %v1850_v17 = vsel %vm1842_vm4, %v1839_v58, %v1841_v49  ;;  %v6384_v11 = vpop.permute.xlu1 %2713  ;;  %v5059_v49 = vld [vmem:[%s7086_s6 + $0x4] ss:$16 sps:$4 sm:$0xff]  }
 0x24c   : > { %1920 = vmatprep.subr.bf16.mxu1 %v1850_v17 }
 0x24d   : > { %1921 = vmatpush1.bf16.msra.mxu1 %v1849_v31  ;;  %4627 = vmatmul.mubr.msk.bf16.vlgmr.msra.gmra.mrb[32].mxu0 %vm1699_vm5, %v6381_v16 }
 0x24e   : > { %2082 = vmatprep.subr.bf16.mxu1 %v2010_v46  ;;  %2573 = vmatpush1.bf16.msra.mxu0 %v2550_v22  ;;  %v2712_v38 = vpop.permute.xlu0 %2711 }
 0x24f   : > { %2574 = vmatprep.subr.bf16.mxu0 %v2555_v42  ;;  %v2003_v3 = vpop.permute.xlu1 %2002  ;;  %2394 = vmatprep.mubr.bf16.mxu0 %v7195_v37  ;;  %v2731_v44 = vsel %vm2729_vm9, %v2712_v38, %v6384_v11  ;;  %v6516_v42 = vld [vmem:[%s7083_s3 + $0x78] sm:$0xff]  }
 0x250   : > { %4599 = vmatmul.mubr.msk.bf16.vlgmr.msra.gmra.mrb[32].mxu1 %vm1699_vm5, %v6266_v27  ;;  %v2013_v57 = vsel %vm2006_vm6, %v6276_v43, %v2003_v3 }
 0x251   : > { %2083 = vmatpush1.bf16.msra.mxu1 %v2009_v41  ;;  %1960 = vmatprep.mubr.bf16.mxu1 %v7195_v37  ;;  %v6531_v41 = vld [vmem:[%s7083_s3 + $0x80] sm:$0xff]  }
 0x252   : > { %2575 = vmatpush1.bf16.msra.mxu0 %v2554_v24  ;;  %v2710_v61 = vpop.permute.xlu0 %2709 }
 0x253   : > { %2752 = vmatprep.subr.bf16.mxu0 %v2731_v44  ;;  %v2720_v45 = vpop.permute.xlu1 %2719  ;;  %v5065_v44 = vld [vmem:[%s7086_s6 + $0x24] ss:$16 sps:$4 sm:$0xff]  }
 0x255   : > { %4628 = vmatmul.mubr.msk.bf16.gmra.mrb[36].mxu0 %vm1699_vm5, %v6405_v33 }
 0x256   : > { %v6410_v27 = vpop.permute.xlu0 %2723  ;;  %2604 = vmatprep.mubr.bf16.mxu0 %v7195_v37 }
 0x257   : > { %v2722_v28 = vpop.permute.xlu1 %2721 }
 0x258   : > { %4600 = vmatmul.mubr.msk.bf16.gmra.mrb[36].mxu1 %vm1699_vm5, %v6289_v2  ;;  %v2735_v51 = vsel %vm2729_vm9, %v2722_v28, %v6410_v27  ;;  %v2730_v2 = vsel %vm2729_vm9, %v2710_v61, %v2712_v38  ;;  %v2734_v59 = vsel %vm2729_vm9, %v2720_v45, %v2722_v28  ;;  %v5063_v61 = vld [vmem:[%s7086_s6 + $0x20] ss:$16 sps:$4 sm:$0xff]   ;;  %v5071_v45 = vld [vmem:[%s7086_s6 + $0x44] ss:$16 sps:$4 sm:$0xff]  }
 0x259   : > { %2114 = vmatprep.mubr.bf16.mxu1 %v7195_v37 }
 0x25a   : > { %v2005_v34 = vpop.permute.xlu0 %2004 }
 0x25b   : > { %v2014_v35 = vsel %vm2006_vm6, %v2003_v3, %v2005_v34  ;;  %v2175_v15 = vpop.permute.xlu1 %2174 }
 0x25c   : > { %2084 = vmatprep.subr.bf16.mxu1 %v2014_v35  ;;  %v6557_v35 = vld [vmem:[%s7083_s3 + $0x88] sm:$0xff]  }
 0x25d   : > { %2085 = vmatpush1.bf16.msra.mxu1 %v2013_v57  ;;  %4637 = vmatmul.mubr.msk.bf16.vlgmr.msra.gmra.mrb[32].mxu0 %vm1699_vm5, %v6418_v0 }
 0x25e   : > { %2753 = vmatpush1.bf16.msra.mxu0 %v2730_v2  ;;  %v2173_v40 = vpop.permute.xlu0 %2172  ;;  %2614 = vmatprep.mubr.bf16.mxu0 %v7195_v37 }
 0x25f   : > { %2754 = vmatprep.subr.bf16.mxu0 %v2735_v51  ;;  %v2190_v25 = vsel %vm2186_vm7, %v2173_v40, %v2175_v15  ;;  %v6431_v60 = vpop.permute.xlu1 %2893  ;;  %v2189_v43 = vsel %vm2186_vm7, %v6282_v36, %v2173_v40  ;;  %v5075_v40 = vld [vmem:[%s7086_s6 + $0x60] ss:$16 sps:$4 sm:$0xff]  }
 0x260   : > { %4609 = vmatmul.mubr.msk.bf16.vlgmr.msra.gmra.mrb[32].mxu1 %vm1699_vm5, %v6312_v12  ;;  %2262 = vmatprep.subr.bf16.mxu1 %v2190_v25  ;;  %v5083_v25 = vld [vmem:[%s7086_s6 + $0x84] ss:$16 sps:$4 sm:$0xff]  }
 0x261   : > { %2263 = vmatpush1.bf16.msra.mxu1 %v2189_v43  ;;  %2124 = vmatprep.mubr.bf16.mxu1 %v7195_v37  ;;  %v5089_v43 = vld [vmem:[%s7086_s6 + $0xa4] ss:$16 sps:$4 sm:$0xff]  }
 0x262   : > { %2755 = vmatpush1.bf16.msra.mxu0 %v2734_v59  ;;  %v2892_v63 = vpop.permute.xlu0 %2891 }
 0x263   : > { %v2911_v36 = vsel %vm2909_vm10, %v2892_v63, %v6431_v60  ;;  %v2183_v30 = vpop.permute.xlu1 %2182 }
 0x264   : > { %2932 = vmatprep.subr.bf16.mxu0 %v2911_v36  ;;  %v2193_v1 = vsel %vm2186_vm7, %v6326_v55, %v2183_v30  ;;  %v5087_v36 = vld [vmem:[%s7086_s6 + $0xa0] ss:$16 sps:$4 sm:$0xff]  }
 0x265   : > { %4638 = vmatmul.mubr.msk.bf16.gmra.mrb[36].mxu0 %vm1699_vm5, %v6441_v19 }
 0x266   : > { %v2890_v12 = vpop.permute.xlu0 %2889  ;;  %2784 = vmatprep.mubr.bf16.mxu0 %v7195_v37 }
 0x267   : > { %v2902_v14 = vpop.permute.xlu1 %2901  ;;  %v2910_v32 = vsel %vm2909_vm10, %v2890_v12, %v2892_v63 }
 0x268   : > { %4610 = vmatmul.mubr.msk.bf16.gmra.mrb[36].mxu1 %vm1699_vm5, %v6335_v26 }
 0x269   : > { %2294 = vmatprep.mubr.bf16.mxu1 %v7195_v37 }
 0x26a   : > { %v2185_v62 = vpop.permute.xlu0 %2184 }
 0x26b   : > { %v2194_v53 = vsel %vm2186_vm7, %v2183_v30, %v2185_v62  ;;  %v2900_v29 = vpop.permute.xlu1 %2899  ;;  %v5093_v62 = vld [vmem:[%s7086_s6 + $0xc0] ss:$16 sps:$4 sm:$0xff]  }
 0x26c   : > { %2264 = vmatprep.subr.bf16.mxu1 %v2194_v53  ;;  %v2914_v7 = vsel %vm2909_vm10, %v2900_v29, %v2902_v14 }
 0x26d   : > { %2265 = vmatpush1.bf16.msra.mxu1 %v2193_v1  ;;  %4647 = vmatmul.mubr.msk.bf16.vlgmr.msra.gmra.mrb[32].mxu0 %vm1699_vm5, %v6454_v20  ;;  %v5099_v1 = vld [vmem:[%s7086_s6 + $0xe0] ss:$16 sps:$4 sm:$0xff]  }
 0x26e   : > { %2405 = vmatprep.subr.bf16.mxu1 %v6062_v10  ;;  %2933 = vmatpush1.bf16.msra.mxu0 %v2910_v32  ;;  %v6464_v26 = vpop.permute.xlu0 %2903  ;;  %v6478_v10 = vld [vmem:[%s7083_s3 + $0x68] sm:$0xff]   ;;  %v5107_v32 = vld [vmem:[%s7086_s6 + $0x104] ss:$16 sps:$4 sm:$0xff]  }
 0x26f   : > { %v2915_v52 = vsel %vm2909_vm10, %v2902_v14, %v6464_v26  ;;  %v6469_v58 = vpop.permute.xlu1 %3073  ;;  %2794 = vmatprep.mubr.bf16.mxu0 %v7195_v37 }
 0x270   : > { %2934 = vmatprep.subr.bf16.mxu0 %v2915_v52  ;;  %4619 = vmatmul.mubr.msk.bf16.vlgmr.msra.gmra.mrb[32].mxu1 %vm1699_vm5, %v6349_v48  ;;  %v5113_v52 = vld [vmem:[%s7086_s6 + $0x124] ss:$16 sps:$4 sm:$0xff]  }
 0x271   : > { %2406 = vmatpush1.bf16.msra.mxu1 %v6055_v50  ;;  %2304 = vmatprep.mubr.bf16.mxu1 %v7195_v37 }
 0x272   : > { %v3072_v55 = vpop.permute.xlu0 %3071  ;;  %2935 = vmatpush1.bf16.msra.mxu0 %v2914_v7  ;;  %2407 = vmatprep.subr.bf16.mxu1 %v6090_v18  ;;  %v6493_v18 = vld [vmem:[%s7083_s3 + $0x70] sm:$0xff]  }
 0x273   : > { %v3091_v4 = vsel %vm3089_vm11, %v3072_v55, %v6469_v58  ;;  %v3082_v8 = vpop.permute.xlu1 %3081 }
 0x274   : > { %3112 = vmatprep.subr.bf16.mxu0 %v3091_v4 }
 0x275   : > { %4648 = vmatmul.mubr.msk.bf16.gmra.mrb[36].mxu0 %vm1699_vm5, %v6478_v10  ;;  %2408 = vmatpush1.bf16.msra.mxu1 %v6084_v5 }
 0x276   : > { %v3070_v50 = vpop.permute.xlu0 %3069  ;;  %2964 = vmatprep.mubr.bf16.mxu0 %v7195_v37 }
 0x277   : > { %v3080_v48 = vpop.permute.xlu1 %3079  ;;  %v3090_v6 = vsel %vm3089_vm11, %v3070_v50, %v3072_v55  ;;  %v5111_v55 = vld [vmem:[%s7086_s6 + $0x120] ss:$16 sps:$4 sm:$0xff]  }
 0x278   : > { %4620 = vmatmul.mubr.msk.bf16.gmra.mrb[36].mxu1 %vm1699_vm5, %v6365_v54  ;;  %v3094_v31 = vsel %vm3089_vm11, %v3080_v48, %v3082_v8  ;;  %v5062_v48 = vld [vmem:[%s7086_s6 + $0xc] ss:$16 sps:$4 sm:$0xff]  }
 0x279   : > { %2437 = vmatprep.mubr.bf16.mxu1 %v7195_v37 }
 0x27a   : > { %v6496_v13 = vpop.permute.xlu0 %3083 }
 0x27b   : > { %v2538_v56 = vpop.permute.xlu1 %2537  ;;  %v3095_v54 = vsel %vm3089_vm11, %v3082_v8, %v6496_v13 }
 0x27d   : > { %4657 = vmatmul.mubr.msk.bf16.vlgmr.msra.gmra.mrb[32].mxu0 %vm1699_vm5, %v6493_v18 }
 0x27e   : > { %3113 = vmatpush1.bf16.msra.mxu0 %v3090_v6  ;;  %v2536_v5 = vpop.permute.xlu0 %2535  ;;  %2974 = vmatprep.mubr.bf16.mxu0 %v7195_v37  ;;  %v5123_v6 = vld [vmem:[%s7086_s6 + $0x160] ss:$16 sps:$4 sm:$0xff]  }
 0x27f   : > { %3114 = vmatprep.subr.bf16.mxu0 %v3095_v54  ;;  %v2553_v23 = vsel %vm2549_vm8, %v2536_v5, %v2538_v56  ;;  %v2548_v47 = vpop.permute.xlu1 %2547  ;;  %v2552_v17 = vsel %vm2549_vm8, %v6338_v39, %v2536_v5  ;;  %v5117_v56 = vld [vmem:[%s7086_s6 + $0x140] ss:$16 sps:$4 sm:$0xff]   ;;  %v5131_v5 = vld [vmem:[%s7086_s6 + $0x184] ss:$16 sps:$4 sm:$0xff]  }
 0x280   : > { %4629 = vmatmul.mubr.msk.bf16.vlgmr.msra.gmra.mrb[32].mxu1 %vm1699_vm5, %v6381_v16  ;;  %2625 = vmatprep.subr.bf16.mxu1 %v2553_v23  ;;  %v5137_v54 = vld [vmem:[%s7086_s6 + $0x1a4] ss:$16 sps:$4 sm:$0xff]   ;;  %v5060_v23 = vld [vmem:[%s7086_s6 + $0x8] ss:$16 sps:$4 sm:$0xff]  }
 0x281   : > { %2626 = vmatpush1.bf16.msra.mxu1 %v2552_v17  ;;  %2447 = vmatprep.mubr.bf16.mxu1 %v7195_v37  ;;  %v5066_v17 = vld [vmem:[%s7086_s6 + $0x28] ss:$16 sps:$4 sm:$0xff]  }
 0x282   : > { %3115 = vmatpush1.bf16.msra.mxu0 %v3094_v31  ;;  %v2546_v22 = vpop.permute.xlu0 %2545  ;;  %v5074_v31 = vld [vmem:[%s7086_s6 + $0x4c] ss:$16 sps:$4 sm:$0xff]  }
 0x283   : > { %v2557_v46 = vsel %vm2549_vm8, %v2546_v22, %v2548_v47  ;;  %4178 = vmatprep.subr.bf16.mxu0 %v5059_v49  ;;  %v2556_v39 = vsel %vm2549_vm8, %v6368_v9, %v2546_v22  ;;  %v2718_v16 = vpop.permute.xlu1 %2717  ;;  %v5057_v9 = vld [vmem:[%s7086_s6] ss:$16 sps:$4 sm:$0xff]   ;;  %v5068_v47 = vld [vmem:[%s7086_s6 + $0x2c] ss:$16 sps:$4 sm:$0xff]   ;;  %v5078_v22 = vld [vmem:[%s7086_s6 + $0x68] ss:$16 sps:$4 sm:$0xff]  }
 0x284   : > { %2627 = vmatprep.subr.bf16.mxu1 %v2557_v46  ;;  %v5135_v49 = vld [vmem:[%s7086_s6 + $0x1a0] ss:$16 sps:$4 sm:$0xff]   ;;  %v5086_v46 = vld [vmem:[%s7086_s6 + $0x8c] ss:$16 sps:$4 sm:$0xff]  }
 0x285   : > { %4658 = vmatmul.mubr.msk.bf16.gmra.mrb[36].mxu0 %vm1699_vm5, %v6516_v42  ;;  %2628 = vmatpush1.bf16.msra.mxu1 %v2556_v39  ;;  %v5084_v39 = vld [vmem:[%s7086_s6 + $0x88] ss:$16 sps:$4 sm:$0xff]  }
 0x286   : > { %v2716_v38 = vpop.permute.xlu0 %2715  ;;  %3144 = vmatprep.mubr.bf16.mxu0 %v7195_v37 }
 0x287   : > { %v2733_v3 = vsel %vm2729_vm9, %v2716_v38, %v2718_v16  ;;  %v2728_v24 = vpop.permute.xlu1 %2727  ;;  %v2732_v28 = vsel %vm2729_vm9, %v6384_v11, %v2716_v38  ;;  %v5069_v11 = vld [vmem:[%s7086_s6 + $0x40] ss:$16 sps:$4 sm:$0xff]   ;;  %v5092_v16 = vld [vmem:[%s7086_s6 + $0xac] ss:$16 sps:$4 sm:$0xff]   ;;  %v5090_v38 = vld [vmem:[%s7086_s6 + $0xa8] ss:$16 sps:$4 sm:$0xff]  }
 0x288   : > { %4630 = vmatmul.mubr.msk.bf16.gmra.mrb[36].mxu1 %vm1699_vm5, %v6405_v33  ;;  %2805 = vmatprep.subr.bf16.mxu1 %v2733_v3  ;;  %v5098_v3 = vld [vmem:[%s7086_s6 + $0xcc] ss:$16 sps:$4 sm:$0xff]  }
 0x289   : > { %2657 = vmatprep.mubr.bf16.mxu1 %v7195_v37 }
 0x28a   : > { %v2726_v33 = vpop.permute.xlu0 %2725 }
 0x28b   : > { %v2737_v34 = vsel %vm2729_vm9, %v2726_v33, %v2728_v24  ;;  %v2898_v15 = vpop.permute.xlu1 %2897  ;;  %v2736_v57 = vsel %vm2729_vm9, %v6410_v27, %v2726_v33  ;;  %v5081_v27 = vld [vmem:[%s7086_s6 + $0x80] ss:$16 sps:$4 sm:$0xff]   ;;  %v5110_v24 = vld [vmem:[%s7086_s6 + $0x10c] ss:$16 sps:$4 sm:$0xff]   ;;  %v5108_v33 = vld [vmem:[%s7086_s6 + $0x108] ss:$16 sps:$4 sm:$0xff]  }
 0x28d   : > { %4667 = vmatmul.mubr.msk.bf16.vlgmr.msra.gmra.mrb[32].mxu0 %vm1699_vm5, %v6531_v41 }
 0x28e   : > { %3154 = vmatprep.mubr.bf16.mxu0 %v7195_v37  ;;  %4179 = vmatpush1.bf16.msra.mxu0 %v5057_v9  ;;  %v2896_v51 = vpop.permute.xlu0 %2895  ;;  %v5104_v9 = vld [vmem:[%s7086_s6 + $0xec] ss:$16 sps:$4 sm:$0xff]  }
 0x28f   : > { %4180 = vmatprep.subr.bf16.mxu0 %v5065_v44  ;;  %v2913_v2 = vsel %vm2909_vm10, %v2896_v51, %v2898_v15  ;;  %v2908_v59 = vpop.permute.xlu1 %2907  ;;  %v2912_v30 = vsel %vm2909_vm10, %v6431_v60, %v2896_v51  ;;  %v5101_v60 = vld [vmem:[%s7086_s6 + $0xe4] ss:$16 sps:$4 sm:$0xff]   ;;  %v5102_v44 = vld [vmem:[%s7086_s6 + $0xe8] ss:$16 sps:$4 sm:$0xff]  }
 0x290   : > { %4639 = vmatmul.mubr.msk.bf16.vlgmr.msra.gmra.mrb[32].mxu1 %vm1699_vm5, %v6418_v0  ;;  %v5077_v0 = vld [vmem:[%s7086_s6 + $0x64] ss:$16 sps:$4 sm:$0xff]   ;;  %v5120_v15 = vld [vmem:[%s7086_s6 + $0x148] ss:$16 sps:$4 sm:$0xff]  }
 0x291   : > { %2806 = vmatpush1.bf16.msra.mxu1 %v2732_v28  ;;  %2667 = vmatprep.mubr.bf16.mxu1 %v7195_v37  ;;  %v5122_v28 = vld [vmem:[%s7086_s6 + $0x14c] ss:$16 sps:$4 sm:$0xff]   ;;  %v5126_v51 = vld [vmem:[%s7086_s6 + $0x168] ss:$16 sps:$4 sm:$0xff]  }
 0x292   : > { %2807 = vmatprep.subr.bf16.mxu1 %v2737_v34  ;;  %4181 = vmatpush1.bf16.msra.mxu0 %v5063_v61  ;;  %v2906_v63 = vpop.permute.xlu0 %2905  ;;  %v5116_v61 = vld [vmem:[%s7086_s6 + $0x12c] ss:$16 sps:$4 sm:$0xff]   ;;  %v5143_v34 = vld [vmem:[%s7086_s6 + $0x1c4] ss:$16 sps:$4 sm:$0xff]  }
 0x293   : > { %4182 = vmatprep.subr.bf16.mxu0 %v5071_v45  ;;  %v2917_v12 = vsel %vm2909_vm10, %v2906_v63, %v2908_v59  ;;  %v3078_v14 = vpop.permute.xlu1 %3077  ;;  %v5114_v45 = vld [vmem:[%s7086_s6 + $0x128] ss:$16 sps:$4 sm:$0xff]   ;;  %v5146_v59 = vld [vmem:[%s7086_s6 + $0x1cc] ss:$16 sps:$4 sm:$0xff]  }
 0x295   : > { %4668 = vmatmul.mubr.msk.bf16.gmra.mrb[36].mxu0 %vm1699_vm5, %v6557_v35  ;;  %2808 = vmatpush1.bf16.msra.mxu1 %v2736_v57  ;;  %v5147_v57 = vld [vmem:[%s7086_s6 + $0x1e0] ss:$16 sps:$4 sm:$0xff]  }
 0x296   : > { %2985 = vmatprep.subr.bf16.mxu1 %v2913_v2  ;;  %4183 = vmatpush1.bf16.msra.mxu0 %v5069_v11  ;;  %v3076_v53 = vpop.permute.xlu0 %3075  ;;  %v5128_v11 = vld [vmem:[%s7086_s6 + $0x16c] ss:$16 sps:$4 sm:$0xff]  }
 0x297   : > { %4184 = vmatprep.subr.bf16.mxu0 %v5077_v0  ;;  %v3093_v29 = vsel %vm3089_vm11, %v3076_v53, %v3078_v14  ;;  %v3088_v7 = vpop.permute.xlu1 %3087  ;;  %v3092_v4 = vsel %vm3089_vm11, %v6469_v58, %v3076_v53  ;;  %v5125_v58 = vld [vmem:[%s7086_s6 + $0x164] ss:$16 sps:$4 sm:$0xff]   ;;  %v5134_v2 = vld [vmem:[%s7086_s6 + $0x18c] ss:$16 sps:$4 sm:$0xff]  }
 0x298   : > { %4640 = vmatmul.mubr.msk.bf16.gmra.mrb[36].mxu1 %vm1699_vm5, %v6441_v19  ;;  %v5095_v19 = vld [vmem:[%s7086_s6 + $0xc4] ss:$16 sps:$4 sm:$0xff]   ;;  %v3275_v53 = vld [vmem:[#allocation3 + $0x8] sm:$0xff] }
 0x299   : > { %2837 = vmatprep.mubr.bf16.mxu1 %v7195_v37  ;;  %v5149_v0 = vld [vmem:[%s7086_s6 + $0x1e4] ss:$16 sps:$4 sm:$0xff]  }
 0x29a   : > { %4185 = vmatpush1.bf16.msra.mxu0 %v5075_v40  ;;  %v3086_v8 = vpop.permute.xlu0 %3085  ;;  %v5155_v40 = vld [vmem:[%s7086_s6 + $0x204] ss:$16 sps:$4 sm:$0xff]  }
 0x29b   : > { %4186 = vmatprep.subr.bf16.mxu0 %v5083_v25  ;;  %v3097_v50 = vsel %vm3089_vm11, %v3086_v8, %v3088_v7  ;;  %v5132_v25 = vld [vmem:[%s7086_s6 + $0x188] ss:$16 sps:$4 sm:$0xff]  }
 0x29e   : > { %4187 = vmatpush1.bf16.msra.mxu0 %v5081_v27  ;;  %v5140_v27 = vld [vmem:[%s7086_s6 + $0x1ac] ss:$16 sps:$4 sm:$0xff]  }
 0x29f   : > { %4188 = vmatprep.subr.bf16.mxu0 %v5089_v43  ;;  %v5138_v43 = vld [vmem:[%s7086_s6 + $0x1a8] ss:$16 sps:$4 sm:$0xff]  }
 0x2a0   : > { %4649 = vmatmul.mubr.msk.bf16.vlgmr.msra.gmra.mrb[32].mxu1 %vm1699_vm5, %v6454_v20  ;;  %v2916_v20 = vsel %vm2909_vm10, %v6464_v26, %v2906_v63  ;;  %v5105_v26 = vld [vmem:[%s7086_s6 + $0x100] ss:$16 sps:$4 sm:$0xff]   ;;  %v5144_v63 = vld [vmem:[%s7086_s6 + $0x1c8] ss:$16 sps:$4 sm:$0xff]  }
 0x2a1   : > { %2986 = vmatpush1.bf16.msra.mxu1 %v2912_v30  ;;  %2847 = vmatprep.mubr.bf16.mxu1 %v7195_v37  ;;  %v5158_v30 = vld [vmem:[%s7086_s6 + $0x20c] ss:$16 sps:$4 sm:$0xff]  }
 0x2a2   : > { %2987 = vmatprep.subr.bf16.mxu1 %v2917_v12  ;;  %4189 = vmatpush1.bf16.msra.mxu0 %v5087_v36  ;;  %v5152_v36 = vld [vmem:[%s7086_s6 + $0x1ec] ss:$16 sps:$4 sm:$0xff]  }
 0x2a3   : > { %4190 = vmatprep.subr.bf16.mxu0 %v5095_v19  ;;  %v5150_v19 = vld [vmem:[%s7086_s6 + $0x1e8] ss:$16 sps:$4 sm:$0xff]  }
 0x2a5   : > { %2988 = vmatpush1.bf16.msra.mxu1 %v2916_v20 }
 0x2a6   : > { %3165 = vmatprep.subr.bf16.mxu1 %v3093_v29  ;;  %4191 = vmatpush1.bf16.msra.mxu0 %v5093_v62  ;;  %v3274_v62 = vld [vmem:[#allocation3] sm:$0xff] }
 0x2a7   : > { %4192 = vmatprep.subr.bf16.mxu0 %v5101_v60 }
 0x2a8   : > { %4650 = vmatmul.mubr.msk.bf16.gmra.mrb[36].mxu1 %vm1699_vm5, %v6478_v10  ;;  %v5119_v10 = vld [vmem:[%s7086_s6 + $0x144] ss:$16 sps:$4 sm:$0xff]   ;;  %v6782_v29 = vpop.permute.xlu1 %3245 }
 0x2a9   : > { %3017 = vmatprep.mubr.bf16.mxu1 %v7195_v37 }
 0x2aa   : > { %4193 = vmatpush1.bf16.msra.mxu0 %v5099_v1 }
 0x2ab   : > { %4194 = vmatprep.subr.bf16.mxu0 %v5107_v32  ;;  %v6779_v12 = vpop.permute.xlu0 %3240 }
 0x2ae   : > { %4195 = vmatpush1.bf16.msra.mxu0 %v5105_v26  ;;  %v3278_v26 = vld [vmem:[#allocation3 + $0x20] sm:$0xff] }
 0x2af   : > { %4196 = vmatprep.subr.bf16.mxu0 %v5113_v52 }
 0x2b0   : > { %4659 = vmatmul.mubr.msk.bf16.vlgmr.msra.gmra.mrb[32].mxu1 %vm1699_vm5, %v6493_v18  ;;  %v3096_v18 = vsel %vm3089_vm11, %v6496_v13, %v3086_v8  ;;  %v5129_v13 = vld [vmem:[%s7086_s6 + $0x180] ss:$16 sps:$4 sm:$0xff]  }
 0x2b1   : > { %3166 = vmatpush1.bf16.msra.mxu1 %v3092_v4  ;;  %3027 = vmatprep.mubr.bf16.mxu1 %v7195_v37 }
 0x2b2   : > { %3167 = vmatprep.subr.bf16.mxu1 %v3097_v50  ;;  %4197 = vmatpush1.bf16.msra.mxu0 %v5111_v55 }
 0x2b3   : > { %4198 = vmatprep.subr.bf16.mxu0 %v5119_v10  ;;  %v3279_v10 = vld [vmem:[#allocation3 + $0x28] sm:$0xff] }
 0x2b5   : > { %3168 = vmatpush1.bf16.msra.mxu1 %v3096_v18 }
 0x2b6   : > { %4284 = vmatprep.subr.bf16.mxu1 %v5062_v48  ;;  %4199 = vmatpush1.bf16.msra.mxu0 %v5117_v56 }
 0x2b7   : > { %4200 = vmatprep.subr.bf16.mxu0 %v5125_v58  ;;  %v5153_v58 = vld [vmem:[%s7086_s6 + $0x200] ss:$16 sps:$4 sm:$0xff]  }
 0x2b8   : > { %4660 = vmatmul.mubr.msk.bf16.gmra.mrb[36].mxu1 %vm1699_vm5, %v6516_v42  ;;  %v5072_v42 = vld [vmem:[%s7086_s6 + $0x48] ss:$16 sps:$4 sm:$0xff]  }
 0x2b9   : > { %3197 = vmatprep.mubr.bf16.mxu1 %v7195_v37 }
 0x2ba   : > { %4201 = vmatpush1.bf16.msra.mxu0 %v5123_v6 }
 0x2bb   : > { %4202 = vmatprep.subr.bf16.mxu0 %v5131_v5  ;;  %v3282_v5 = vld [vmem:[#allocation3 + $0x40] sm:$0xff] }
 0x2be   : > { %4203 = vmatpush1.bf16.msra.mxu0 %v5129_v13  ;;  %v5156_v13 = vld [vmem:[%s7086_s6 + $0x208] ss:$16 sps:$4 sm:$0xff]  }
 0x2bf   : > { %4204 = vmatprep.subr.bf16.mxu0 %v5137_v54  ;;  %v6796_v54 = vpop.permute.xlu0 %3250 }
 0x2c0   : > { %4669 = vmatmul.mubr.msk.bf16.vlgmr.msra.gmra.mrb[32].mxu1 %vm1699_vm5, %v6531_v41  ;;  %v5096_v41 = vld [vmem:[%s7086_s6 + $0xc8] ss:$16 sps:$4 sm:$0xff]  }
 0x2c1   : > { %3207 = vmatprep.mubr.bf16.mxu1 %v7195_v37  ;;  %4285 = vmatpush1.bf16.msra.mxu1 %v5060_v23  ;;  %v5080_v37 = vld [vmem:[%s7086_s6 + $0x6c] ss:$16 sps:$4 sm:$0xff]  }
 0x2c2   : > { %4286 = vmatprep.subr.bf16.mxu1 %v5068_v47  ;;  %4205 = vmatpush1.bf16.msra.mxu0 %v5135_v49  ;;  %v5189_v49 = vld [vmem:[%s7086_s6 + $0x2c0] ss:$16 sps:$4 sm:$0xff]  }
 0x2c3   : > { %4206 = vmatprep.subr.bf16.mxu0 %v5143_v34 }
 0x2c5   : > { %4287 = vmatpush1.bf16.msra.mxu1 %v5066_v17 }
 0x2c6   : > { %4288 = vmatprep.subr.bf16.mxu1 %v5074_v31  ;;  %v5161_v31 = vld [vmem:[%s7086_s6 + $0x224] ss:$16 sps:$4 sm:$0xff]  }
 0x2c8   : > { %4670 = vmatmul.mubr.msk.bf16.gmra.mrb[36].mxu1 %vm1699_vm5, %v6557_v35  ;;  %v5141_v35 = vld [vmem:[%s7086_s6 + $0x1c0] ss:$16 sps:$4 sm:$0xff]  }
 0x2c9   : > { %4289 = vmatpush1.bf16.msra.mxu1 %v5072_v42  ;;  %4207 = vmatpush1.bf16.msra.mxu0 %v5141_v35 }
 0x2ca   : > { %4290 = vmatprep.subr.bf16.mxu1 %v5080_v37  ;;  %4208 = vmatprep.subr.bf16.mxu0 %v5149_v0 }
 0x2cd   : > { %4291 = vmatpush1.bf16.msra.mxu1 %v5078_v22  ;;  %4209 = vmatpush1.bf16.msra.mxu0 %v5147_v57 }
 0x2ce   : > { %4292 = vmatprep.subr.bf16.mxu1 %v5086_v46  ;;  %4231 = vmatprep.subr.bf16.mxu0 %v5155_v40 }
 0x2d1   : > { %4293 = vmatpush1.bf16.msra.mxu1 %v5084_v39 }
 0x2d2   : > { %4294 = vmatprep.subr.bf16.mxu1 %v5092_v16  ;;  %v3283_v16 = vld [vmem:[#allocation3 + $0x48] sm:$0xff] }
 0x2d5   : > { %4295 = vmatpush1.bf16.msra.mxu1 %v5090_v38  ;;  %v5164_v38 = vld [vmem:[%s7086_s6 + $0x22c] ss:$16 sps:$4 sm:$0xff]  }
 0x2d6   : > { %4296 = vmatprep.subr.bf16.mxu1 %v5098_v3  ;;  %v6812_v3 = vpop.permute.xlu1 %3255 }
 0x2d9   : > { %4297 = vmatpush1.bf16.msra.mxu1 %v5096_v41 }
 0x2da   : > { %4298 = vmatprep.subr.bf16.mxu1 %v5104_v9 }
 0x2dd   : > { %4299 = vmatpush1.bf16.msra.mxu1 %v5102_v44 }
 0x2de   : > { %4300 = vmatprep.subr.bf16.mxu1 %v5110_v24 }
 0x2e1   : > { %4301 = vmatpush1.bf16.msra.mxu1 %v5108_v33  ;;  %v3286_v33 = vld [vmem:[#allocation3 + $0x60] sm:$0xff] }
 0x2e2   : > { %4302 = vmatprep.subr.bf16.mxu1 %v5116_v61  ;;  %v5269_v61 = vmov 1.0|1.0  }
 0x2e5   : > { %4303 = vmatpush1.bf16.msra.mxu1 %v5114_v45 }
 0x2e6   : > { %4304 = vmatprep.subr.bf16.mxu1 %v5122_v28 }
 0x2e9   : > { %4305 = vmatpush1.bf16.msra.mxu1 %v5120_v15  ;;  %v3287_v15 = vld [vmem:[#allocation3 + $0x68] sm:$0xff] }
 0x2ea   : > { %4306 = vmatprep.subr.bf16.mxu1 %v5128_v11 }
 0x2ed   : > { %4307 = vmatpush1.bf16.msra.mxu1 %v5126_v51  ;;  %v5159_v51 = vld [vmem:[%s7086_s6 + $0x220] ss:$16 sps:$4 sm:$0xff]  }
 0x2ee   : > { %4308 = vmatprep.subr.bf16.mxu1 %v5134_v2  ;;  %v5162_v2 = vld [vmem:[%s7086_s6 + $0x228] ss:$16 sps:$4 sm:$0xff]  }
 0x2f1   : > { %4309 = vmatpush1.bf16.msra.mxu1 %v5132_v25  ;;  %v5167_v25 = vld [vmem:[%s7086_s6 + $0x244] ss:$16 sps:$4 sm:$0xff]  }
 0x2f2   : > { %4310 = vmatprep.subr.bf16.mxu1 %v5140_v27  ;;  %v5170_v27 = vld [vmem:[%s7086_s6 + $0x24c] ss:$16 sps:$4 sm:$0xff]  }
 0x2f5   : > { %4311 = vmatpush1.bf16.msra.mxu1 %v5138_v43 }
 0x2f6   : > { %4312 = vmatprep.subr.bf16.mxu1 %v5146_v59 }
 0x2f9   : > { %4313 = vmatpush1.bf16.msra.mxu1 %v5144_v63 }
 0x2fa   : > { %4314 = vmatprep.subr.bf16.mxu1 %v5152_v36 }
 0x2fd   : > { %4315 = vmatpush1.bf16.msra.mxu1 %v5150_v19  ;;  %v5165_v19 = vld [vmem:[%s7086_s6 + $0x240] ss:$16 sps:$4 sm:$0xff]  }
 0x2fe   : > { %4337 = vmatprep.subr.bf16.mxu1 %v5158_v30 }
 0x360   : > { %v3146_v14 = vpop.f32.mrb[32].mxu0 }
 0x361   : > { %v3258_v60 = vadd.f32 %v6779_v12, %v3146_v14  ;;  %v3148_v20 = vpop.f32.mrb[33].mxu0 }
 0x362   : > { %v3259_v1 = vadd.f32 %v6779_v12, %v3148_v20  ;;  %v3150_v32 = vpop.f32.mrb[34].mxu0 }
 0x363   : > { %v3290_v52 = vadd.f32 %v3274_v62, %v3258_v60  ;;  %v3262_v7 = vadd.f32 %v6782_v29, %v3150_v32  ;;  %v3152_v55 = vpop.f32.mrb[35].mxu0  ;;  %v5168_v62 = vld [vmem:[%s7086_s6 + $0x248] ss:$16 sps:$4 sm:$0xff]   ;;  %v5173_v32 = vld [vmem:[%s7086_s6 + $0x264] ss:$16 sps:$4 sm:$0xff]  }
 0x364   : > { %v3291_v4 = vadd.f32 %v3275_v53, %v3259_v1  ;;  %v3263_v8 = vadd.f32 %v6782_v29, %v3152_v55 }
 0x365   : > { %vm3306_vm12 = vcmp.ge.f32.partialorder %v3290_v52, 1.0  ;;  %v3294_v50 = vadd.f32 %v3278_v26, %v3262_v7  ;;  %v5176_v26 = vld [vmem:[%s7086_s6 + $0x26c] ss:$16 sps:$4 sm:$0xff]  }
 0x366   : > { %v4671_v48 = vsel %vm3306_vm12, 1.0, %v7137_v21  ;;  %vm3307_vm13 = vcmp.ge.f32.partialorder %v3291_v4, 1.0  ;;  %v3295_v56 = vadd.f32 %v3279_v10, %v3263_v8  ;;  %v5174_v8 = vld [vmem:[%s7086_s6 + $0x268] ss:$16 sps:$4 sm:$0xff]  }
 0x367   : > { %v3354_v18 = vsub.f32 1.0, %v4671_v48  ;;  %v4672_v6 = vsel %vm3307_vm13, 1.0, %v7137_v21  ;;  %vm3310_vm14 = vcmp.ge.f32.partialorder %v3294_v50, 1.0  ;;  %v5182_v48 = vld [vmem:[%s7086_s6 + $0x28c] ss:$16 sps:$4 sm:$0xff]  }
 0x368   : > { %v3355_v23 = vsub.f32 1.0, %v4672_v6  ;;  %v4675_v47 = vsel %vm3310_vm14, 1.0, %v7137_v21  ;;  %vm6799_vm15 = vmpackc.low %vm3310_vm14, %vm3306_vm12  ;;  %vm3311_vm0 = vcmp.ge.f32.partialorder %v3295_v56, 1.0  ;;  %v3156_v17 = vpop.f32.mrb[36].mxu0  ;;  %v5188_v6 = vld [vmem:[%s7086_s6 + $0x2ac] ss:$16 sps:$4 sm:$0xff]  }
 0x369   : > { %v3370_v42 = vmul.f32 %v3354_v18, %v3290_v52  ;;  %v3358_v37 = vsub.f32 1.0, %v4675_v47  ;;  %v4676_v22 = vsel %vm3311_vm0, 1.0, %v7137_v21  ;;  %v3266_v46 = vadd.f32 %v6796_v54, %v3156_v17  ;;  %v3158_v39 = vpop.f32.mrb[37].mxu0  ;;  %vm4815_vm1 = vmpackc.low %vm3311_vm0, %vm3307_vm13  ;;  %v5185_v18 = vld [vmem:[%s7086_s6 + $0x2a4] ss:$16 sps:$4 sm:$0xff]  }
 0x36a   : > { %v3371_v41 = vmul.f32 %v3355_v23, %v3291_v4  ;;  %v3359_v9 = vsub.f32 1.0, %v4676_v22  ;;  %v3267_v44 = vadd.f32 %v6796_v54, %v3158_v39  ;;  %v3160_v24 = vpop.f32.mrb[38].mxu0  ;;  %4816 = vmatprep.mubr.msk.bf16.mxu0 %vm4815_vm1, %v5269_v61  ;;  %4832 = vmatprep.mubr.msk.bf16.mxu1 %vm4815_vm1, %v5269_v61  ;;  %v5171_v4 = vld [vmem:[%s7086_s6 + $0x260] ss:$16 sps:$4 sm:$0xff]   ;;  %v5191_v23 = vld [vmem:[%s7086_s6 + $0x2c4] ss:$16 sps:$4 sm:$0xff]  }
 0x36b   : > { %3386 = vst [vmem:[#allocation3] sm:$0xff] %v3370_v42  ;;  %v3374_v45 = vmul.f32 %v3358_v37, %v3294_v50  ;;  %v3298_v28 = vadd.f32 %v3282_v5, %v3266_v46  ;;  %v3270_v34 = vadd.f32 %v6812_v3, %v3160_v24  ;;  %v3162_v35 = vpop.f32.mrb[39].mxu0  ;;  %4818 = vmatmul.mubr.msk.bf16.vlgmr.msra.gmra.mrb[40].mxu0 %vm6799_vm15, %v5269_v61  ;;  %v5179_v50 = vld [vmem:[%s7086_s6 + $0x284] ss:$16 sps:$4 sm:$0xff]   ;;  %v5183_v5 = vld [vmem:[%s7086_s6 + $0x2a0] ss:$16 sps:$4 sm:$0xff]  }
 0x36c   : > { %4834 = vmatmul.mubr.msk.bf16.vlgmr.msra.gmra.mrb[40].mxu1 %vm6799_vm15, %v5269_v61  ;;  %3387 = vst [vmem:[#allocation3 + $0x8] sm:$0xff] %v3371_v41  ;;  %v3375_v11 = vmul.f32 %v3359_v9, %v3295_v56  ;;  %v3299_v0 = vadd.f32 %v3283_v16, %v3267_v44  ;;  %v3271_v57 = vadd.f32 %v6812_v3, %v3162_v35  ;;  %v5177_v56 = vld [vmem:[%s7086_s6 + $0x280] ss:$16 sps:$4 sm:$0xff]   ;;  %v5194_v47 = vld [vmem:[%s7086_s6 + $0x2cc] ss:$16 sps:$4 sm:$0xff]  }
 0x36d   : > { %4232 = vmatpush1.bf16.msra.mxu0 %v5153_v58  ;;  %4338 = vmatpush1.bf16.msra.mxu1 %v5156_v13  ;;  %3390 = vst [vmem:[#allocation3 + $0x20] sm:$0xff] %v3374_v45  ;;  %vm3314_vm2 = vcmp.ge.f32.partialorder %v3298_v28, 1.0  ;;  %v3302_v40 = vadd.f32 %v3286_v33, %v3270_v34  ;;  %v5180_v58 = vld [vmem:[%s7086_s6 + $0x288] ss:$16 sps:$4 sm:$0xff]   ;;  %v5200_v42 = vld [vmem:[%s7086_s6 + $0x2ec] ss:$16 sps:$4 sm:$0xff]  }
 0x36e   : > { %4233 = vmatprep.subr.bf16.mxu0 %v5161_v31  ;;  %4339 = vmatprep.subr.bf16.mxu1 %v5164_v38  ;;  %3391 = vst [vmem:[#allocation3 + $0x28] sm:$0xff] %v3375_v11  ;;  %v4679_v43 = vsel %vm3314_vm2, 1.0, %v7137_v21  ;;  %vm3315_vm3 = vcmp.ge.f32.partialorder %v3299_v0, 1.0  ;;  %v3303_v59 = vadd.f32 %v3287_v15, %v3271_v57  ;;  %v5186_v13 = vld [vmem:[%s7086_s6 + $0x2a8] ss:$16 sps:$4 sm:$0xff]  }
 0x36f   : > { %v3362_v63 = vsub.f32 1.0, %v4679_v43  ;;  %v4680_v36 = vsel %vm3315_vm3, 1.0, %v7137_v21  ;;  %vm3318_vm4 = vcmp.ge.f32.partialorder %v3302_v40, 1.0  ;;  %v5192_v17 = vld [vmem:[%s7086_s6 + $0x2c8] ss:$16 sps:$4 sm:$0xff]  }
 0x370   : > { %v3363_v30 = vsub.f32 1.0, %v4680_v36  ;;  %v4683_v14 = vsel %vm3318_vm4, 1.0, %v7137_v21  ;;  %vm3319_vm5 = vcmp.ge.f32.partialorder %v3303_v59, 1.0  ;;  %vm6849_vm6 = vmpackc.low %vm3318_vm4, %vm3314_vm2  ;;  %v5197_v31 = vld [vmem:[%s7086_s6 + $0x2e4] ss:$16 sps:$4 sm:$0xff]  }
 0x371   : > { %4234 = vmatpush1.bf16.msra.mxu0 %v5159_v51  ;;  %4340 = vmatpush1.bf16.msra.mxu1 %v5162_v2  ;;  %v3378_v20 = vmul.f32 %v3362_v63, %v3298_v28  ;;  %v3366_v53 = vsub.f32 1.0, %v4683_v14  ;;  %v4684_v1 = vsel %vm3319_vm5, 1.0, %v7137_v21  ;;  %vm4819_vm7 = vmpackc.low %vm3319_vm5, %vm3315_vm3  ;;  %v5195_v37 = vld [vmem:[%s7086_s6 + $0x2e0] ss:$16 sps:$4 sm:$0xff]   ;;  %v5198_v22 = vld [vmem:[%s7086_s6 + $0x2e8] ss:$16 sps:$4 sm:$0xff]  }
 0x372   : > { %4235 = vmatprep.subr.bf16.mxu0 %v5167_v25  ;;  %4341 = vmatprep.subr.bf16.mxu1 %v5170_v27  ;;  %v3379_v52 = vmul.f32 %v3363_v30, %v3299_v0  ;;  %v3367_v7 = vsub.f32 1.0, %v4684_v1  ;;  %v5203_v46 = vld [vmem:[%s7086_s6 + $0x304] ss:$16 sps:$4 sm:$0xff]   ;;  %v5206_v39 = vld [vmem:[%s7086_s6 + $0x30c] ss:$16 sps:$4 sm:$0xff]  }
 0x373   : > { %4820 = vmatprep.mubr.msk.bf16.mxu0 %vm4819_vm7, %v5269_v61  ;;  %4836 = vmatprep.mubr.msk.bf16.mxu1 %vm4819_vm7, %v5269_v61  ;;  %3394 = vst [vmem:[#allocation3 + $0x40] sm:$0xff] %v3378_v20  ;;  %v3382_v55 = vmul.f32 %v3366_v53, %v3302_v40  ;;  %v5201_v16 = vld [vmem:[%s7086_s6 + $0x300] ss:$16 sps:$4 sm:$0xff]   ;;  %v5204_v38 = vld [vmem:[%s7086_s6 + $0x308] ss:$16 sps:$4 sm:$0xff]  }
 0x374   : > { %4822 = vmatmul.mubr.msk.bf16.gmra.mrb[44].mxu0 %vm6849_vm6, %v5269_v61  ;;  %4838 = vmatmul.mubr.msk.bf16.gmra.mrb[44].mxu1 %vm6849_vm6, %v5269_v61  ;;  %3395 = vst [vmem:[#allocation3 + $0x48] sm:$0xff] %v3379_v52  ;;  %v3383_v10 = vmul.f32 %v3367_v7, %v3303_v59  ;;  %v5209_v41 = vld [vmem:[%s7086_s6 + $0x324] ss:$16 sps:$4 sm:$0xff]   ;;  %v5212_v9 = vld [vmem:[%s7086_s6 + $0x32c] ss:$16 sps:$4 sm:$0xff]  }
 0x375   : > { %4236 = vmatpush1.bf16.msra.mxu0 %v5165_v19  ;;  %4342 = vmatpush1.bf16.msra.mxu1 %v5168_v62  ;;  %3398 = vst [vmem:[#allocation3 + $0x60] sm:$0xff] %v3382_v55  ;;  %v5207_v44 = vld [vmem:[%s7086_s6 + $0x320] ss:$16 sps:$4 sm:$0xff]   ;;  %v5210_v24 = vld [vmem:[%s7086_s6 + $0x328] ss:$16 sps:$4 sm:$0xff]  }
 0x376   : > { %4237 = vmatprep.subr.bf16.mxu0 %v5173_v32  ;;  %4343 = vmatprep.subr.bf16.mxu1 %v5176_v26  ;;  %3399 = vst [vmem:[#allocation3 + $0x68] sm:$0xff] %v3383_v10  ;;  %v5215_v33 = vld [vmem:[%s7086_s6 + $0x344] ss:$16 sps:$4 sm:$0xff]   ;;  %v5218_v45 = vld [vmem:[%s7086_s6 + $0x34c] ss:$16 sps:$4 sm:$0xff]  }
 0x377   : > { %v5213_v28 = vld [vmem:[%s7086_s6 + $0x340] ss:$16 sps:$4 sm:$0xff]   ;;  %v5216_v34 = vld [vmem:[%s7086_s6 + $0x348] ss:$16 sps:$4 sm:$0xff]   ;;  %v5221_v35 = vld [vmem:[%s7086_s6 + $0x364] ss:$16 sps:$4 sm:$0xff]  }
 0x378   : > { %v5224_v15 = vld [vmem:[%s7086_s6 + $0x36c] ss:$16 sps:$4 sm:$0xff]   ;;  %v3276_v0 = vld [vmem:[#allocation3 + $0x10] sm:$0xff]  ;;  %v5222_v25 = vld [vmem:[%s7086_s6 + $0x368] ss:$16 sps:$4 sm:$0xff]  }
 0x379   : > { %4238 = vmatpush1.bf16.msra.mxu0 %v5171_v4  ;;  %4344 = vmatpush1.bf16.msra.mxu1 %v5174_v8  ;;  %v3277_v2 = vld [vmem:[#allocation3 + $0x18] sm:$0xff]  ;;  %v5219_v40 = vld [vmem:[%s7086_s6 + $0x360] ss:$16 sps:$4 sm:$0xff]   ;;  %v5227_v63 = vld [vmem:[%s7086_s6 + $0x384] ss:$16 sps:$4 sm:$0xff]  }
 0x37a   : > { %4239 = vmatprep.subr.bf16.mxu0 %v5179_v50  ;;  %4345 = vmatprep.subr.bf16.mxu1 %v5182_v48  ;;  %v3280_v59 = vld [vmem:[#allocation3 + $0x30] sm:$0xff]  ;;  %v5230_v36 = vld [vmem:[%s7086_s6 + $0x38c] ss:$16 sps:$4 sm:$0xff]   ;;  %v5228_v1 = vld [vmem:[%s7086_s6 + $0x388] ss:$16 sps:$4 sm:$0xff]  }
 0x37b   : > { %v3281_v62 = vld [vmem:[#allocation3 + $0x38] sm:$0xff]  ;;  %v5225_v53 = vld [vmem:[%s7086_s6 + $0x380] ss:$16 sps:$4 sm:$0xff]  }
 0x37c   : > { %v5236_v52 = vld [vmem:[%s7086_s6 + $0x3ac] ss:$16 sps:$4 sm:$0xff]   ;;  %v5231_v10 = vld [vmem:[%s7086_s6 + $0x3a0] ss:$16 sps:$4 sm:$0xff]   ;;  %v5234_v4 = vld [vmem:[%s7086_s6 + $0x3a8] ss:$16 sps:$4 sm:$0xff]  }
 0x37d   : > { %4240 = vmatpush1.bf16.msra.mxu0 %v5177_v56  ;;  %4346 = vmatpush1.bf16.msra.mxu1 %v5180_v58  ;;  %v3284_v58 = vld [vmem:[#allocation3 + $0x50] sm:$0xff] }
 0x37e   : > { %4241 = vmatprep.subr.bf16.mxu0 %v5185_v18  ;;  %4347 = vmatprep.subr.bf16.mxu1 %v5188_v6 }
 0x381   : > { %4242 = vmatpush1.bf16.msra.mxu0 %v5183_v5  ;;  %4348 = vmatpush1.bf16.msra.mxu1 %v5186_v13 }
 0x382   : > { %4243 = vmatprep.subr.bf16.mxu0 %v5191_v23  ;;  %4349 = vmatprep.subr.bf16.mxu1 %v5194_v47  ;;  %v3285_v47 = vld [vmem:[#allocation3 + $0x58] sm:$0xff] }
 0x385   : > { %4244 = vmatpush1.bf16.msra.mxu0 %v5189_v49  ;;  %4350 = vmatpush1.bf16.msra.mxu1 %v5192_v17  ;;  %v5239_v49 = vld [vmem:[%s7086_s6 + $0x3c4] ss:$16 sps:$4 sm:$0xff]  }
 0x386   : > { %4245 = vmatprep.subr.bf16.mxu0 %v5197_v31  ;;  %4351 = vmatprep.subr.bf16.mxu1 %v5200_v42 }
 0x389   : > { %4246 = vmatpush1.bf16.msra.mxu0 %v5195_v37  ;;  %4352 = vmatpush1.bf16.msra.mxu1 %v5198_v22  ;;  %v3288_v22 = vld [vmem:[#allocation3 + $0x70] sm:$0xff] }
 0x38a   : > { %4247 = vmatprep.subr.bf16.mxu0 %v5203_v46  ;;  %4353 = vmatprep.subr.bf16.mxu1 %v5206_v39  ;;  %v5242_v46 = vld [vmem:[%s7086_s6 + $0x3cc] ss:$16 sps:$4 sm:$0xff]  }
 0x38d   : > { %4248 = vmatpush1.bf16.msra.mxu0 %v5201_v16  ;;  %4354 = vmatpush1.bf16.msra.mxu1 %v5204_v38 }
 0x38e   : > { %4249 = vmatprep.subr.bf16.mxu0 %v5209_v41  ;;  %4355 = vmatprep.subr.bf16.mxu1 %v5212_v9  ;;  %v3289_v9 = vld [vmem:[#allocation3 + $0x78] sm:$0xff] }
 0x391   : > { %4250 = vmatpush1.bf16.msra.mxu0 %v5207_v44  ;;  %4356 = vmatpush1.bf16.msra.mxu1 %v5210_v24 }
 0x392   : > { %4251 = vmatprep.subr.bf16.mxu0 %v5215_v33  ;;  %4357 = vmatprep.subr.bf16.mxu1 %v5218_v45  ;;  %v5237_v45 = vld [vmem:[%s7086_s6 + $0x3c0] ss:$16 sps:$4 sm:$0xff]  }
 0x393   : > { %v3199_v11 = vpop.f32.mrb[32].mxu1 }
 0x394   : > { %v3260_v57 = vadd.f32 %v6779_v12, %v3199_v11  ;;  %v3201_v51 = vpop.f32.mrb[33].mxu1 }
 0x395   : > { %4252 = vmatpush1.bf16.msra.mxu0 %v5213_v28  ;;  %4358 = vmatpush1.bf16.msra.mxu1 %v5216_v34  ;;  %v3261_v27 = vadd.f32 %v6779_v12, %v3201_v51  ;;  %v3203_v43 = vpop.f32.mrb[34].mxu1  ;;  %v5240_v28 = vld [vmem:[%s7086_s6 + $0x3c8] ss:$16 sps:$4 sm:$0xff]  }
 0x396   : > { %4253 = vmatprep.subr.bf16.mxu0 %v5221_v35  ;;  %4359 = vmatprep.subr.bf16.mxu1 %v5224_v15  ;;  %v3292_v19 = vadd.f32 %v3276_v0, %v3260_v57  ;;  %v3264_v30 = vadd.f32 %v6782_v29, %v3203_v43  ;;  %v3205_v14 = vpop.f32.mrb[35].mxu1  ;;  %v5248_v15 = vld [vmem:[%s7086_s6 + $0x3ec] ss:$16 sps:$4 sm:$0xff]   ;;  %v5243_v43 = vld [vmem:[%s7086_s6 + $0x3e0] ss:$16 sps:$4 sm:$0xff]  }
 0x397   : > { %v3293_v60 = vadd.f32 %v3277_v2, %v3261_v27  ;;  %v3265_v12 = vadd.f32 %v6782_v29, %v3205_v14  ;;  %v5233_v29 = vld [vmem:[%s7086_s6 + $0x3a4] ss:$16 sps:$4 sm:$0xff]  }
 0x398   : > { %vm3308_vm8 = vcmp.ge.f32.partialorder %v3292_v19, 1.0  ;;  %v3296_v20 = vadd.f32 %v3280_v59, %v3264_v30  ;;  %v5246_v59 = vld [vmem:[%s7086_s6 + $0x3e8] ss:$16 sps:$4 sm:$0xff]  }
 0x399   : > { %4254 = vmatpush1.bf16.msra.mxu0 %v5219_v40  ;;  %4360 = vmatpush1.bf16.msra.mxu1 %v5222_v25  ;;  %v4673_v32 = vsel %vm3308_vm8, 1.0, %v7137_v21  ;;  %vm3309_vm9 = vcmp.ge.f32.partialorder %v3293_v60, 1.0  ;;  %v3297_v26 = vadd.f32 %v3281_v62, %v3265_v12 }
 0x39a   : > { %4255 = vmatprep.subr.bf16.mxu0 %v5227_v63  ;;  %4361 = vmatprep.subr.bf16.mxu1 %v5230_v36  ;;  %v3356_v7 = vsub.f32 1.0, %v4673_v32  ;;  %v4674_v55 = vsel %vm3309_vm9, 1.0, %v7137_v21  ;;  %vm3312_vm10 = vcmp.ge.f32.partialorder %v3296_v20, 1.0 }
 0x39b   : > { %v3357_v8 = vsub.f32 1.0, %v4674_v55  ;;  %v4677_v50 = vsel %vm3312_vm10, 1.0, %v7137_v21  ;;  %vm7005_vm11 = vmpackc.low %vm3312_vm10, %vm3308_vm8  ;;  %vm3313_vm12 = vcmp.ge.f32.partialorder %v3297_v26, 1.0  ;;  %v3209_v56 = vpop.f32.mrb[36].mxu1 }
 0x39c   : > { %v3372_v18 = vmul.f32 %v3356_v7, %v3292_v19  ;;  %v3360_v6 = vsub.f32 1.0, %v4677_v50  ;;  %v4678_v5 = vsel %vm3313_vm12, 1.0, %v7137_v21  ;;  %v3268_v13 = vadd.f32 %v6796_v54, %v3209_v56  ;;  %v3211_v23 = vpop.f32.mrb[37].mxu1  ;;  %vm4823_vm13 = vmpackc.low %vm3313_vm12, %vm3309_vm9 }
 0x39d   : > { %4256 = vmatpush1.bf16.msra.mxu0 %v5225_v53  ;;  %4362 = vmatpush1.bf16.msra.mxu1 %v5228_v1  ;;  %v3373_v17 = vmul.f32 %v3357_v8, %v3293_v60  ;;  %v3361_v31 = vsub.f32 1.0, %v4678_v5  ;;  %v3269_v42 = vadd.f32 %v6796_v54, %v3211_v23  ;;  %v3213_v37 = vpop.f32.mrb[38].mxu1 }
 0x39e   : > { %4257 = vmatprep.subr.bf16.mxu0 %v5233_v29  ;;  %4363 = vmatprep.subr.bf16.mxu1 %v5236_v52  ;;  %3388 = vst [vmem:[#allocation3 + $0x10] sm:$0xff] %v3372_v18  ;;  %v3376_v39 = vmul.f32 %v3360_v6, %v3296_v20  ;;  %v3300_v16 = vadd.f32 %v3284_v58, %v3268_v13  ;;  %v3215_v41 = vpop.f32.mrb[39].mxu1 }
 0x39f   : > { %v3272_v38 = vadd.f32 %v6812_v3, %v3213_v37  ;;  %4824 = vmatprep.mubr.msk.bf16.mxu0 %vm4823_vm13, %v5269_v61  ;;  %4840 = vmatprep.mubr.msk.bf16.mxu1 %vm4823_vm13, %v5269_v61  ;;  %3389 = vst [vmem:[#allocation3 + $0x18] sm:$0xff] %v3373_v17  ;;  %v3377_v54 = vmul.f32 %v3361_v31, %v3297_v26 }
 0x3a0   : > { %v3301_v44 = vadd.f32 %v3285_v47, %v3269_v42  ;;  %v3273_v24 = vadd.f32 %v6812_v3, %v3215_v41  ;;  %3392 = vst [vmem:[#allocation3 + $0x30] sm:$0xff] %v3376_v39  ;;  %vm3316_vm14 = vcmp.ge.f32.partialorder %v3300_v16, 1.0  ;;  %v5245_v3 = vld [vmem:[%s7086_s6 + $0x3e4] ss:$16 sps:$4 sm:$0xff]  }
 0x3a1   : > { %v3304_v33 = vadd.f32 %v3288_v22, %v3272_v38  ;;  %4258 = vmatpush1.bf16.msra.mxu0 %v5231_v10  ;;  %4364 = vmatpush1.bf16.msra.mxu1 %v5234_v4  ;;  %3393 = vst [vmem:[#allocation3 + $0x38] sm:$0xff] %v3377_v54  ;;  %v4681_v34 = vsel %vm3316_vm14, 1.0, %v7137_v21 }
 0x3a2   : > { %vm3317_vm15 = vcmp.ge.f32.partialorder %v3301_v44, 1.0  ;;  %v3305_v35 = vadd.f32 %v3289_v9, %v3273_v24  ;;  %4259 = vmatprep.subr.bf16.mxu0 %v5239_v49  ;;  %4365 = vmatprep.subr.bf16.mxu1 %v5242_v46  ;;  %v3364_v11 = vsub.f32 1.0, %v4681_v34 }
 0x3a3   : > { %v4682_v0 = vsel %vm3317_vm15, 1.0, %v7137_v21  ;;  %vm3320_vm0 = vcmp.ge.f32.partialorder %v3304_v33, 1.0 }
 0x3a4   : > { %v3365_v57 = vsub.f32 1.0, %v4682_v0  ;;  %v4685_v51 = vsel %vm3320_vm0, 1.0, %v7137_v21  ;;  %vm3321_vm1 = vcmp.ge.f32.partialorder %v3305_v35, 1.0  ;;  %vm7041_vm2 = vmpackc.low %vm3320_vm0, %vm3316_vm14  ;;  %v3380_v40 = vmul.f32 %v3364_v11, %v3300_v16 }
 0x3a5   : > { %v3368_v25 = vsub.f32 1.0, %v4685_v51  ;;  %v4686_v27 = vsel %vm3321_vm1, 1.0, %v7137_v21  ;;  %4260 = vmatpush1.bf16.msra.mxu0 %v5237_v45  ;;  %4366 = vmatpush1.bf16.msra.mxu1 %v5240_v28  ;;  %vm7053_vm3 = vmpackc.low %vm3321_vm1, %vm3317_vm15 }
 0x3a6   : > { %v3381_v36 = vmul.f32 %v3365_v57, %v3301_v44  ;;  %v3369_v19 = vsub.f32 1.0, %v4686_v27  ;;  %4261 = vmatprep.subr.bf16.mxu0 %v5245_v3  ;;  %4367 = vmatprep.subr.bf16.mxu1 %v5248_v15  ;;  %3396 = vst [vmem:[#allocation3 + $0x50] sm:$0xff] %v3380_v40 }
 0x3a7   : > { %v3384_v21 = vmul.f32 %v3368_v25, %v3304_v33 }
 0x3a8   : > { %3397 = vst [vmem:[#allocation3 + $0x58] sm:$0xff] %v3381_v36  ;;  %v3385_v30 = vmul.f32 %v3369_v19, %v3305_v35 }
 0x3a9   : > { %3400 = vst [vmem:[#allocation3 + $0x70] sm:$0xff] %v3384_v21  ;;  %4262 = vmatpush1.bf16.msra.mxu0 %v5243_v43  ;;  %4368 = vmatpush1.bf16.msra.mxu1 %v5246_v59 }
 0x3aa   : > { %3401 = vst [vmem:[#allocation3 + $0x78] sm:$0xff] %v3385_v30 }
 0x3ac   : > { %4826 = vmatmul.mubr.msk.bf16.vlgmr.msra.gmra.mrb[40].mxu0 %vm7005_vm11, %v5269_v61  ;;  %4842 = vmatmul.mubr.msk.bf16.vlgmr.msra.gmra.mrb[40].mxu1 %vm7005_vm11, %v5269_v61 }
 0x3ad   : > { %4828 = vmatprep.mubr.msk.bf16.mxu0 %vm7053_vm3, %v5269_v61  ;;  %4844 = vmatprep.mubr.msk.bf16.mxu1 %vm7053_vm3, %v5269_v61 }
 0x3b4   : > { %4830 = vmatmul.mubr.msk.bf16.gmra.mrb[44].mxu0 %vm7041_vm2, %v5269_v61  ;;  %4846 = vmatmul.mubr.msk.bf16.gmra.mrb[44].mxu1 %vm7041_vm2, %v5269_v61 }
 0x47f   : > { %v4265_v14 = vpop.f32.mrb[40].mxu0  ;;  %v4371_v62 = vpop.f32.mrb[40].mxu1 }
 0x480   : > { %v4267_v60 = vpop.f32.mrb[41].mxu0  ;;  %v4373_v12 = vpop.f32.mrb[41].mxu1 }
 0x481   : > { %v4390_v20 = vmax.f32 %v4265_v14, %v4267_v60  ;;  %v4394_v53 = vmax.f32 %v4371_v62, %v4373_v12  ;;  %v4269_v1 = vpop.f32.mrb[42].mxu0  ;;  %v4375_v32 = vpop.f32.mrb[42].mxu1 }
 0x482   : > { %v4271_v26 = vpop.f32.mrb[43].mxu0  ;;  %v4377_v29 = vpop.f32.mrb[43].mxu1 }
 0x483   : > { %v4398_v52 = vmax.f32 %v4390_v20, %v4394_v53  ;;  %v4391_v7 = vmax.f32 %v4269_v1, %v4271_v26  ;;  %v4395_v55 = vmax.f32 %v4375_v32, %v4377_v29 }
 0x485   : > { %v4399_v10 = vmax.f32 %v4391_v7, %v4395_v55 }
 0x487   : > { %v4862_v4 = vpack.c.bf16 %v4399_v10, %v4398_v52  ;;  %v4275_v8 = vpop.f32.mrb[44].mxu0  ;;  %v4381_v50 = vpop.f32.mrb[44].mxu1 }
 0x488   : > { %v4277_v61 = vpop.f32.mrb[45].mxu0  ;;  %v4383_v48 = vpop.f32.mrb[45].mxu1 }
 0x489   : > { %4863 = vst [vmem:[%s5326_s11] sm:$0xff] %v4862_v4   ;;  %v4392_v56 = vmax.f32 %v4275_v8, %v4277_v61  ;;  %v4396_v58 = vmax.f32 %v4381_v50, %v4383_v48  ;;  %v4279_v18 = vpop.f32.mrb[46].mxu0  ;;  %v4385_v6 = vpop.f32.mrb[46].mxu1 }
 0x48a   : > { %v4281_v5 = vpop.f32.mrb[47].mxu0  ;;  %v4387_v13 = vpop.f32.mrb[47].mxu1 }
 0x48b   : > { %v4400_v23 = vmax.f32 %v4392_v56, %v4396_v58  ;;  %v4393_v47 = vmax.f32 %v4279_v18, %v4281_v5  ;;  %v4397_v49 = vmax.f32 %v4385_v6, %v4387_v13 }
 0x48d   : > { %v4401_v17 = vmax.f32 %v4393_v47, %v4397_v49 }
 0x48f   : > { %v4867_v31 = vpack.c.bf16 %v4401_v17, %v4400_v23 }
 0x491   : > { %4869 = vst [vmem:[%s5326_s11 + $0x8] sm:$0xff] %v4867_v31  }
 0x492 PF: > { %s17_s24 = sadd.s32 1, %s5255_s24  }
 0x493   : > { %p14_p5 = scmp.ge.s32.totalorder %s17_s24, 6  }
 0x495   :  { %16 = sbr.rel (!%p14_p5) target bundleno = 1 (0x1), region = 90 }

// kernel: recurrent_stal_classifier_forward.3
= control target key start
LH: loop header
LB: loop body
LE: loop exit
PB: predicated region body
PF: predicated region fallthrough
CT: control target
= control target key end

     0   :  { %8 = vsyncpa [#allocation5], 0  ;;  %s4891_s12 = smov 0   ;;  %s6277_s0 = inlined_call_operand.vmem [shape: bf16[4,2,1568], index: 0, kind: input, shape index: {}]   ;;  %s6278_s1 = inlined_call_operand.vmem [shape: bf16[1568,512], index: 1, kind: input, shape index: {}]   ;;  %s6279_s2 = inlined_call_operand.vmem [shape: bf16[512,10], index: 2, kind: input, shape index: {}]   ;;  %s6280_s3 = inlined_call_operand.hbm [shape: f32[2,10], index: 3, kind: output, shape index: {}]  }
   0x1 LB: > { %s4897_s13 = sadd.s32 4294967295, %s4863_s12   ;;  %p3657_p0 = scmp.ge.s32.totalorder %s4863_s12, 1  ;;  %s4863_s12 = sphi %s4891_s12, %s14_s12  }
   0x2   : > { %p132_p1 = scmp.lt.s32.totalorder %s4863_s12, 5 }
   0x4   : > { %p133_p2 = pnand %p3657_p0, %p132_p1 }
   0x5   : > { %p150_p3 = scmp.lt.s32.totalorder (!%p133_p2), %s4897_s13, 3  ;;  %p3658_p4 = scmp.ne.s32.totalorder (!%p133_p2), %s4897_s13, 0 }
   0x6   : > { %136 = sbr.rel (%p133_p2) target bundleno = 909 (0x38d), region = 32 }
   0xd   : > { %s151_s14 = scalar_select %p150_p3, %s4897_s13, 3 }
   0xe   : > { %158 = sbr.rel (%p3658_p4) target bundleno = 21 (0x15), region = 36  ;;  %vm160_vm0 = vcmask (!%p3658_p4), 74752   ;;  %v4865_v0 = vmov (!%p3658_p4), 0.0  }
   0xf   : > { %s4184_s15 = smul.u32 13, %s151_s14  ;;  %159 = vst [vmem:[#allocation2] sm:$0xff] (!%p3658_p4), %v4865_v0  ;;  %161 = vst.msk [vmem:[#allocation3] sm:$0x3] (!%p3658_p4), %vm160_vm0, %v4865_v0 }
  0x10   : > { %162 = vst.msk [vmem:[#allocation4] sm:$0x3] (!%p3658_p4), %vm160_vm0, %v4865_v0 }
  0x11   : > { %s4906_s18 = scalar_lea.vmem %s6277_s0, %s4184_s15 }
  0x15 PF: > { %v4205_v1 = vld [vmem:[%s6278_s1 + $0x4] ss:$16 sps:$4 sm:$0xff]   ;;  %v4207_v2 = vld [vmem:[%s6278_s1 + $0xc] ss:$16 sps:$4 sm:$0xff]   ;;  %v4209_v3 = vld [vmem:[%s6278_s1] ss:$16 sps:$4 sm:$0xff]   ;;  %v563_v39 = vlaneseq }
  0x16   : > { %2623 = vmatprep.subr.bf16.mxu0 %v4205_v1  ;;  %v4210_v4 = vld [vmem:[%s6278_s1 + $0x8] ss:$16 sps:$4 sm:$0xff]   ;;  %2910 = vmatprep.subr.bf16.mxu1 %v4207_v2  ;;  %v4211_v5 = vld [vmem:[%s6278_s1 + $0x24] ss:$16 sps:$4 sm:$0xff]   ;;  %v4213_v6 = vld [vmem:[%s6278_s1 + $0x2c] ss:$16 sps:$4 sm:$0xff]  }
  0x17   : > { %2624 = vmatpush1.bf16.msra.mxu0 %v4209_v3  ;;  %2911 = vmatpush1.bf16.msra.mxu1 %v4210_v4  ;;  %v4215_v7 = vld [vmem:[%s6278_s1 + $0x20] ss:$16 sps:$4 sm:$0xff]   ;;  %v4216_v8 = vld [vmem:[%s6278_s1 + $0x28] ss:$16 sps:$4 sm:$0xff]   ;;  %v4217_v9 = vld [vmem:[%s6278_s1 + $0x44] ss:$16 sps:$4 sm:$0xff]  }
  0x18   : > { %2625 = vmatprep.subr.bf16.mxu0 %v4211_v5  ;;  %2912 = vmatprep.subr.bf16.mxu1 %v4213_v6  ;;  %v4219_v10 = vld [vmem:[%s6278_s1 + $0x4c] ss:$16 sps:$4 sm:$0xff]   ;;  %v4221_v11 = vld [vmem:[%s6278_s1 + $0x40] ss:$16 sps:$4 sm:$0xff]   ;;  %v4222_v12 = vld [vmem:[%s6278_s1 + $0x48] ss:$16 sps:$4 sm:$0xff]  }
  0x19   : > { %v4223_v13 = vld [vmem:[%s6278_s1 + $0x64] ss:$16 sps:$4 sm:$0xff]   ;;  %v4225_v14 = vld [vmem:[%s6278_s1 + $0x6c] ss:$16 sps:$4 sm:$0xff]   ;;  %v4227_v15 = vld [vmem:[%s6278_s1 + $0x60] ss:$16 sps:$4 sm:$0xff]  }
  0x1a   : > { %v4228_v16 = vld [vmem:[%s6278_s1 + $0x68] ss:$16 sps:$4 sm:$0xff]   ;;  %v4229_v17 = vld [vmem:[%s6278_s1 + $0x84] ss:$16 sps:$4 sm:$0xff]   ;;  %v4231_v18 = vld [vmem:[%s6278_s1 + $0x8c] ss:$16 sps:$4 sm:$0xff]  }
  0x1b   : > { %2626 = vmatpush1.bf16.msra.mxu0 %v4215_v7  ;;  %2913 = vmatpush1.bf16.msra.mxu1 %v4216_v8  ;;  %v4233_v19 = vld [vmem:[%s6278_s1 + $0x80] ss:$16 sps:$4 sm:$0xff]   ;;  %v4234_v20 = vld [vmem:[%s6278_s1 + $0x88] ss:$16 sps:$4 sm:$0xff]   ;;  %v4235_v21 = vld [vmem:[%s6278_s1 + $0xa4] ss:$16 sps:$4 sm:$0xff]  }
  0x1c   : > { %2627 = vmatprep.subr.bf16.mxu0 %v4217_v9  ;;  %2914 = vmatprep.subr.bf16.mxu1 %v4219_v10  ;;  %v4237_v22 = vld [vmem:[%s6278_s1 + $0xac] ss:$16 sps:$4 sm:$0xff]   ;;  %v4239_v23 = vld [vmem:[%s6278_s1 + $0xa0] ss:$16 sps:$4 sm:$0xff]   ;;  %v4240_v24 = vld [vmem:[%s6278_s1 + $0xa8] ss:$16 sps:$4 sm:$0xff]  }
  0x1d   : > { %v4241_v25 = vld [vmem:[%s6278_s1 + $0xc4] ss:$16 sps:$4 sm:$0xff]   ;;  %v4243_v26 = vld [vmem:[%s6278_s1 + $0xcc] ss:$16 sps:$4 sm:$0xff]   ;;  %v4245_v27 = vld [vmem:[%s6278_s1 + $0xc0] ss:$16 sps:$4 sm:$0xff]  }
  0x1e   : > { %v4246_v28 = vld [vmem:[%s6278_s1 + $0xc8] ss:$16 sps:$4 sm:$0xff]   ;;  %v4247_v29 = vld [vmem:[%s6278_s1 + $0xe4] ss:$16 sps:$4 sm:$0xff]   ;;  %v4249_v30 = vld [vmem:[%s6278_s1 + $0xec] ss:$16 sps:$4 sm:$0xff]  }
  0x1f   : > { %2628 = vmatpush1.bf16.msra.mxu0 %v4221_v11  ;;  %2915 = vmatpush1.bf16.msra.mxu1 %v4222_v12  ;;  %v4251_v31 = vld [vmem:[%s6278_s1 + $0xe0] ss:$16 sps:$4 sm:$0xff]   ;;  %v4252_v32 = vld [vmem:[%s6278_s1 + $0xe8] ss:$16 sps:$4 sm:$0xff]   ;;  %v4253_v33 = vld [vmem:[%s6278_s1 + $0x104] ss:$16 sps:$4 sm:$0xff]  }
  0x20   : > { %2629 = vmatprep.subr.bf16.mxu0 %v4223_v13  ;;  %2916 = vmatprep.subr.bf16.mxu1 %v4225_v14  ;;  %v4255_v34 = vld [vmem:[%s6278_s1 + $0x10c] ss:$16 sps:$4 sm:$0xff]   ;;  %v4257_v35 = vld [vmem:[%s6278_s1 + $0x100] ss:$16 sps:$4 sm:$0xff]   ;;  %v4258_v36 = vld [vmem:[%s6278_s1 + $0x108] ss:$16 sps:$4 sm:$0xff]  }
  0x21   : > { %v4866_v37 = vmov 1966171168   ;;  %v4259_v40 = vld [vmem:[%s6278_s1 + $0x124] ss:$16 sps:$4 sm:$0xff]   ;;  %v4261_v41 = vld [vmem:[%s6278_s1 + $0x12c] ss:$16 sps:$4 sm:$0xff]  }
  0x22   : > { %v561_v38 = vunpack.c.l.s4 %v4866_v37  ;;  %v4263_v42 = vld [vmem:[%s6278_s1 + $0x120] ss:$16 sps:$4 sm:$0xff]   ;;  %v5026_v44 = vshrl.u32 %v563_v39, 7  ;;  %v4264_v45 = vld [vmem:[%s6278_s1 + $0x128] ss:$16 sps:$4 sm:$0xff]   ;;  %vm2619_vm1 = vcmask 261120  }
  0x23   : > { %2630 = vmatpush1.bf16.msra.mxu0 %v4227_v15  ;;  %2917 = vmatpush1.bf16.msra.mxu1 %v4228_v16  ;;  %v4265_v46 = vld [vmem:[%s6278_s1 + $0x144] ss:$16 sps:$4 sm:$0xff]   ;;  %v4267_v47 = vld [vmem:[%s6278_s1 + $0x14c] ss:$16 sps:$4 sm:$0xff]   ;;  %v4269_v48 = vld [vmem:[%s6278_s1 + $0x140] ss:$16 sps:$4 sm:$0xff]  }
  0x24   : > { %2631 = vmatprep.subr.bf16.mxu0 %v4229_v17  ;;  %2918 = vmatprep.subr.bf16.mxu1 %v4231_v18  ;;  %v562_v43 = vunpack.c.0.s8 %v561_v38  ;;  %v4270_v49 = vld [vmem:[%s6278_s1 + $0x148] ss:$16 sps:$4 sm:$0xff]   ;;  %v4271_v51 = vld [vmem:[%s6278_s1 + $0x164] ss:$16 sps:$4 sm:$0xff]   ;;  %v4273_v52 = vld [vmem:[%s6278_s1 + $0x16c] ss:$16 sps:$4 sm:$0xff]  }
  0x25   : > { %v5053_v53 = vld [vmem:[%s4906_s18] sm:$0xff]  ;;  %v4276_v56 = vld [vmem:[%s6278_s1 + $0x168] ss:$16 sps:$4 sm:$0xff]   ;;  %v4279_v58 = vld [vmem:[%s6278_s1 + $0x18c] ss:$16 sps:$4 sm:$0xff]   ;;  %vm3596_vm4 = vcmask 74752  }
  0x26   : > { %v5044_v50 = vsub.s32 %v562_v43, %v5026_v44  ;;  %v4275_v54 = vld [vmem:[%s6278_s1 + $0x160] ss:$16 sps:$4 sm:$0xff]   ;;  %v4277_v57 = vld [vmem:[%s6278_s1 + $0x184] ss:$16 sps:$4 sm:$0xff]   ;;  %v4282_v62 = vld [vmem:[%s6278_s1 + $0x188] ss:$16 sps:$4 sm:$0xff]  }
  0x27   : > { %2632 = vmatpush1.bf16.msra.mxu0 %v4233_v19  ;;  %2919 = vmatpush1.bf16.msra.mxu1 %v4234_v20  ;;  %v4281_v60 = vld [vmem:[%s6278_s1 + $0x180] ss:$16 sps:$4 sm:$0xff]   ;;  %v4283_v63 = vld [vmem:[%s6278_s1 + $0x1a4] ss:$16 sps:$4 sm:$0xff]   ;;  %v4285_v0 = vld [vmem:[%s6278_s1 + $0x1ac] ss:$16 sps:$4 sm:$0xff]  }
  0x28   : > { %2633 = vmatprep.subr.bf16.mxu0 %v4235_v21  ;;  %2920 = vmatprep.subr.bf16.mxu1 %v4237_v22  ;;  %v566_v55 = vrot.slane %v5053_v53, %v5044_v50  ;;  %v4287_v1 = vld [vmem:[%s6278_s1 + $0x1a0] ss:$16 sps:$4 sm:$0xff]   ;;  %v4288_v2 = vld [vmem:[%s6278_s1 + $0x1a8] ss:$16 sps:$4 sm:$0xff]   ;;  %v4289_v3 = vld [vmem:[%s6278_s1 + $0x1c4] ss:$16 sps:$4 sm:$0xff]  }
  0x29   : > { %v4291_v4 = vld [vmem:[%s6278_s1 + $0x1cc] ss:$16 sps:$4 sm:$0xff]   ;;  %v4293_v5 = vld [vmem:[%s6278_s1 + $0x1c0] ss:$16 sps:$4 sm:$0xff]   ;;  %v4294_v6 = vld [vmem:[%s6278_s1 + $0x1c8] ss:$16 sps:$4 sm:$0xff]  }
  0x2a   : > { %v574_v59 = vcombine.high %v566_v55, %v566_v55  ;;  %v4295_v7 = vld [vmem:[%s6278_s1 + $0x1e4] ss:$16 sps:$4 sm:$0xff]   ;;  %v4297_v8 = vld [vmem:[%s6278_s1 + $0x1ec] ss:$16 sps:$4 sm:$0xff]   ;;  %v4299_v9 = vld [vmem:[%s6278_s1 + $0x1e0] ss:$16 sps:$4 sm:$0xff]   ;;  %v5122_v14 = vrot.slane %v566_v55, %v5044_v50 }
  0x2b   : > { %2634 = vmatpush1.bf16.msra.mxu0 %v4239_v23  ;;  %2921 = vmatpush1.bf16.msra.mxu1 %v4240_v24  ;;  %v4300_v10 = vld [vmem:[%s6278_s1 + $0x1e8] ss:$16 sps:$4 sm:$0xff]   ;;  %v4303_v11 = vld [vmem:[%s6278_s1 + $0x204] ss:$16 sps:$4 sm:$0xff]   ;;  %v4306_v12 = vld [vmem:[%s6278_s1 + $0x20c] ss:$16 sps:$4 sm:$0xff]  }
  0x2c   : > { %2635 = vmatprep.subr.bf16.mxu0 %v4241_v25  ;;  %2922 = vmatprep.subr.bf16.mxu1 %v4243_v26  ;;  %v596_v61 = vrot.slane %v574_v59, %v5044_v50  ;;  %v4301_v13 = vld [vmem:[%s6278_s1 + $0x200] ss:$16 sps:$4 sm:$0xff]   ;;  %v4304_v15 = vld [vmem:[%s6278_s1 + $0x208] ss:$16 sps:$4 sm:$0xff]   ;;  %v4309_v16 = vld [vmem:[%s6278_s1 + $0x224] ss:$16 sps:$4 sm:$0xff]  }
  0x2d   : > { %v4312_v17 = vld [vmem:[%s6278_s1 + $0x22c] ss:$16 sps:$4 sm:$0xff]   ;;  %v4307_v19 = vld [vmem:[%s6278_s1 + $0x220] ss:$16 sps:$4 sm:$0xff]   ;;  %v4310_v20 = vld [vmem:[%s6278_s1 + $0x228] ss:$16 sps:$4 sm:$0xff]  }
  0x2e   : > { %2655 = vmatprep.mubr.bf16.mxu0 %v596_v61  ;;  %2942 = vmatprep.mubr.bf16.mxu1 %v596_v61  ;;  %v606_v18 = vcombine.high %v596_v61, %v596_v61  ;;  %v4315_v21 = vld [vmem:[%s6278_s1 + $0x244] ss:$16 sps:$4 sm:$0xff]   ;;  %v4318_v22 = vld [vmem:[%s6278_s1 + $0x24c] ss:$16 sps:$4 sm:$0xff]   ;;  %v4313_v23 = vld [vmem:[%s6278_s1 + $0x240] ss:$16 sps:$4 sm:$0xff]  }
  0x2f   : > { %2636 = vmatpush1.bf16.msra.mxu0 %v4245_v27  ;;  %2923 = vmatpush1.bf16.msra.mxu1 %v4246_v28  ;;  %v4316_v24 = vld [vmem:[%s6278_s1 + $0x248] ss:$16 sps:$4 sm:$0xff]   ;;  %v4321_v25 = vld [vmem:[%s6278_s1 + $0x264] ss:$16 sps:$4 sm:$0xff]   ;;  %v4324_v26 = vld [vmem:[%s6278_s1 + $0x26c] ss:$16 sps:$4 sm:$0xff]  }
  0x30   : > { %2637 = vmatprep.subr.bf16.mxu0 %v4247_v29  ;;  %2924 = vmatprep.subr.bf16.mxu1 %v4249_v30  ;;  %v4319_v27 = vld [vmem:[%s6278_s1 + $0x260] ss:$16 sps:$4 sm:$0xff]   ;;  %v4322_v28 = vld [vmem:[%s6278_s1 + $0x268] ss:$16 sps:$4 sm:$0xff]   ;;  %v4327_v29 = vld [vmem:[%s6278_s1 + $0x284] ss:$16 sps:$4 sm:$0xff]  }
  0x31   : > { %v4330_v30 = vld [vmem:[%s6278_s1 + $0x28c] ss:$16 sps:$4 sm:$0xff]   ;;  %v4339_v37 = vld [vmem:[%s6278_s1 + $0x2c4] ss:$16 sps:$4 sm:$0xff]   ;;  %v4337_v39 = vld [vmem:[%s6278_s1 + $0x2c0] ss:$16 sps:$4 sm:$0xff]  }
  0x32   : > { %v4342_v38 = vld [vmem:[%s6278_s1 + $0x2cc] ss:$16 sps:$4 sm:$0xff]   ;;  %v4343_v43 = vld [vmem:[%s6278_s1 + $0x2e0] ss:$16 sps:$4 sm:$0xff]   ;;  %v4358_v55 = vld [vmem:[%s6278_s1 + $0x328] ss:$16 sps:$4 sm:$0xff]  }
  0x33   : > { %2638 = vmatpush1.bf16.msra.mxu0 %v4251_v31  ;;  %2925 = vmatpush1.bf16.msra.mxu1 %v4252_v32  ;;  %v4325_v31 = vld [vmem:[%s6278_s1 + $0x280] ss:$16 sps:$4 sm:$0xff]   ;;  %v4328_v32 = vld [vmem:[%s6278_s1 + $0x288] ss:$16 sps:$4 sm:$0xff]   ;;  %v4372_v61 = vld [vmem:[%s6278_s1 + $0x36c] ss:$16 sps:$4 sm:$0xff]  }
  0x34   : > { %2639 = vmatprep.subr.bf16.mxu0 %v4253_v33  ;;  %2926 = vmatprep.subr.bf16.mxu1 %v4255_v34  ;;  %v4333_v33 = vld [vmem:[%s6278_s1 + $0x2a4] ss:$16 sps:$4 sm:$0xff]   ;;  %v4336_v34 = vld [vmem:[%s6278_s1 + $0x2ac] ss:$16 sps:$4 sm:$0xff]   ;;  %v4364_v59 = vld [vmem:[%s6278_s1 + $0x348] ss:$16 sps:$4 sm:$0xff]  }
  0x35   : > { %p4087_p5 = scmp.ne.s32.totalorder %s4897_s13, 3 }
  0x37   : > { %2640 = vmatpush1.bf16.msra.mxu0 %v4257_v35  ;;  %2927 = vmatpush1.bf16.msra.mxu1 %v4258_v36  ;;  %v4331_v35 = vld [vmem:[%s6278_s1 + $0x2a0] ss:$16 sps:$4 sm:$0xff]   ;;  %v4334_v36 = vld [vmem:[%s6278_s1 + $0x2a8] ss:$16 sps:$4 sm:$0xff]  }
  0x38   : > { %2641 = vmatprep.subr.bf16.mxu0 %v4259_v40  ;;  %2928 = vmatprep.subr.bf16.mxu1 %v4261_v41  ;;  %v4340_v40 = vld [vmem:[%s6278_s1 + $0x2c8] ss:$16 sps:$4 sm:$0xff]   ;;  %v4345_v41 = vld [vmem:[%s6278_s1 + $0x2e4] ss:$16 sps:$4 sm:$0xff]  }
  0x3b   : > { %2642 = vmatpush1.bf16.msra.mxu0 %v4263_v42  ;;  %2929 = vmatpush1.bf16.msra.mxu1 %v4264_v45  ;;  %v4348_v42 = vld [vmem:[%s6278_s1 + $0x2ec] ss:$16 sps:$4 sm:$0xff]   ;;  %v4346_v45 = vld [vmem:[%s6278_s1 + $0x2e8] ss:$16 sps:$4 sm:$0xff]  }
  0x3c   : > { %2643 = vmatprep.subr.bf16.mxu0 %v4265_v46  ;;  %2930 = vmatprep.subr.bf16.mxu1 %v4267_v47  ;;  %v4351_v46 = vld [vmem:[%s6278_s1 + $0x304] ss:$16 sps:$4 sm:$0xff]   ;;  %v4354_v47 = vld [vmem:[%s6278_s1 + $0x30c] ss:$16 sps:$4 sm:$0xff]  }
  0x3f   : > { %2644 = vmatpush1.bf16.msra.mxu0 %v4269_v48  ;;  %2931 = vmatpush1.bf16.msra.mxu1 %v4270_v49  ;;  %v4349_v48 = vld [vmem:[%s6278_s1 + $0x300] ss:$16 sps:$4 sm:$0xff]   ;;  %v4352_v49 = vld [vmem:[%s6278_s1 + $0x308] ss:$16 sps:$4 sm:$0xff]  }
  0x40   : > { %2645 = vmatprep.subr.bf16.mxu0 %v4271_v51  ;;  %2932 = vmatprep.subr.bf16.mxu1 %v4273_v52  ;;  %v4357_v51 = vld [vmem:[%s6278_s1 + $0x324] ss:$16 sps:$4 sm:$0xff]   ;;  %v4360_v52 = vld [vmem:[%s6278_s1 + $0x32c] ss:$16 sps:$4 sm:$0xff]  }
  0x43   : > { %2646 = vmatpush1.bf16.msra.mxu0 %v4275_v54  ;;  %2933 = vmatpush1.bf16.msra.mxu1 %v4276_v56  ;;  %v4355_v54 = vld [vmem:[%s6278_s1 + $0x320] ss:$16 sps:$4 sm:$0xff]   ;;  %v4363_v56 = vld [vmem:[%s6278_s1 + $0x344] ss:$16 sps:$4 sm:$0xff]  }
  0x44   : > { %2647 = vmatprep.subr.bf16.mxu0 %v4277_v57  ;;  %2934 = vmatprep.subr.bf16.mxu1 %v4279_v58  ;;  %v4366_v57 = vld [vmem:[%s6278_s1 + $0x34c] ss:$16 sps:$4 sm:$0xff]   ;;  %v4361_v58 = vld [vmem:[%s6278_s1 + $0x340] ss:$16 sps:$4 sm:$0xff]  }
  0x47   : > { %2648 = vmatpush1.bf16.msra.mxu0 %v4281_v60  ;;  %2935 = vmatpush1.bf16.msra.mxu1 %v4282_v62  ;;  %v4369_v60 = vld [vmem:[%s6278_s1 + $0x364] ss:$16 sps:$4 sm:$0xff]   ;;  %v4367_v62 = vld [vmem:[%s6278_s1 + $0x360] ss:$16 sps:$4 sm:$0xff]  }
  0x48   : > { %2649 = vmatprep.subr.bf16.mxu0 %v4283_v63  ;;  %2936 = vmatprep.subr.bf16.mxu1 %v4285_v0  ;;  %v4370_v63 = vld [vmem:[%s6278_s1 + $0x368] ss:$16 sps:$4 sm:$0xff]   ;;  %v4375_v0 = vld [vmem:[%s6278_s1 + $0x384] ss:$16 sps:$4 sm:$0xff]  }
  0x4b   : > { %2650 = vmatpush1.bf16.msra.mxu0 %v4287_v1  ;;  %2937 = vmatpush1.bf16.msra.mxu1 %v4288_v2  ;;  %v4378_v1 = vld [vmem:[%s6278_s1 + $0x38c] ss:$16 sps:$4 sm:$0xff]   ;;  %v4373_v2 = vld [vmem:[%s6278_s1 + $0x380] ss:$16 sps:$4 sm:$0xff]  }
  0x4c   : > { %2651 = vmatprep.subr.bf16.mxu0 %v4289_v3  ;;  %2938 = vmatprep.subr.bf16.mxu1 %v4291_v4  ;;  %v4376_v3 = vld [vmem:[%s6278_s1 + $0x388] ss:$16 sps:$4 sm:$0xff]   ;;  %v4381_v4 = vld [vmem:[%s6278_s1 + $0x3a4] ss:$16 sps:$4 sm:$0xff]  }
  0x4f   : > { %2652 = vmatpush1.bf16.msra.mxu0 %v4293_v5  ;;  %2939 = vmatpush1.bf16.msra.mxu1 %v4294_v6  ;;  %v4384_v5 = vld [vmem:[%s6278_s1 + $0x3ac] ss:$16 sps:$4 sm:$0xff]   ;;  %v4379_v6 = vld [vmem:[%s6278_s1 + $0x3a0] ss:$16 sps:$4 sm:$0xff]  }
  0x50   : > { %2653 = vmatprep.subr.bf16.mxu0 %v4295_v7  ;;  %2940 = vmatprep.subr.bf16.mxu1 %v4297_v8  ;;  %v4382_v7 = vld [vmem:[%s6278_s1 + $0x3a8] ss:$16 sps:$4 sm:$0xff]   ;;  %v4387_v8 = vld [vmem:[%s6278_s1 + $0x3c4] ss:$16 sps:$4 sm:$0xff]  }
  0x53   : > { %2654 = vmatpush1.bf16.msra.mxu0 %v4299_v9  ;;  %2941 = vmatpush1.bf16.msra.mxu1 %v4300_v10  ;;  %v4390_v9 = vld [vmem:[%s6278_s1 + $0x3cc] ss:$16 sps:$4 sm:$0xff]   ;;  %v559_v10 = vcombine.high %v5053_v53, %v5053_v53 }
  0x54   : > { %2664 = vmatprep.subr.bf16.mxu0 %v4303_v11  ;;  %2951 = vmatprep.subr.bf16.mxu1 %v4306_v12  ;;  %v4385_v11 = vld [vmem:[%s6278_s1 + $0x3c0] ss:$16 sps:$4 sm:$0xff]   ;;  %v4388_v12 = vld [vmem:[%s6278_s1 + $0x3c8] ss:$16 sps:$4 sm:$0xff]   ;;  %v4396_v53 = vld [vmem:[%s6278_s1 + $0x3ec] ss:$16 sps:$4 sm:$0xff]  }
  0x56   : > { %2656 = vmatmul.mubr.bf16.vlgmr.msra.gmra.mrb[0].mxu0 %v5122_v14  ;;  %2943 = vmatmul.mubr.bf16.vlgmr.msra.gmra.mrb[0].mxu1 %v5122_v14 }
  0x57   : > { %2665 = vmatpush1.bf16.msra.mxu0 %v4301_v13  ;;  %2952 = vmatpush1.bf16.msra.mxu1 %v4304_v15  ;;  %v4393_v13 = vld [vmem:[%s6278_s1 + $0x3e4] ss:$16 sps:$4 sm:$0xff]   ;;  %v5306_v15 = vrot.slane %v559_v10, %v5044_v50  ;;  %v4472_v10 = vld [vmem:[%s6278_s1 + $0x588] ss:$16 sps:$4 sm:$0xff]  }
  0x58   : > { %2666 = vmatprep.subr.bf16.mxu0 %v4309_v16  ;;  %2953 = vmatprep.subr.bf16.mxu1 %v4312_v17  ;;  %v4391_v16 = vld [vmem:[%s6278_s1 + $0x3e0] ss:$16 sps:$4 sm:$0xff]   ;;  %v4394_v17 = vld [vmem:[%s6278_s1 + $0x3e8] ss:$16 sps:$4 sm:$0xff]  }
  0x59   : > { %2696 = vmatprep.mubr.bf16.mxu0 %v606_v18  ;;  %2983 = vmatprep.mubr.bf16.mxu1 %v606_v18  ;;  %v4399_v18 = vld [vmem:[%s6278_s1 + $0x404] ss:$16 sps:$4 sm:$0xff]  }
  0x5b   : > { %2667 = vmatpush1.bf16.msra.mxu0 %v4307_v19  ;;  %2954 = vmatpush1.bf16.msra.mxu1 %v4310_v20  ;;  %v4402_v19 = vld [vmem:[%s6278_s1 + $0x40c] ss:$16 sps:$4 sm:$0xff]   ;;  %v575_v20 = vcombine.high %v5306_v15, %v5306_v15 }
  0x5c   : > { %2668 = vmatprep.subr.bf16.mxu0 %v4315_v21  ;;  %2955 = vmatprep.subr.bf16.mxu1 %v4318_v22  ;;  %v4397_v21 = vld [vmem:[%s6278_s1 + $0x400] ss:$16 sps:$4 sm:$0xff]   ;;  %v604_v22 = vcombine.high %v5122_v14, %v5122_v14 }
  0x5d   : > { %v4403_v14 = vld [vmem:[%s6278_s1 + $0x420] ss:$16 sps:$4 sm:$0xff]  }
  0x5f   : > { %2669 = vmatpush1.bf16.msra.mxu0 %v4313_v23  ;;  %2956 = vmatpush1.bf16.msra.mxu1 %v4316_v24  ;;  %v4400_v23 = vld [vmem:[%s6278_s1 + $0x408] ss:$16 sps:$4 sm:$0xff]   ;;  %v4405_v24 = vld [vmem:[%s6278_s1 + $0x424] ss:$16 sps:$4 sm:$0xff]  }
  0x60   : > { %2670 = vmatprep.subr.bf16.mxu0 %v4321_v25  ;;  %2957 = vmatprep.subr.bf16.mxu1 %v4324_v26  ;;  %v4408_v25 = vld [vmem:[%s6278_s1 + $0x42c] ss:$16 sps:$4 sm:$0xff]   ;;  %v5337_v26 = vrot.slane %v575_v20, %v5044_v50  ;;  %v4489_v20 = vld [vmem:[%s6278_s1 + $0x5e4] ss:$16 sps:$4 sm:$0xff]  }
  0x63   : > { %2671 = vmatpush1.bf16.msra.mxu0 %v4319_v27  ;;  %2958 = vmatpush1.bf16.msra.mxu1 %v4322_v28  ;;  %v4406_v27 = vld [vmem:[%s6278_s1 + $0x428] ss:$16 sps:$4 sm:$0xff]   ;;  %v4411_v28 = vld [vmem:[%s6278_s1 + $0x444] ss:$16 sps:$4 sm:$0xff]  }
  0x64   : > { %2672 = vmatprep.subr.bf16.mxu0 %v4327_v29  ;;  %2959 = vmatprep.subr.bf16.mxu1 %v4330_v30  ;;  %v4414_v29 = vld [vmem:[%s6278_s1 + $0x44c] ss:$16 sps:$4 sm:$0xff]   ;;  %v4409_v30 = vld [vmem:[%s6278_s1 + $0x440] ss:$16 sps:$4 sm:$0xff]  }
  0x67   : > { %2673 = vmatpush1.bf16.msra.mxu0 %v4325_v31  ;;  %2960 = vmatpush1.bf16.msra.mxu1 %v4328_v32  ;;  %v4412_v31 = vld [vmem:[%s6278_s1 + $0x448] ss:$16 sps:$4 sm:$0xff]   ;;  %v4417_v32 = vld [vmem:[%s6278_s1 + $0x464] ss:$16 sps:$4 sm:$0xff]  }
  0x68   : > { %2674 = vmatprep.subr.bf16.mxu0 %v4333_v33  ;;  %2961 = vmatprep.subr.bf16.mxu1 %v4336_v34  ;;  %v4420_v33 = vld [vmem:[%s6278_s1 + $0x46c] ss:$16 sps:$4 sm:$0xff]   ;;  %v4415_v34 = vld [vmem:[%s6278_s1 + $0x460] ss:$16 sps:$4 sm:$0xff]  }
  0x6b   : > { %2675 = vmatpush1.bf16.msra.mxu0 %v4331_v35  ;;  %2962 = vmatpush1.bf16.msra.mxu1 %v4334_v36  ;;  %v4418_v35 = vld [vmem:[%s6278_s1 + $0x468] ss:$16 sps:$4 sm:$0xff]   ;;  %v4423_v36 = vld [vmem:[%s6278_s1 + $0x484] ss:$16 sps:$4 sm:$0xff]  }
  0x6c   : > { %2676 = vmatprep.subr.bf16.mxu0 %v4339_v37  ;;  %2963 = vmatprep.subr.bf16.mxu1 %v4342_v38  ;;  %v4426_v37 = vld [vmem:[%s6278_s1 + $0x48c] ss:$16 sps:$4 sm:$0xff]   ;;  %v4421_v38 = vld [vmem:[%s6278_s1 + $0x480] ss:$16 sps:$4 sm:$0xff]  }
  0x6f   : > { %2677 = vmatpush1.bf16.msra.mxu0 %v4337_v39  ;;  %2964 = vmatpush1.bf16.msra.mxu1 %v4340_v40  ;;  %v4424_v39 = vld [vmem:[%s6278_s1 + $0x488] ss:$16 sps:$4 sm:$0xff]   ;;  %v4429_v40 = vld [vmem:[%s6278_s1 + $0x4a4] ss:$16 sps:$4 sm:$0xff]  }
  0x70   : > { %2678 = vmatprep.subr.bf16.mxu0 %v4345_v41  ;;  %2965 = vmatprep.subr.bf16.mxu1 %v4348_v42  ;;  %v4432_v41 = vld [vmem:[%s6278_s1 + $0x4ac] ss:$16 sps:$4 sm:$0xff]   ;;  %v4427_v42 = vld [vmem:[%s6278_s1 + $0x4a0] ss:$16 sps:$4 sm:$0xff]  }
  0x73   : > { %2679 = vmatpush1.bf16.msra.mxu0 %v4343_v43  ;;  %2966 = vmatpush1.bf16.msra.mxu1 %v4346_v45  ;;  %v4430_v43 = vld [vmem:[%s6278_s1 + $0x4a8] ss:$16 sps:$4 sm:$0xff]   ;;  %v4435_v45 = vld [vmem:[%s6278_s1 + $0x4c4] ss:$16 sps:$4 sm:$0xff]  }
  0x74   : > { %2680 = vmatprep.subr.bf16.mxu0 %v4351_v46  ;;  %2967 = vmatprep.subr.bf16.mxu1 %v4354_v47  ;;  %v4438_v46 = vld [vmem:[%s6278_s1 + $0x4cc] ss:$16 sps:$4 sm:$0xff]   ;;  %v4433_v47 = vld [vmem:[%s6278_s1 + $0x4c0] ss:$16 sps:$4 sm:$0xff]  }
  0x77   : > { %2681 = vmatpush1.bf16.msra.mxu0 %v4349_v48  ;;  %2968 = vmatpush1.bf16.msra.mxu1 %v4352_v49  ;;  %v4436_v48 = vld [vmem:[%s6278_s1 + $0x4c8] ss:$16 sps:$4 sm:$0xff]   ;;  %v4441_v49 = vld [vmem:[%s6278_s1 + $0x4e4] ss:$16 sps:$4 sm:$0xff]  }
  0x78   : > { %2682 = vmatprep.subr.bf16.mxu0 %v4357_v51  ;;  %2969 = vmatprep.subr.bf16.mxu1 %v4360_v52  ;;  %v4444_v51 = vld [vmem:[%s6278_s1 + $0x4ec] ss:$16 sps:$4 sm:$0xff]   ;;  %v4439_v52 = vld [vmem:[%s6278_s1 + $0x4e0] ss:$16 sps:$4 sm:$0xff]  }
  0x7b   : > { %2683 = vmatpush1.bf16.msra.mxu0 %v4355_v54  ;;  %2970 = vmatpush1.bf16.msra.mxu1 %v4358_v55  ;;  %v4442_v54 = vld [vmem:[%s6278_s1 + $0x4e8] ss:$16 sps:$4 sm:$0xff]   ;;  %v4447_v55 = vld [vmem:[%s6278_s1 + $0x504] ss:$16 sps:$4 sm:$0xff]  }
  0x7c   : > { %2684 = vmatprep.subr.bf16.mxu0 %v4363_v56  ;;  %2971 = vmatprep.subr.bf16.mxu1 %v4366_v57  ;;  %v4450_v56 = vld [vmem:[%s6278_s1 + $0x50c] ss:$16 sps:$4 sm:$0xff]   ;;  %v4445_v57 = vld [vmem:[%s6278_s1 + $0x500] ss:$16 sps:$4 sm:$0xff]  }
  0x7f   : > { %2685 = vmatpush1.bf16.msra.mxu0 %v4361_v58  ;;  %2972 = vmatpush1.bf16.msra.mxu1 %v4364_v59  ;;  %v4448_v58 = vld [vmem:[%s6278_s1 + $0x508] ss:$16 sps:$4 sm:$0xff]   ;;  %v4453_v59 = vld [vmem:[%s6278_s1 + $0x524] ss:$16 sps:$4 sm:$0xff]  }
  0x80   : > { %2686 = vmatprep.subr.bf16.mxu0 %v4369_v60  ;;  %2973 = vmatprep.subr.bf16.mxu1 %v4372_v61  ;;  %v4456_v60 = vld [vmem:[%s6278_s1 + $0x52c] ss:$16 sps:$4 sm:$0xff]   ;;  %v4451_v61 = vld [vmem:[%s6278_s1 + $0x520] ss:$16 sps:$4 sm:$0xff]  }
  0x83   : > { %2687 = vmatpush1.bf16.msra.mxu0 %v4367_v62  ;;  %2974 = vmatpush1.bf16.msra.mxu1 %v4370_v63  ;;  %v4454_v62 = vld [vmem:[%s6278_s1 + $0x528] ss:$16 sps:$4 sm:$0xff]   ;;  %v4459_v63 = vld [vmem:[%s6278_s1 + $0x544] ss:$16 sps:$4 sm:$0xff]  }
  0x84   : > { %2688 = vmatprep.subr.bf16.mxu0 %v4375_v0  ;;  %2975 = vmatprep.subr.bf16.mxu1 %v4378_v1  ;;  %v4462_v0 = vld [vmem:[%s6278_s1 + $0x54c] ss:$16 sps:$4 sm:$0xff]   ;;  %v4457_v1 = vld [vmem:[%s6278_s1 + $0x540] ss:$16 sps:$4 sm:$0xff]  }
  0x87   : > { %2689 = vmatpush1.bf16.msra.mxu0 %v4373_v2  ;;  %2976 = vmatpush1.bf16.msra.mxu1 %v4376_v3  ;;  %v4460_v2 = vld [vmem:[%s6278_s1 + $0x548] ss:$16 sps:$4 sm:$0xff]   ;;  %v4465_v3 = vld [vmem:[%s6278_s1 + $0x564] ss:$16 sps:$4 sm:$0xff]  }
  0x88   : > { %2690 = vmatprep.subr.bf16.mxu0 %v4381_v4  ;;  %2977 = vmatprep.subr.bf16.mxu1 %v4384_v5  ;;  %v4468_v4 = vld [vmem:[%s6278_s1 + $0x56c] ss:$16 sps:$4 sm:$0xff]   ;;  %v4463_v5 = vld [vmem:[%s6278_s1 + $0x560] ss:$16 sps:$4 sm:$0xff]  }
  0x8b   : > { %2691 = vmatpush1.bf16.msra.mxu0 %v4379_v6  ;;  %2978 = vmatpush1.bf16.msra.mxu1 %v4382_v7  ;;  %v4466_v6 = vld [vmem:[%s6278_s1 + $0x568] ss:$16 sps:$4 sm:$0xff]   ;;  %v4471_v7 = vld [vmem:[%s6278_s1 + $0x584] ss:$16 sps:$4 sm:$0xff]  }
  0x8c   : > { %2692 = vmatprep.subr.bf16.mxu0 %v4387_v8  ;;  %2979 = vmatprep.subr.bf16.mxu1 %v4390_v9  ;;  %v4474_v8 = vld [vmem:[%s6278_s1 + $0x58c] ss:$16 sps:$4 sm:$0xff]   ;;  %v4469_v9 = vld [vmem:[%s6278_s1 + $0x580] ss:$16 sps:$4 sm:$0xff]  }
  0x8f   : > { %2693 = vmatpush1.bf16.msra.mxu0 %v4385_v11  ;;  %2980 = vmatpush1.bf16.msra.mxu1 %v4388_v12  ;;  %v4477_v11 = vld [vmem:[%s6278_s1 + $0x5a4] ss:$16 sps:$4 sm:$0xff]   ;;  %v4480_v12 = vld [vmem:[%s6278_s1 + $0x5ac] ss:$16 sps:$4 sm:$0xff]  }
  0x90   : > { %2694 = vmatprep.subr.bf16.mxu0 %v4393_v13  ;;  %2981 = vmatprep.subr.bf16.mxu1 %v4396_v53  ;;  %v4475_v13 = vld [vmem:[%s6278_s1 + $0x5a0] ss:$16 sps:$4 sm:$0xff]   ;;  %v4478_v53 = vld [vmem:[%s6278_s1 + $0x5a8] ss:$16 sps:$4 sm:$0xff]  }
  0x93   : > { %2695 = vmatpush1.bf16.msra.mxu0 %v4391_v16  ;;  %2982 = vmatpush1.bf16.msra.mxu1 %v4394_v17  ;;  %v4483_v16 = vld [vmem:[%s6278_s1 + $0x5c4] ss:$16 sps:$4 sm:$0xff]   ;;  %v4486_v17 = vld [vmem:[%s6278_s1 + $0x5cc] ss:$16 sps:$4 sm:$0xff]  }
  0x94   : > { %2705 = vmatprep.subr.bf16.mxu0 %v4399_v18  ;;  %2992 = vmatprep.subr.bf16.mxu1 %v4402_v19  ;;  %v4481_v18 = vld [vmem:[%s6278_s1 + $0x5c0] ss:$16 sps:$4 sm:$0xff]   ;;  %v4484_v19 = vld [vmem:[%s6278_s1 + $0x5c8] ss:$16 sps:$4 sm:$0xff]  }
  0x96   : > { %2697 = vmatmul.mubr.bf16.vlgmr.msra.gmra.mrb[0].mxu0 %v604_v22  ;;  %2984 = vmatmul.mubr.bf16.vlgmr.msra.gmra.mrb[0].mxu1 %v604_v22  ;;  %v4487_v22 = vld [vmem:[%s6278_s1 + $0x5e0] ss:$16 sps:$4 sm:$0xff]  }
  0x97   : > { %2706 = vmatpush1.bf16.msra.mxu0 %v4397_v21  ;;  %2993 = vmatpush1.bf16.msra.mxu1 %v4400_v23  ;;  %v4492_v21 = vld [vmem:[%s6278_s1 + $0x5ec] ss:$16 sps:$4 sm:$0xff]   ;;  %v4490_v23 = vld [vmem:[%s6278_s1 + $0x5e8] ss:$16 sps:$4 sm:$0xff]  }
  0x98   : > { %2707 = vmatprep.subr.bf16.mxu0 %v4405_v24  ;;  %2994 = vmatprep.subr.bf16.mxu1 %v4408_v25  ;;  %v4496_v24 = vld [vmem:[%s6278_s1 + $0x604] ss:$16 sps:$4 sm:$0xff]   ;;  %v4499_v25 = vld [vmem:[%s6278_s1 + $0x60c] ss:$16 sps:$4 sm:$0xff]  }
  0x99   : > { %2737 = vmatprep.mubr.bf16.mxu0 %v5337_v26  ;;  %3024 = vmatprep.mubr.bf16.mxu1 %v5337_v26 }
  0x9b   : > { %2708 = vmatpush1.bf16.msra.mxu0 %v4403_v14  ;;  %2995 = vmatpush1.bf16.msra.mxu1 %v4406_v27  ;;  %v4494_v14 = vld [vmem:[%s6278_s1 + $0x600] ss:$16 sps:$4 sm:$0xff]   ;;  %v5526_v27 = vrot.slane %v5306_v15, %v5044_v50  ;;  %v607_v15 = vcombine.high %v5337_v26, %v5337_v26  ;;  %v4508_v26 = vld [vmem:[%s6278_s1 + $0x644] ss:$16 sps:$4 sm:$0xff]  }
  0x9c   : > { %2709 = vmatprep.subr.bf16.mxu0 %v4411_v28  ;;  %2996 = vmatprep.subr.bf16.mxu1 %v4414_v29  ;;  %v4497_v28 = vld [vmem:[%s6278_s1 + $0x608] ss:$16 sps:$4 sm:$0xff]   ;;  %v4502_v29 = vld [vmem:[%s6278_s1 + $0x624] ss:$16 sps:$4 sm:$0xff]  }
  0x9f   : > { %2710 = vmatpush1.bf16.msra.mxu0 %v4409_v30  ;;  %2997 = vmatpush1.bf16.msra.mxu1 %v4412_v31  ;;  %v4505_v30 = vld [vmem:[%s6278_s1 + $0x62c] ss:$16 sps:$4 sm:$0xff]   ;;  %v4500_v31 = vld [vmem:[%s6278_s1 + $0x620] ss:$16 sps:$4 sm:$0xff]  }
  0xa0   : > { %2711 = vmatprep.subr.bf16.mxu0 %v4417_v32  ;;  %2998 = vmatprep.subr.bf16.mxu1 %v4420_v33  ;;  %v4503_v32 = vld [vmem:[%s6278_s1 + $0x628] ss:$16 sps:$4 sm:$0xff]   ;;  %v4511_v33 = vld [vmem:[%s6278_s1 + $0x64c] ss:$16 sps:$4 sm:$0xff]  }
  0xa3   : > { %2712 = vmatpush1.bf16.msra.mxu0 %v4415_v34  ;;  %2999 = vmatpush1.bf16.msra.mxu1 %v4418_v35  ;;  %v4506_v34 = vld [vmem:[%s6278_s1 + $0x640] ss:$16 sps:$4 sm:$0xff]   ;;  %v4509_v35 = vld [vmem:[%s6278_s1 + $0x648] ss:$16 sps:$4 sm:$0xff]  }
  0xa4   : > { %2713 = vmatprep.subr.bf16.mxu0 %v4423_v36  ;;  %3000 = vmatprep.subr.bf16.mxu1 %v4426_v37  ;;  %v4514_v36 = vld [vmem:[%s6278_s1 + $0x664] ss:$16 sps:$4 sm:$0xff]   ;;  %v4517_v37 = vld [vmem:[%s6278_s1 + $0x66c] ss:$16 sps:$4 sm:$0xff]  }
  0xa7   : > { %2714 = vmatpush1.bf16.msra.mxu0 %v4421_v38  ;;  %3001 = vmatpush1.bf16.msra.mxu1 %v4424_v39  ;;  %v4512_v38 = vld [vmem:[%s6278_s1 + $0x660] ss:$16 sps:$4 sm:$0xff]   ;;  %v4515_v39 = vld [vmem:[%s6278_s1 + $0x668] ss:$16 sps:$4 sm:$0xff]  }
  0xa8   : > { %2715 = vmatprep.subr.bf16.mxu0 %v4429_v40  ;;  %3002 = vmatprep.subr.bf16.mxu1 %v4432_v41  ;;  %v4520_v40 = vld [vmem:[%s6278_s1 + $0x684] ss:$16 sps:$4 sm:$0xff]   ;;  %v4523_v41 = vld [vmem:[%s6278_s1 + $0x68c] ss:$16 sps:$4 sm:$0xff]  }
  0xab   : > { %2716 = vmatpush1.bf16.msra.mxu0 %v4427_v42  ;;  %3003 = vmatpush1.bf16.msra.mxu1 %v4430_v43  ;;  %v4518_v42 = vld [vmem:[%s6278_s1 + $0x680] ss:$16 sps:$4 sm:$0xff]   ;;  %v4521_v43 = vld [vmem:[%s6278_s1 + $0x688] ss:$16 sps:$4 sm:$0xff]  }
  0xac   : > { %2717 = vmatprep.subr.bf16.mxu0 %v4435_v45  ;;  %3004 = vmatprep.subr.bf16.mxu1 %v4438_v46  ;;  %v4526_v45 = vld [vmem:[%s6278_s1 + $0x6a4] ss:$16 sps:$4 sm:$0xff]   ;;  %v4529_v46 = vld [vmem:[%s6278_s1 + $0x6ac] ss:$16 sps:$4 sm:$0xff]  }
  0xaf   : > { %2718 = vmatpush1.bf16.msra.mxu0 %v4433_v47  ;;  %3005 = vmatpush1.bf16.msra.mxu1 %v4436_v48  ;;  %v4524_v47 = vld [vmem:[%s6278_s1 + $0x6a0] ss:$16 sps:$4 sm:$0xff]   ;;  %v4527_v48 = vld [vmem:[%s6278_s1 + $0x6a8] ss:$16 sps:$4 sm:$0xff]  }
  0xb0   : > { %2719 = vmatprep.subr.bf16.mxu0 %v4441_v49  ;;  %3006 = vmatprep.subr.bf16.mxu1 %v4444_v51  ;;  %v4532_v49 = vld [vmem:[%s6278_s1 + $0x6c4] ss:$16 sps:$4 sm:$0xff]   ;;  %v4535_v51 = vld [vmem:[%s6278_s1 + $0x6cc] ss:$16 sps:$4 sm:$0xff]  }
  0xb3   : > { %2720 = vmatpush1.bf16.msra.mxu0 %v4439_v52  ;;  %3007 = vmatpush1.bf16.msra.mxu1 %v4442_v54  ;;  %v4530_v52 = vld [vmem:[%s6278_s1 + $0x6c0] ss:$16 sps:$4 sm:$0xff]   ;;  %v4533_v54 = vld [vmem:[%s6278_s1 + $0x6c8] ss:$16 sps:$4 sm:$0xff]  }
  0xb4   : > { %2721 = vmatprep.subr.bf16.mxu0 %v4447_v55  ;;  %3008 = vmatprep.subr.bf16.mxu1 %v4450_v56  ;;  %v4538_v55 = vld [vmem:[%s6278_s1 + $0x6e4] ss:$16 sps:$4 sm:$0xff]   ;;  %v4541_v56 = vld [vmem:[%s6278_s1 + $0x6ec] ss:$16 sps:$4 sm:$0xff]  }
  0xb7   : > { %2722 = vmatpush1.bf16.msra.mxu0 %v4445_v57  ;;  %3009 = vmatpush1.bf16.msra.mxu1 %v4448_v58  ;;  %v4536_v57 = vld [vmem:[%s6278_s1 + $0x6e0] ss:$16 sps:$4 sm:$0xff]   ;;  %v4539_v58 = vld [vmem:[%s6278_s1 + $0x6e8] ss:$16 sps:$4 sm:$0xff]  }
  0xb8   : > { %2723 = vmatprep.subr.bf16.mxu0 %v4453_v59  ;;  %3010 = vmatprep.subr.bf16.mxu1 %v4456_v60  ;;  %v4544_v59 = vld [vmem:[%s6278_s1 + $0x704] ss:$16 sps:$4 sm:$0xff]   ;;  %v4547_v60 = vld [vmem:[%s6278_s1 + $0x70c] ss:$16 sps:$4 sm:$0xff]  }
  0xbb   : > { %2724 = vmatpush1.bf16.msra.mxu0 %v4451_v61  ;;  %3011 = vmatpush1.bf16.msra.mxu1 %v4454_v62  ;;  %v4542_v61 = vld [vmem:[%s6278_s1 + $0x700] ss:$16 sps:$4 sm:$0xff]   ;;  %v4545_v62 = vld [vmem:[%s6278_s1 + $0x708] ss:$16 sps:$4 sm:$0xff]  }
  0xbc   : > { %2725 = vmatprep.subr.bf16.mxu0 %v4459_v63  ;;  %3012 = vmatprep.subr.bf16.mxu1 %v4462_v0  ;;  %v4550_v63 = vld [vmem:[%s6278_s1 + $0x724] ss:$16 sps:$4 sm:$0xff]   ;;  %v4553_v0 = vld [vmem:[%s6278_s1 + $0x72c] ss:$16 sps:$4 sm:$0xff]  }
  0xbf   : > { %2726 = vmatpush1.bf16.msra.mxu0 %v4457_v1  ;;  %3013 = vmatpush1.bf16.msra.mxu1 %v4460_v2  ;;  %v4548_v1 = vld [vmem:[%s6278_s1 + $0x720] ss:$16 sps:$4 sm:$0xff]   ;;  %v4551_v2 = vld [vmem:[%s6278_s1 + $0x728] ss:$16 sps:$4 sm:$0xff]  }
  0xc0   : > { %2727 = vmatprep.subr.bf16.mxu0 %v4465_v3  ;;  %3014 = vmatprep.subr.bf16.mxu1 %v4468_v4  ;;  %v4556_v3 = vld [vmem:[%s6278_s1 + $0x744] ss:$16 sps:$4 sm:$0xff]   ;;  %v4559_v4 = vld [vmem:[%s6278_s1 + $0x74c] ss:$16 sps:$4 sm:$0xff]  }
  0xc3   : > { %2728 = vmatpush1.bf16.msra.mxu0 %v4463_v5  ;;  %3015 = vmatpush1.bf16.msra.mxu1 %v4466_v6  ;;  %v4554_v5 = vld [vmem:[%s6278_s1 + $0x740] ss:$16 sps:$4 sm:$0xff]   ;;  %v4557_v6 = vld [vmem:[%s6278_s1 + $0x748] ss:$16 sps:$4 sm:$0xff]  }
  0xc4   : > { %2729 = vmatprep.subr.bf16.mxu0 %v4471_v7  ;;  %3016 = vmatprep.subr.bf16.mxu1 %v4474_v8  ;;  %v4562_v7 = vld [vmem:[%s6278_s1 + $0x764] ss:$16 sps:$4 sm:$0xff]   ;;  %v4565_v8 = vld [vmem:[%s6278_s1 + $0x76c] ss:$16 sps:$4 sm:$0xff]  }
  0xc7   : > { %2730 = vmatpush1.bf16.msra.mxu0 %v4469_v9  ;;  %3017 = vmatpush1.bf16.msra.mxu1 %v4472_v10  ;;  %v4560_v9 = vld [vmem:[%s6278_s1 + $0x760] ss:$16 sps:$4 sm:$0xff]   ;;  %v4563_v10 = vld [vmem:[%s6278_s1 + $0x768] ss:$16 sps:$4 sm:$0xff]  }
  0xc8   : > { %2731 = vmatprep.subr.bf16.mxu0 %v4477_v11  ;;  %3018 = vmatprep.subr.bf16.mxu1 %v4480_v12  ;;  %v4568_v11 = vld [vmem:[%s6278_s1 + $0x784] ss:$16 sps:$4 sm:$0xff]   ;;  %v4571_v12 = vld [vmem:[%s6278_s1 + $0x78c] ss:$16 sps:$4 sm:$0xff]  }
  0xcb   : > { %2732 = vmatpush1.bf16.msra.mxu0 %v4475_v13  ;;  %3019 = vmatpush1.bf16.msra.mxu1 %v4478_v53  ;;  %v4566_v13 = vld [vmem:[%s6278_s1 + $0x780] ss:$16 sps:$4 sm:$0xff]   ;;  %v4569_v53 = vld [vmem:[%s6278_s1 + $0x788] ss:$16 sps:$4 sm:$0xff]  }
  0xcc   : > { %2733 = vmatprep.subr.bf16.mxu0 %v4483_v16  ;;  %3020 = vmatprep.subr.bf16.mxu1 %v4486_v17  ;;  %v4574_v16 = vld [vmem:[%s6278_s1 + $0x7a4] ss:$16 sps:$4 sm:$0xff]   ;;  %v4577_v17 = vld [vmem:[%s6278_s1 + $0x7ac] ss:$16 sps:$4 sm:$0xff]  }
  0xcf   : > { %2734 = vmatpush1.bf16.msra.mxu0 %v4481_v18  ;;  %3021 = vmatpush1.bf16.msra.mxu1 %v4484_v19  ;;  %v4572_v18 = vld [vmem:[%s6278_s1 + $0x7a0] ss:$16 sps:$4 sm:$0xff]   ;;  %v4575_v19 = vld [vmem:[%s6278_s1 + $0x7a8] ss:$16 sps:$4 sm:$0xff]  }
  0xd0   : > { %2735 = vmatprep.subr.bf16.mxu0 %v4489_v20  ;;  %3022 = vmatprep.subr.bf16.mxu1 %v4492_v21  ;;  %v4580_v20 = vld [vmem:[%s6278_s1 + $0x7c4] ss:$16 sps:$4 sm:$0xff]   ;;  %v4583_v21 = vld [vmem:[%s6278_s1 + $0x7cc] ss:$16 sps:$4 sm:$0xff]  }
  0xd3   : > { %2736 = vmatpush1.bf16.msra.mxu0 %v4487_v22  ;;  %3023 = vmatpush1.bf16.msra.mxu1 %v4490_v23  ;;  %v5698_v22 = vld [vmem:[%s4906_s18 + $0x8] sm:$0x1f]  ;;  %v4578_v23 = vld [vmem:[%s6278_s1 + $0x7c0] ss:$16 sps:$4 sm:$0xff]  }
  0xd4   : > { %2746 = vmatprep.subr.bf16.mxu0 %v4496_v24  ;;  %3033 = vmatprep.subr.bf16.mxu1 %v4499_v25  ;;  %v4581_v24 = vld [vmem:[%s6278_s1 + $0x7c8] ss:$16 sps:$4 sm:$0xff]   ;;  %v4586_v25 = vld [vmem:[%s6278_s1 + $0x7e4] ss:$16 sps:$4 sm:$0xff]  }
  0xd6   : > { %2738 = vmatmul.mubr.bf16.vlgmr.msra.gmra.mrb[0].mxu0 %v5526_v27  ;;  %3025 = vmatmul.mubr.bf16.vlgmr.msra.gmra.mrb[0].mxu1 %v5526_v27 }
  0xd7   : > { %2747 = vmatpush1.bf16.msra.mxu0 %v4494_v14  ;;  %3034 = vmatpush1.bf16.msra.mxu1 %v4497_v28  ;;  %v4589_v14 = vld [vmem:[%s6278_s1 + $0x7ec] ss:$16 sps:$4 sm:$0xff]   ;;  %v5714_v28 = vrot.slane %v5698_v22, %v5044_v50 }
  0xd8   : > { %2748 = vmatprep.subr.bf16.mxu0 %v4502_v29  ;;  %3035 = vmatprep.subr.bf16.mxu1 %v4505_v30  ;;  %v4584_v29 = vld [vmem:[%s6278_s1 + $0x7e0] ss:$16 sps:$4 sm:$0xff]   ;;  %v4587_v30 = vld [vmem:[%s6278_s1 + $0x7e8] ss:$16 sps:$4 sm:$0xff]  }
  0xd9   : > { %2778 = vmatprep.mubr.bf16.mxu0 %v607_v15  ;;  %3065 = vmatprep.mubr.bf16.mxu1 %v607_v15  ;;  %v4592_v15 = vld [vmem:[%s6278_s1 + $0x804] ss:$16 sps:$4 sm:$0xff]  }
  0xdb   : > { %2749 = vmatpush1.bf16.msra.mxu0 %v4500_v31  ;;  %3036 = vmatpush1.bf16.msra.mxu1 %v4503_v32  ;;  %v4595_v31 = vld [vmem:[%s6278_s1 + $0x80c] ss:$16 sps:$4 sm:$0xff]   ;;  %v4590_v32 = vld [vmem:[%s6278_s1 + $0x800] ss:$16 sps:$4 sm:$0xff]  }
  0xdc   : > { %2750 = vmatprep.subr.bf16.mxu0 %v4508_v26  ;;  %3037 = vmatprep.subr.bf16.mxu1 %v4511_v33  ;;  %v623_v26 = vcombine.high %v5714_v28, %v5714_v28  ;;  %v4593_v33 = vld [vmem:[%s6278_s1 + $0x808] ss:$16 sps:$4 sm:$0xff]  }
  0xdf   : > { %2751 = vmatpush1.bf16.msra.mxu0 %v4506_v34  ;;  %3038 = vmatpush1.bf16.msra.mxu1 %v4509_v35  ;;  %v605_v34 = vcombine.high %v5526_v27, %v5526_v27  ;;  %v4598_v35 = vld [vmem:[%s6278_s1 + $0x824] ss:$16 sps:$4 sm:$0xff]   ;;  %v4596_v27 = vld [vmem:[%s6278_s1 + $0x820] ss:$16 sps:$4 sm:$0xff]  }
  0xe0   : > { %2752 = vmatprep.subr.bf16.mxu0 %v4514_v36  ;;  %3039 = vmatprep.subr.bf16.mxu1 %v4517_v37  ;;  %v4601_v36 = vld [vmem:[%s6278_s1 + $0x82c] ss:$16 sps:$4 sm:$0xff]   ;;  %v5745_v37 = vrot.slane %v623_v26, %v5044_v50  ;;  %v4682_v26 = vld [vmem:[%s6278_s1 + $0x9e4] ss:$16 sps:$4 sm:$0xff]  }
  0xe3   : > { %2753 = vmatpush1.bf16.msra.mxu0 %v4512_v38  ;;  %3040 = vmatpush1.bf16.msra.mxu1 %v4515_v39  ;;  %v4599_v38 = vld [vmem:[%s6278_s1 + $0x828] ss:$16 sps:$4 sm:$0xff]   ;;  %v4604_v39 = vld [vmem:[%s6278_s1 + $0x844] ss:$16 sps:$4 sm:$0xff]  }
  0xe4   : > { %2754 = vmatprep.subr.bf16.mxu0 %v4520_v40  ;;  %3041 = vmatprep.subr.bf16.mxu1 %v4523_v41  ;;  %v4607_v40 = vld [vmem:[%s6278_s1 + $0x84c] ss:$16 sps:$4 sm:$0xff]   ;;  %v4602_v41 = vld [vmem:[%s6278_s1 + $0x840] ss:$16 sps:$4 sm:$0xff]  }
  0xe7   : > { %2755 = vmatpush1.bf16.msra.mxu0 %v4518_v42  ;;  %3042 = vmatpush1.bf16.msra.mxu1 %v4521_v43  ;;  %v4605_v42 = vld [vmem:[%s6278_s1 + $0x848] ss:$16 sps:$4 sm:$0xff]   ;;  %v4610_v43 = vld [vmem:[%s6278_s1 + $0x864] ss:$16 sps:$4 sm:$0xff]  }
  0xe8   : > { %2756 = vmatprep.subr.bf16.mxu0 %v4526_v45  ;;  %3043 = vmatprep.subr.bf16.mxu1 %v4529_v46  ;;  %v4613_v45 = vld [vmem:[%s6278_s1 + $0x86c] ss:$16 sps:$4 sm:$0xff]   ;;  %v4608_v46 = vld [vmem:[%s6278_s1 + $0x860] ss:$16 sps:$4 sm:$0xff]  }
  0xeb   : > { %2757 = vmatpush1.bf16.msra.mxu0 %v4524_v47  ;;  %3044 = vmatpush1.bf16.msra.mxu1 %v4527_v48  ;;  %v4611_v47 = vld [vmem:[%s6278_s1 + $0x868] ss:$16 sps:$4 sm:$0xff]   ;;  %v4616_v48 = vld [vmem:[%s6278_s1 + $0x884] ss:$16 sps:$4 sm:$0xff]  }
  0xec   : > { %2758 = vmatprep.subr.bf16.mxu0 %v4532_v49  ;;  %3045 = vmatprep.subr.bf16.mxu1 %v4535_v51  ;;  %v4619_v49 = vld [vmem:[%s6278_s1 + $0x88c] ss:$16 sps:$4 sm:$0xff]   ;;  %v4614_v51 = vld [vmem:[%s6278_s1 + $0x880] ss:$16 sps:$4 sm:$0xff]  }
  0xef   : > { %2759 = vmatpush1.bf16.msra.mxu0 %v4530_v52  ;;  %3046 = vmatpush1.bf16.msra.mxu1 %v4533_v54  ;;  %v4617_v52 = vld [vmem:[%s6278_s1 + $0x888] ss:$16 sps:$4 sm:$0xff]   ;;  %v4622_v54 = vld [vmem:[%s6278_s1 + $0x8a4] ss:$16 sps:$4 sm:$0xff]  }
  0xf0   : > { %2760 = vmatprep.subr.bf16.mxu0 %v4538_v55  ;;  %3047 = vmatprep.subr.bf16.mxu1 %v4541_v56  ;;  %v4625_v55 = vld [vmem:[%s6278_s1 + $0x8ac] ss:$16 sps:$4 sm:$0xff]   ;;  %v4620_v56 = vld [vmem:[%s6278_s1 + $0x8a0] ss:$16 sps:$4 sm:$0xff]  }
  0xf3   : > { %2761 = vmatpush1.bf16.msra.mxu0 %v4536_v57  ;;  %3048 = vmatpush1.bf16.msra.mxu1 %v4539_v58  ;;  %v4623_v57 = vld [vmem:[%s6278_s1 + $0x8a8] ss:$16 sps:$4 sm:$0xff]   ;;  %v4628_v58 = vld [vmem:[%s6278_s1 + $0x8c4] ss:$16 sps:$4 sm:$0xff]  }
  0xf4   : > { %2762 = vmatprep.subr.bf16.mxu0 %v4544_v59  ;;  %3049 = vmatprep.subr.bf16.mxu1 %v4547_v60  ;;  %v4631_v59 = vld [vmem:[%s6278_s1 + $0x8cc] ss:$16 sps:$4 sm:$0xff]   ;;  %v4626_v60 = vld [vmem:[%s6278_s1 + $0x8c0] ss:$16 sps:$4 sm:$0xff]  }
  0xf7   : > { %2763 = vmatpush1.bf16.msra.mxu0 %v4542_v61  ;;  %3050 = vmatpush1.bf16.msra.mxu1 %v4545_v62  ;;  %v4629_v61 = vld [vmem:[%s6278_s1 + $0x8c8] ss:$16 sps:$4 sm:$0xff]   ;;  %v4634_v62 = vld [vmem:[%s6278_s1 + $0x8e4] ss:$16 sps:$4 sm:$0xff]  }
  0xf8   : > { %2764 = vmatprep.subr.bf16.mxu0 %v4550_v63  ;;  %3051 = vmatprep.subr.bf16.mxu1 %v4553_v0  ;;  %v4637_v63 = vld [vmem:[%s6278_s1 + $0x8ec] ss:$16 sps:$4 sm:$0xff]   ;;  %v4632_v0 = vld [vmem:[%s6278_s1 + $0x8e0] ss:$16 sps:$4 sm:$0xff]  }
  0xfb   : > { %2765 = vmatpush1.bf16.msra.mxu0 %v4548_v1  ;;  %3052 = vmatpush1.bf16.msra.mxu1 %v4551_v2  ;;  %v4635_v1 = vld [vmem:[%s6278_s1 + $0x8e8] ss:$16 sps:$4 sm:$0xff]   ;;  %v4640_v2 = vld [vmem:[%s6278_s1 + $0x904] ss:$16 sps:$4 sm:$0xff]  }
  0xfc   : > { %2766 = vmatprep.subr.bf16.mxu0 %v4556_v3  ;;  %3053 = vmatprep.subr.bf16.mxu1 %v4559_v4  ;;  %v4643_v3 = vld [vmem:[%s6278_s1 + $0x90c] ss:$16 sps:$4 sm:$0xff]   ;;  %v4638_v4 = vld [vmem:[%s6278_s1 + $0x900] ss:$16 sps:$4 sm:$0xff]  }
  0xff   : > { %2767 = vmatpush1.bf16.msra.mxu0 %v4554_v5  ;;  %3054 = vmatpush1.bf16.msra.mxu1 %v4557_v6  ;;  %v4641_v5 = vld [vmem:[%s6278_s1 + $0x908] ss:$16 sps:$4 sm:$0xff]   ;;  %v4646_v6 = vld [vmem:[%s6278_s1 + $0x924] ss:$16 sps:$4 sm:$0xff]  }
 0x100   : > { %2768 = vmatprep.subr.bf16.mxu0 %v4562_v7  ;;  %3055 = vmatprep.subr.bf16.mxu1 %v4565_v8  ;;  %v4649_v7 = vld [vmem:[%s6278_s1 + $0x92c] ss:$16 sps:$4 sm:$0xff]   ;;  %v4644_v8 = vld [vmem:[%s6278_s1 + $0x920] ss:$16 sps:$4 sm:$0xff]  }
 0x103   : > { %2769 = vmatpush1.bf16.msra.mxu0 %v4560_v9  ;;  %3056 = vmatpush1.bf16.msra.mxu1 %v4563_v10  ;;  %v4647_v9 = vld [vmem:[%s6278_s1 + $0x928] ss:$16 sps:$4 sm:$0xff]   ;;  %v4652_v10 = vld [vmem:[%s6278_s1 + $0x944] ss:$16 sps:$4 sm:$0xff]  }
 0x104   : > { %2770 = vmatprep.subr.bf16.mxu0 %v4568_v11  ;;  %3057 = vmatprep.subr.bf16.mxu1 %v4571_v12  ;;  %v4655_v11 = vld [vmem:[%s6278_s1 + $0x94c] ss:$16 sps:$4 sm:$0xff]   ;;  %v4650_v12 = vld [vmem:[%s6278_s1 + $0x940] ss:$16 sps:$4 sm:$0xff]  }
 0x107   : > { %2771 = vmatpush1.bf16.msra.mxu0 %v4566_v13  ;;  %3058 = vmatpush1.bf16.msra.mxu1 %v4569_v53  ;;  %v4653_v13 = vld [vmem:[%s6278_s1 + $0x948] ss:$16 sps:$4 sm:$0xff]   ;;  %v4658_v53 = vld [vmem:[%s6278_s1 + $0x964] ss:$16 sps:$4 sm:$0xff]  }
 0x108   : > { %2772 = vmatprep.subr.bf16.mxu0 %v4574_v16  ;;  %3059 = vmatprep.subr.bf16.mxu1 %v4577_v17  ;;  %v4661_v16 = vld [vmem:[%s6278_s1 + $0x96c] ss:$16 sps:$4 sm:$0xff]   ;;  %v4656_v17 = vld [vmem:[%s6278_s1 + $0x960] ss:$16 sps:$4 sm:$0xff]  }
 0x10b   : > { %2773 = vmatpush1.bf16.msra.mxu0 %v4572_v18  ;;  %3060 = vmatpush1.bf16.msra.mxu1 %v4575_v19  ;;  %v4659_v18 = vld [vmem:[%s6278_s1 + $0x968] ss:$16 sps:$4 sm:$0xff]   ;;  %v4664_v19 = vld [vmem:[%s6278_s1 + $0x984] ss:$16 sps:$4 sm:$0xff]  }
 0x10c   : > { %2774 = vmatprep.subr.bf16.mxu0 %v4580_v20  ;;  %3061 = vmatprep.subr.bf16.mxu1 %v4583_v21  ;;  %v4667_v20 = vld [vmem:[%s6278_s1 + $0x98c] ss:$16 sps:$4 sm:$0xff]   ;;  %v4662_v21 = vld [vmem:[%s6278_s1 + $0x980] ss:$16 sps:$4 sm:$0xff]  }
 0x10f   : > { %2775 = vmatpush1.bf16.msra.mxu0 %v4578_v23  ;;  %3062 = vmatpush1.bf16.msra.mxu1 %v4581_v24  ;;  %v4665_v23 = vld [vmem:[%s6278_s1 + $0x988] ss:$16 sps:$4 sm:$0xff]   ;;  %v4670_v24 = vld [vmem:[%s6278_s1 + $0x9a4] ss:$16 sps:$4 sm:$0xff]  }
 0x110   : > { %2776 = vmatprep.subr.bf16.mxu0 %v4586_v25  ;;  %3063 = vmatprep.subr.bf16.mxu1 %v4589_v14  ;;  %v4673_v25 = vld [vmem:[%s6278_s1 + $0x9ac] ss:$16 sps:$4 sm:$0xff]   ;;  %v4668_v14 = vld [vmem:[%s6278_s1 + $0x9a0] ss:$16 sps:$4 sm:$0xff]  }
 0x113   : > { %2777 = vmatpush1.bf16.msra.mxu0 %v4584_v29  ;;  %3064 = vmatpush1.bf16.msra.mxu1 %v4587_v30  ;;  %v4671_v29 = vld [vmem:[%s6278_s1 + $0x9a8] ss:$16 sps:$4 sm:$0xff]   ;;  %v4676_v30 = vld [vmem:[%s6278_s1 + $0x9c4] ss:$16 sps:$4 sm:$0xff]  }
 0x114   : > { %2787 = vmatprep.subr.bf16.mxu0 %v4592_v15  ;;  %3074 = vmatprep.subr.bf16.mxu1 %v4595_v31  ;;  %v4679_v15 = vld [vmem:[%s6278_s1 + $0x9cc] ss:$16 sps:$4 sm:$0xff]   ;;  %v4674_v31 = vld [vmem:[%s6278_s1 + $0x9c0] ss:$16 sps:$4 sm:$0xff]  }
 0x116   : > { %2779 = vmatmul.mubr.bf16.vlgmr.msra.gmra.mrb[0].mxu0 %v605_v34  ;;  %3066 = vmatmul.mubr.bf16.vlgmr.msra.gmra.mrb[0].mxu1 %v605_v34  ;;  %v4680_v34 = vld [vmem:[%s6278_s1 + $0x9e0] ss:$16 sps:$4 sm:$0xff]  }
 0x117   : > { %2788 = vmatpush1.bf16.msra.mxu0 %v4590_v32  ;;  %3075 = vmatpush1.bf16.msra.mxu1 %v4593_v33  ;;  %v4677_v32 = vld [vmem:[%s6278_s1 + $0x9c8] ss:$16 sps:$4 sm:$0xff]   ;;  %v4685_v33 = vld [vmem:[%s6278_s1 + $0x9ec] ss:$16 sps:$4 sm:$0xff]  }
 0x118   : > { %2789 = vmatprep.subr.bf16.mxu0 %v4598_v35  ;;  %3076 = vmatprep.subr.bf16.mxu1 %v4601_v36  ;;  %v4683_v35 = vld [vmem:[%s6278_s1 + $0x9e8] ss:$16 sps:$4 sm:$0xff]   ;;  %v4689_v36 = vld [vmem:[%s6278_s1 + $0xa04] ss:$16 sps:$4 sm:$0xff]  }
 0x119   : > { %2819 = vmatprep.mubr.bf16.mxu0 %v5745_v37  ;;  %3106 = vmatprep.mubr.bf16.mxu1 %v5745_v37 }
 0x11b   : > { %2790 = vmatpush1.bf16.msra.mxu0 %v4596_v27  ;;  %3077 = vmatpush1.bf16.msra.mxu1 %v4599_v38  ;;  %v4692_v27 = vld [vmem:[%s6278_s1 + $0xa0c] ss:$16 sps:$4 sm:$0xff]   ;;  %v5931_v38 = vrot.slane %v5714_v28, %v5044_v50 }
 0x11c   : > { %2791 = vmatprep.subr.bf16.mxu0 %v4604_v39  ;;  %3078 = vmatprep.subr.bf16.mxu1 %v4607_v40  ;;  %v4687_v39 = vld [vmem:[%s6278_s1 + $0xa00] ss:$16 sps:$4 sm:$0xff]   ;;  %v4690_v40 = vld [vmem:[%s6278_s1 + $0xa08] ss:$16 sps:$4 sm:$0xff]   ;;  %v4698_v28 = vld [vmem:[%s6278_s1 + $0xa2c] ss:$16 sps:$4 sm:$0xff]  }
 0x11f   : > { %2792 = vmatpush1.bf16.msra.mxu0 %v4602_v41  ;;  %3079 = vmatpush1.bf16.msra.mxu1 %v4605_v42  ;;  %v4695_v41 = vld [vmem:[%s6278_s1 + $0xa24] ss:$16 sps:$4 sm:$0xff]   ;;  %v646_v42 = vcombine.high %v5745_v37, %v5745_v37 }
 0x120   : > { %2793 = vmatprep.subr.bf16.mxu0 %v4610_v43  ;;  %3080 = vmatprep.subr.bf16.mxu1 %v4613_v45  ;;  %v4693_v43 = vld [vmem:[%s6278_s1 + $0xa20] ss:$16 sps:$4 sm:$0xff]   ;;  %v4696_v45 = vld [vmem:[%s6278_s1 + $0xa28] ss:$16 sps:$4 sm:$0xff]   ;;  %v4701_v37 = vld [vmem:[%s6278_s1 + $0xa44] ss:$16 sps:$4 sm:$0xff]  }
 0x123   : > { %2794 = vmatpush1.bf16.msra.mxu0 %v4608_v46  ;;  %3081 = vmatpush1.bf16.msra.mxu1 %v4611_v47  ;;  %v4704_v46 = vld [vmem:[%s6278_s1 + $0xa4c] ss:$16 sps:$4 sm:$0xff]   ;;  %v4699_v47 = vld [vmem:[%s6278_s1 + $0xa40] ss:$16 sps:$4 sm:$0xff]  }
 0x124   : > { %2795 = vmatprep.subr.bf16.mxu0 %v4616_v48  ;;  %3082 = vmatprep.subr.bf16.mxu1 %v4619_v49  ;;  %v4702_v48 = vld [vmem:[%s6278_s1 + $0xa48] ss:$16 sps:$4 sm:$0xff]   ;;  %v4707_v49 = vld [vmem:[%s6278_s1 + $0xa64] ss:$16 sps:$4 sm:$0xff]  }
 0x127   : > { %2796 = vmatpush1.bf16.msra.mxu0 %v4614_v51  ;;  %3083 = vmatpush1.bf16.msra.mxu1 %v4617_v52  ;;  %v4710_v51 = vld [vmem:[%s6278_s1 + $0xa6c] ss:$16 sps:$4 sm:$0xff]   ;;  %v4705_v52 = vld [vmem:[%s6278_s1 + $0xa60] ss:$16 sps:$4 sm:$0xff]  }
 0x128   : > { %2797 = vmatprep.subr.bf16.mxu0 %v4622_v54  ;;  %3084 = vmatprep.subr.bf16.mxu1 %v4625_v55  ;;  %v4708_v54 = vld [vmem:[%s6278_s1 + $0xa68] ss:$16 sps:$4 sm:$0xff]   ;;  %v4713_v55 = vld [vmem:[%s6278_s1 + $0xa84] ss:$16 sps:$4 sm:$0xff]  }
 0x12b   : > { %2798 = vmatpush1.bf16.msra.mxu0 %v4620_v56  ;;  %3085 = vmatpush1.bf16.msra.mxu1 %v4623_v57  ;;  %v4716_v56 = vld [vmem:[%s6278_s1 + $0xa8c] ss:$16 sps:$4 sm:$0xff]   ;;  %v4711_v57 = vld [vmem:[%s6278_s1 + $0xa80] ss:$16 sps:$4 sm:$0xff]  }
 0x12c   : > { %2799 = vmatprep.subr.bf16.mxu0 %v4628_v58  ;;  %3086 = vmatprep.subr.bf16.mxu1 %v4631_v59  ;;  %v4714_v58 = vld [vmem:[%s6278_s1 + $0xa88] ss:$16 sps:$4 sm:$0xff]   ;;  %v4719_v59 = vld [vmem:[%s6278_s1 + $0xaa4] ss:$16 sps:$4 sm:$0xff]  }
 0x12f   : > { %2800 = vmatpush1.bf16.msra.mxu0 %v4626_v60  ;;  %3087 = vmatpush1.bf16.msra.mxu1 %v4629_v61  ;;  %v4722_v60 = vld [vmem:[%s6278_s1 + $0xaac] ss:$16 sps:$4 sm:$0xff]   ;;  %v4717_v61 = vld [vmem:[%s6278_s1 + $0xaa0] ss:$16 sps:$4 sm:$0xff]  }
 0x130   : > { %2801 = vmatprep.subr.bf16.mxu0 %v4634_v62  ;;  %3088 = vmatprep.subr.bf16.mxu1 %v4637_v63  ;;  %v4720_v62 = vld [vmem:[%s6278_s1 + $0xaa8] ss:$16 sps:$4 sm:$0xff]   ;;  %v4725_v63 = vld [vmem:[%s6278_s1 + $0xac4] ss:$16 sps:$4 sm:$0xff]  }
 0x133   : > { %2802 = vmatpush1.bf16.msra.mxu0 %v4632_v0  ;;  %3089 = vmatpush1.bf16.msra.mxu1 %v4635_v1  ;;  %v4728_v0 = vld [vmem:[%s6278_s1 + $0xacc] ss:$16 sps:$4 sm:$0xff]   ;;  %v4723_v1 = vld [vmem:[%s6278_s1 + $0xac0] ss:$16 sps:$4 sm:$0xff]  }
 0x134   : > { %2803 = vmatprep.subr.bf16.mxu0 %v4640_v2  ;;  %3090 = vmatprep.subr.bf16.mxu1 %v4643_v3  ;;  %v4726_v2 = vld [vmem:[%s6278_s1 + $0xac8] ss:$16 sps:$4 sm:$0xff]   ;;  %v4731_v3 = vld [vmem:[%s6278_s1 + $0xae4] ss:$16 sps:$4 sm:$0xff]  }
 0x137   : > { %2804 = vmatpush1.bf16.msra.mxu0 %v4638_v4  ;;  %3091 = vmatpush1.bf16.msra.mxu1 %v4641_v5  ;;  %v4734_v4 = vld [vmem:[%s6278_s1 + $0xaec] ss:$16 sps:$4 sm:$0xff]   ;;  %v4729_v5 = vld [vmem:[%s6278_s1 + $0xae0] ss:$16 sps:$4 sm:$0xff]  }
 0x138   : > { %2805 = vmatprep.subr.bf16.mxu0 %v4646_v6  ;;  %3092 = vmatprep.subr.bf16.mxu1 %v4649_v7  ;;  %v4732_v6 = vld [vmem:[%s6278_s1 + $0xae8] ss:$16 sps:$4 sm:$0xff]   ;;  %v4737_v7 = vld [vmem:[%s6278_s1 + $0xb04] ss:$16 sps:$4 sm:$0xff]  }
 0x13b   : > { %2806 = vmatpush1.bf16.msra.mxu0 %v4644_v8  ;;  %3093 = vmatpush1.bf16.msra.mxu1 %v4647_v9  ;;  %v4740_v8 = vld [vmem:[%s6278_s1 + $0xb0c] ss:$16 sps:$4 sm:$0xff]   ;;  %v4735_v9 = vld [vmem:[%s6278_s1 + $0xb00] ss:$16 sps:$4 sm:$0xff]  }
 0x13c   : > { %2807 = vmatprep.subr.bf16.mxu0 %v4652_v10  ;;  %3094 = vmatprep.subr.bf16.mxu1 %v4655_v11  ;;  %v4738_v10 = vld [vmem:[%s6278_s1 + $0xb08] ss:$16 sps:$4 sm:$0xff]   ;;  %v4743_v11 = vld [vmem:[%s6278_s1 + $0xb24] ss:$16 sps:$4 sm:$0xff]  }
 0x13f   : > { %2808 = vmatpush1.bf16.msra.mxu0 %v4650_v12  ;;  %3095 = vmatpush1.bf16.msra.mxu1 %v4653_v13  ;;  %v4746_v12 = vld [vmem:[%s6278_s1 + $0xb2c] ss:$16 sps:$4 sm:$0xff]   ;;  %v4741_v13 = vld [vmem:[%s6278_s1 + $0xb20] ss:$16 sps:$4 sm:$0xff]  }
 0x140   : > { %2809 = vmatprep.subr.bf16.mxu0 %v4658_v53  ;;  %3096 = vmatprep.subr.bf16.mxu1 %v4661_v16  ;;  %v4744_v53 = vld [vmem:[%s6278_s1 + $0xb28] ss:$16 sps:$4 sm:$0xff]   ;;  %v4749_v16 = vld [vmem:[%s6278_s1 + $0xb44] ss:$16 sps:$4 sm:$0xff]  }
 0x143   : > { %2810 = vmatpush1.bf16.msra.mxu0 %v4656_v17  ;;  %3097 = vmatpush1.bf16.msra.mxu1 %v4659_v18  ;;  %v4752_v17 = vld [vmem:[%s6278_s1 + $0xb4c] ss:$16 sps:$4 sm:$0xff]   ;;  %v4747_v18 = vld [vmem:[%s6278_s1 + $0xb40] ss:$16 sps:$4 sm:$0xff]  }
 0x144   : > { %2811 = vmatprep.subr.bf16.mxu0 %v4664_v19  ;;  %3098 = vmatprep.subr.bf16.mxu1 %v4667_v20  ;;  %v4750_v19 = vld [vmem:[%s6278_s1 + $0xb48] ss:$16 sps:$4 sm:$0xff]   ;;  %v4755_v20 = vld [vmem:[%s6278_s1 + $0xb64] ss:$16 sps:$4 sm:$0xff]  }
 0x147   : > { %2812 = vmatpush1.bf16.msra.mxu0 %v4662_v21  ;;  %3099 = vmatpush1.bf16.msra.mxu1 %v4665_v23  ;;  %v4758_v21 = vld [vmem:[%s6278_s1 + $0xb6c] ss:$16 sps:$4 sm:$0xff]   ;;  %v4753_v23 = vld [vmem:[%s6278_s1 + $0xb60] ss:$16 sps:$4 sm:$0xff]  }
 0x148   : > { %2813 = vmatprep.subr.bf16.mxu0 %v4670_v24  ;;  %3100 = vmatprep.subr.bf16.mxu1 %v4673_v25  ;;  %v4756_v24 = vld [vmem:[%s6278_s1 + $0xb68] ss:$16 sps:$4 sm:$0xff]   ;;  %v4761_v25 = vld [vmem:[%s6278_s1 + $0xb84] ss:$16 sps:$4 sm:$0xff]  }
 0x14b   : > { %2814 = vmatpush1.bf16.msra.mxu0 %v4668_v14  ;;  %3101 = vmatpush1.bf16.msra.mxu1 %v4671_v29  ;;  %v4764_v14 = vld [vmem:[%s6278_s1 + $0xb8c] ss:$16 sps:$4 sm:$0xff]   ;;  %v4759_v29 = vld [vmem:[%s6278_s1 + $0xb80] ss:$16 sps:$4 sm:$0xff]  }
 0x14c   : > { %2815 = vmatprep.subr.bf16.mxu0 %v4676_v30  ;;  %3102 = vmatprep.subr.bf16.mxu1 %v4679_v15  ;;  %v4762_v30 = vld [vmem:[%s6278_s1 + $0xb88] ss:$16 sps:$4 sm:$0xff]   ;;  %v4767_v15 = vld [vmem:[%s6278_s1 + $0xba4] ss:$16 sps:$4 sm:$0xff]  }
 0x14f   : > { %2816 = vmatpush1.bf16.msra.mxu0 %v4674_v31  ;;  %3103 = vmatpush1.bf16.msra.mxu1 %v4677_v32  ;;  %v4770_v31 = vld [vmem:[%s6278_s1 + $0xbac] ss:$16 sps:$4 sm:$0xff]   ;;  %v4765_v32 = vld [vmem:[%s6278_s1 + $0xba0] ss:$16 sps:$4 sm:$0xff]  }
 0x150   : > { %2817 = vmatprep.subr.bf16.mxu0 %v4682_v26  ;;  %3104 = vmatprep.subr.bf16.mxu1 %v4685_v33  ;;  %v4768_v26 = vld [vmem:[%s6278_s1 + $0xba8] ss:$16 sps:$4 sm:$0xff]   ;;  %v4773_v33 = vld [vmem:[%s6278_s1 + $0xbc4] ss:$16 sps:$4 sm:$0xff]  }
 0x153   : > { %2818 = vmatpush1.bf16.msra.mxu0 %v4680_v34  ;;  %3105 = vmatpush1.bf16.msra.mxu1 %v4683_v35  ;;  %v4776_v34 = vld [vmem:[%s6278_s1 + $0xbcc] ss:$16 sps:$4 sm:$0xff]   ;;  %v4771_v35 = vld [vmem:[%s6278_s1 + $0xbc0] ss:$16 sps:$4 sm:$0xff]  }
 0x154   : > { %2828 = vmatprep.subr.bf16.mxu0 %v4689_v36  ;;  %3115 = vmatprep.subr.bf16.mxu1 %v4692_v27  ;;  %v4774_v36 = vld [vmem:[%s6278_s1 + $0xbc8] ss:$16 sps:$4 sm:$0xff]   ;;  %v4779_v27 = vld [vmem:[%s6278_s1 + $0xbe4] ss:$16 sps:$4 sm:$0xff]  }
 0x156   : > { %2820 = vmatmul.mubr.bf16.vlgmr.msra.gmra.mrb[0].mxu0 %v5931_v38  ;;  %3107 = vmatmul.mubr.bf16.vlgmr.msra.gmra.mrb[0].mxu1 %v5931_v38 }
 0x157   : > { %2829 = vmatpush1.bf16.msra.mxu0 %v4687_v39  ;;  %3116 = vmatpush1.bf16.msra.mxu1 %v4690_v40  ;;  %v4782_v39 = vld [vmem:[%s6278_s1 + $0xbec] ss:$16 sps:$4 sm:$0xff]   ;;  %v4777_v40 = vld [vmem:[%s6278_s1 + $0xbe0] ss:$16 sps:$4 sm:$0xff]  }
 0x158   : > { %2830 = vmatprep.subr.bf16.mxu0 %v4695_v41  ;;  %3117 = vmatprep.subr.bf16.mxu1 %v4698_v28  ;;  %v4780_v41 = vld [vmem:[%s6278_s1 + $0xbe8] ss:$16 sps:$4 sm:$0xff]   ;;  %v4785_v28 = vld [vmem:[%s6278_s1 + $0xc04] ss:$16 sps:$4 sm:$0xff]  }
 0x159   : > { %2860 = vmatprep.mubr.bf16.mxu0 %v646_v42  ;;  %3147 = vmatprep.mubr.bf16.mxu1 %v646_v42  ;;  %v4788_v42 = vld [vmem:[%s6278_s1 + $0xc0c] ss:$16 sps:$4 sm:$0xff]  }
 0x15b   : > { %2831 = vmatpush1.bf16.msra.mxu0 %v4693_v43  ;;  %3118 = vmatpush1.bf16.msra.mxu1 %v4696_v45  ;;  %v645_v43 = vcombine.high %v5931_v38, %v5931_v38  ;;  %v4783_v45 = vld [vmem:[%s6278_s1 + $0xc00] ss:$16 sps:$4 sm:$0xff]   ;;  %v4794_v38 = vld [vmem:[%s6278_s1 + $0xc2c] ss:$16 sps:$4 sm:$0xff]  }
 0x15c   : > { %2832 = vmatprep.subr.bf16.mxu0 %v4701_v37  ;;  %3119 = vmatprep.subr.bf16.mxu1 %v4704_v46  ;;  %v4786_v37 = vld [vmem:[%s6278_s1 + $0xc08] ss:$16 sps:$4 sm:$0xff]   ;;  %v4791_v46 = vld [vmem:[%s6278_s1 + $0xc24] ss:$16 sps:$4 sm:$0xff]  }
 0x15f   : > { %2833 = vmatpush1.bf16.msra.mxu0 %v4699_v47  ;;  %3120 = vmatpush1.bf16.msra.mxu1 %v4702_v48  ;;  %v608_v47 = vcombine.high %v5698_v22, %v5698_v22  ;;  %v4789_v48 = vld [vmem:[%s6278_s1 + $0xc20] ss:$16 sps:$4 sm:$0xff]  }
 0x160   : > { %2834 = vmatprep.subr.bf16.mxu0 %v4707_v49  ;;  %3121 = vmatprep.subr.bf16.mxu1 %v4710_v51  ;;  %v4792_v49 = vld [vmem:[%s6278_s1 + $0xc28] ss:$16 sps:$4 sm:$0xff]   ;;  %v4795_v51 = vld [vmem:[%s6279_s2 + $0x40] sm:$0xff]  }
 0x161   : > { %v4797_v22 = vld [vmem:[%s6279_s2 + $0xc0] sm:$0xff]  }
 0x163   : > { %2835 = vmatpush1.bf16.msra.mxu0 %v4705_v52  ;;  %3122 = vmatpush1.bf16.msra.mxu1 %v4708_v54  ;;  %v4867_v52 = vmov 0   ;;  %v622_v54 = vrot.slane %v608_v47, %v5044_v50 }
 0x164   : > { %2836 = vmatprep.subr.bf16.mxu0 %v4713_v55  ;;  %3123 = vmatprep.subr.bf16.mxu1 %v4716_v56  ;;  %v4796_v56 = vld [vmem:[%s6279_s2] sm:$0xff]  }
 0x165   : > { %v637_v55 = vrot.slane %v622_v54, %v5044_v50  ;;  %v4800_v50 = vld [vmem:[%s6279_s2 + $0x8] sm:$0xff]  }
 0x167   : > { %2837 = vmatpush1.bf16.msra.mxu0 %v4711_v57  ;;  %3124 = vmatpush1.bf16.msra.mxu1 %v4714_v58  ;;  %v4798_v57 = vld [vmem:[%s6279_s2 + $0x80] sm:$0xff]   ;;  %v4799_v58 = vld [vmem:[%s6279_s2 + $0x48] sm:$0xff]  }
 0x168   : > { %2838 = vmatprep.subr.bf16.mxu0 %v4719_v59  ;;  %3125 = vmatprep.subr.bf16.mxu1 %v4722_v60  ;;  %v4801_v59 = vld [vmem:[%s6279_s2 + $0xc8] sm:$0xff]  }
 0x169   : > { %v4802_v60 = vld [vmem:[%s6279_s2 + $0x88] sm:$0xff]  }
 0x16b   : > { %2839 = vmatpush1.bf16.msra.mxu0 %v4717_v61  ;;  %3126 = vmatpush1.bf16.msra.mxu1 %v4720_v62  ;;  %v4803_v61 = vld [vmem:[%s6279_s2 + $0x50] sm:$0xff]  }
 0x16c   : > { %2840 = vmatprep.subr.bf16.mxu0 %v4725_v63  ;;  %3127 = vmatprep.subr.bf16.mxu1 %v4728_v0  ;;  %v4805_v62 = vld [vmem:[%s6279_s2 + $0xd0] sm:$0xff]  }
 0x16d   : > { %v4804_v63 = vld [vmem:[%s6279_s2 + $0x10] sm:$0xff]  }
 0x16e   : > { %v4806_v0 = vld [vmem:[%s6279_s2 + $0x90] sm:$0xff]  }
 0x16f   : > { %2841 = vmatpush1.bf16.msra.mxu0 %v4723_v1  ;;  %3128 = vmatpush1.bf16.msra.mxu1 %v4726_v2  ;;  %v4807_v1 = vld [vmem:[%s6279_s2 + $0x58] sm:$0xff]  }
 0x170   : > { %2842 = vmatprep.subr.bf16.mxu0 %v4731_v3  ;;  %3129 = vmatprep.subr.bf16.mxu1 %v4734_v4  ;;  %v4808_v2 = vld [vmem:[%s6279_s2 + $0x18] sm:$0xff]  }
 0x171   : > { %v4809_v3 = vld [vmem:[%s6279_s2 + $0xd8] sm:$0xff]  }
 0x172   : > { %v4810_v4 = vld [vmem:[%s6279_s2 + $0x98] sm:$0xff]  }
 0x173   : > { %2843 = vmatpush1.bf16.msra.mxu0 %v4729_v5  ;;  %3130 = vmatpush1.bf16.msra.mxu1 %v4732_v6  ;;  %v4811_v5 = vld [vmem:[%s6279_s2 + $0x60] sm:$0xff]  }
 0x174   : > { %2844 = vmatprep.subr.bf16.mxu0 %v4737_v7  ;;  %3131 = vmatprep.subr.bf16.mxu1 %v4740_v8  ;;  %v4812_v6 = vld [vmem:[%s6279_s2 + $0x20] sm:$0xff]  }
 0x175   : > { %v4813_v7 = vld [vmem:[%s6279_s2 + $0xe0] sm:$0xff]  }
 0x176   : > { %v4814_v8 = vld [vmem:[%s6279_s2 + $0xa0] sm:$0xff]  }
 0x177   : > { %2845 = vmatpush1.bf16.msra.mxu0 %v4735_v9  ;;  %3132 = vmatpush1.bf16.msra.mxu1 %v4738_v10  ;;  %v4815_v9 = vld [vmem:[%s6279_s2 + $0x68] sm:$0xff]  }
 0x178   : > { %2846 = vmatprep.subr.bf16.mxu0 %v4743_v11  ;;  %3133 = vmatprep.subr.bf16.mxu1 %v4746_v12  ;;  %v4816_v10 = vld [vmem:[%s6279_s2 + $0x28] sm:$0xff]  }
 0x179   : > { %v4817_v11 = vld [vmem:[%s6279_s2 + $0xe8] sm:$0xff]  }
 0x17a   : > { %v4818_v12 = vld [vmem:[%s6279_s2 + $0xa8] sm:$0xff]  }
 0x17b   : > { %2847 = vmatpush1.bf16.msra.mxu0 %v4741_v13  ;;  %3134 = vmatpush1.bf16.msra.mxu1 %v4744_v53  ;;  %v4819_v13 = vld [vmem:[%s6279_s2 + $0x70] sm:$0xff]  }
 0x17c   : > { %2848 = vmatprep.subr.bf16.mxu0 %v4749_v16  ;;  %3135 = vmatprep.subr.bf16.mxu1 %v4752_v17  ;;  %v4820_v53 = vld [vmem:[%s6279_s2 + $0x30] sm:$0xff]  }
 0x17d   : > { %v4821_v16 = vld [vmem:[%s6279_s2 + $0xf0] sm:$0xff]  }
 0x17e   : > { %v4822_v17 = vld [vmem:[%s6279_s2 + $0xb0] sm:$0xff]  }
 0x17f   : > { %2849 = vmatpush1.bf16.msra.mxu0 %v4747_v18  ;;  %3136 = vmatpush1.bf16.msra.mxu1 %v4750_v19  ;;  %v4823_v18 = vld [vmem:[%s6279_s2 + $0x78] sm:$0xff]  }
 0x180   : > { %2850 = vmatprep.subr.bf16.mxu0 %v4755_v20  ;;  %3137 = vmatprep.subr.bf16.mxu1 %v4758_v21  ;;  %v4824_v19 = vld [vmem:[%s6279_s2 + $0x38] sm:$0xff]  }
 0x181   : > { %v4825_v20 = vld [vmem:[%s6279_s2 + $0xf8] sm:$0xff]  }
 0x182   : > { %v4826_v21 = vld [vmem:[%s6279_s2 + $0xb8] sm:$0xff]  }
 0x183   : > { %2851 = vmatpush1.bf16.msra.mxu0 %v4753_v23  ;;  %3138 = vmatpush1.bf16.msra.mxu1 %v4756_v24  ;;  %v4868_v23 = vmov 1983009808  }
 0x184   : > { %2852 = vmatprep.subr.bf16.mxu0 %v4761_v25  ;;  %3139 = vmatprep.subr.bf16.mxu1 %v4764_v14  ;;  %v3205_v24 = vunpack.c.l.s4 %v4868_v23 }
 0x186   : > { %v3206_v25 = vunpack.c.0.s8 %v3205_v24 }
 0x187   : > { %2853 = vmatpush1.bf16.msra.mxu0 %v4759_v29  ;;  %3140 = vmatpush1.bf16.msra.mxu1 %v4762_v30 }
 0x188   : > { %2854 = vmatprep.subr.bf16.mxu0 %v4767_v15  ;;  %3141 = vmatprep.subr.bf16.mxu1 %v4770_v31  ;;  %v3209_v30 = vsub.s32 %v3206_v25, %v5026_v44 }
 0x18b   : > { %2855 = vmatpush1.bf16.msra.mxu0 %v4765_v32  ;;  %3142 = vmatpush1.bf16.msra.mxu1 %v4768_v26 }
 0x18c   : > { %2856 = vmatprep.subr.bf16.mxu0 %v4773_v33  ;;  %3143 = vmatprep.subr.bf16.mxu1 %v4776_v34 }
 0x18f   : > { %2857 = vmatpush1.bf16.msra.mxu0 %v4771_v35  ;;  %3144 = vmatpush1.bf16.msra.mxu1 %v4774_v36 }
 0x190   : > { %2858 = vmatprep.subr.bf16.mxu0 %v4779_v27  ;;  %3145 = vmatprep.subr.bf16.mxu1 %v4782_v39 }
 0x193   : > { %2859 = vmatpush1.bf16.msra.mxu0 %v4777_v40  ;;  %3146 = vmatpush1.bf16.msra.mxu1 %v4780_v41  ;;  %v3197_v40 = vld [vmem:[#allocation2] sm:$0xff] }
 0x194   : > { %2869 = vmatprep.subr.bf16.mxu0 %v4785_v28  ;;  %3156 = vmatprep.subr.bf16.mxu1 %v4788_v42  ;;  %v4869_v42 = vmov 0.0  }
 0x196   : > { %2861 = vmatmul.mubr.bf16.vlgmr.msra.gmra.mrb[0].mxu0 %v645_v43  ;;  %3148 = vmatmul.mubr.bf16.vlgmr.msra.gmra.mrb[0].mxu1 %v645_v43 }
 0x197   : > { %2870 = vmatpush1.bf16.msra.mxu0 %v4783_v45  ;;  %3157 = vmatpush1.bf16.msra.mxu1 %v4786_v37 }
 0x198   : > { %2871 = vmatprep.subr.bf16.mxu0 %v4791_v46  ;;  %3158 = vmatprep.subr.bf16.mxu1 %v4794_v38 }
 0x199   : > { %2901 = vmatprep.mubr.bf16.mxu0 %v4867_v52  ;;  %3188 = vmatprep.mubr.bf16.mxu1 %v4867_v52 }
 0x19b   : > { %2872 = vmatpush1.bf16.msra.mxu0 %v4789_v48  ;;  %3159 = vmatpush1.bf16.msra.mxu1 %v4792_v49 }
 0x19c   : > { %4092 = vmatprep.subr.bf16.mxu0 %v4795_v51  ;;  %4114 = vmatprep.subr.bf16.mxu1 %v4797_v22 }
 0x1a2   : > { %4051 = vmatmul.mubr.msk.bf16.vlgmr.msra.gmra.mrb[0].mxu0 %vm2619_vm1, %v637_v55  ;;  %4052 = vmatmul.mubr.msk.bf16.vlgmr.msra.gmra.mrb[0].mxu1 %vm2619_vm1, %v637_v55 }
 0x1a3   : > { %4093 = vmatpush3.bf16.msra.mxu0 %v4796_v56  ;;  %4115 = vmatpush3.bf16.msra.mxu1 %v4798_v57 }
 0x1a4   : > { %4094 = vmatprep.subr.bf16.mxu0 %v4799_v58  ;;  %4116 = vmatprep.subr.bf16.mxu1 %v4801_v59 }
 0x1a7   : > { %4095 = vmatpush3.bf16.msra.mxu0 %v4800_v50  ;;  %4117 = vmatpush3.bf16.msra.mxu1 %v4802_v60 }
 0x1a8   : > { %4096 = vmatprep.subr.bf16.mxu0 %v4803_v61  ;;  %4118 = vmatprep.subr.bf16.mxu1 %v4805_v62  ;;  %v3589_v62 = vld [vmem:[#allocation3] sm:$0x3] }
 0x1ab   : > { %4097 = vmatpush3.bf16.msra.mxu0 %v4804_v63  ;;  %4119 = vmatpush3.bf16.msra.mxu1 %v4806_v0 }
 0x1ac   : > { %4098 = vmatprep.subr.bf16.mxu0 %v4807_v1  ;;  %4120 = vmatprep.subr.bf16.mxu1 %v4809_v3 }
 0x1af   : > { %4099 = vmatpush3.bf16.msra.mxu0 %v4808_v2  ;;  %4121 = vmatpush3.bf16.msra.mxu1 %v4810_v4  ;;  %v3598_v2 = vld [vmem:[#allocation4] sm:$0x3] }
 0x1b0   : > { %4100 = vmatprep.subr.bf16.mxu0 %v4811_v5  ;;  %4122 = vmatprep.subr.bf16.mxu1 %v4813_v7 }
 0x1b3   : > { %4101 = vmatpush3.bf16.msra.mxu0 %v4812_v6  ;;  %4123 = vmatpush3.bf16.msra.mxu1 %v4814_v8 }
 0x1b4   : > { %4102 = vmatprep.subr.bf16.mxu0 %v4815_v9  ;;  %4124 = vmatprep.subr.bf16.mxu1 %v4817_v11 }
 0x1b7   : > { %4103 = vmatpush3.bf16.msra.mxu0 %v4816_v10  ;;  %4125 = vmatpush3.bf16.msra.mxu1 %v4818_v12 }
 0x1b8   : > { %4104 = vmatprep.subr.bf16.mxu0 %v4819_v13  ;;  %4126 = vmatprep.subr.bf16.mxu1 %v4821_v16 }
 0x1bb   : > { %4105 = vmatpush3.bf16.msra.mxu0 %v4820_v53  ;;  %4127 = vmatpush3.bf16.msra.mxu1 %v4822_v17 }
 0x1bc   : > { %4106 = vmatprep.subr.bf16.mxu0 %v4823_v18  ;;  %4128 = vmatprep.subr.bf16.mxu1 %v4825_v20 }
 0x1bf   : > { %4107 = vmatpush3.bf16.msra.mxu0 %v4824_v19  ;;  %4129 = vmatpush3.bf16.msra.mxu1 %v4826_v21 }
 0x275   : > { %v2903_v14 = vpop.f32.mrb[0].mxu0  ;;  %v3190_v29 = vpop.f32.mrb[0].mxu1 }
 0x276   : > { %v2905_v15 = vpop.f32.mrb[1].mxu0  ;;  %v3192_v31 = vpop.f32.mrb[1].mxu1 }
 0x277   : > { %v3202_v32 = vcombine.low %v2903_v14, %v2905_v15  ;;  %v3203_v26 = vcombine.low %v3190_v29, %v3192_v31  ;;  %v2907_v33 = vpop.f32.mrb[2].mxu0  ;;  %v3194_v34 = vpop.f32.mrb[2].mxu1 }
 0x278   : > { %v2908_v35 = vpop.f32.mrb[3].mxu0  ;;  %v3195_v36 = vpop.f32.mrb[3].mxu1 }
 0x279   : > { %v3210_v27 = vrot.slane %v3202_v32, %v3209_v30  ;;  %v3217_v39 = vrot.slane %v3203_v26, %v3209_v30 }
 0x27b   : > { %v3218_v41 = vcombine.low %v3210_v27, %v3217_v39 }
 0x27d   : > { %v3220_v28 = vadd.f32 %v3218_v41, %v3197_v40 }
 0x27f   : > { %vm3221_vm2 = vcmp.ge.f32.partialorder %v3220_v28, 1.0 }
 0x280   : > { %v4053_v43 = vsel %vm3221_vm2, 1.0, %v4869_v42 }
 0x281   : > { %v3224_v45 = vsub.f32 1.0, %v4053_v43  ;;  %v3235_v37 = vrot.slane %v4053_v43, %v3209_v30  ;;  %v3228_v46 = vcombine.high %v4053_v43, %v4053_v43 }
 0x283   : > { %v3225_v44 = vmul.f32 %v3224_v45, %v3220_v28  ;;  %v3243_v38 = vcombine.high %v3235_v37, %v3235_v37  ;;  %v3242_v47 = vrot.slane %v3228_v46, %v3209_v30  ;;  %v3249_v51 = vpack.c.bf16 %v3235_v37, %v3235_v37 }
 0x285   : > { %3226 = vst [vmem:[#allocation2] sm:$0xff] %v3225_v44  ;;  %v3250_v48 = vpack.c.bf16 %v3243_v38, %v3243_v38  ;;  %v3244_v49 = vcombine.high %v3242_v47, %v3242_v47  ;;  %v3251_v52 = vpack.c.bf16 %v3242_v47, %v3242_v47 }
 0x287   : > { %3541 = vmatprep.mubr.bf16.mxu0 %v3250_v48  ;;  %v3252_v22 = vpack.c.bf16 %v3244_v49, %v3244_v49 }
 0x288   : > { %3542 = vmatmul.mubr.bf16.vlgmr.msra.gmra.mrb[4].mxu0 %v3249_v51 }
 0x289   : > { %3581 = vmatprep.mubr.bf16.mxu1 %v3252_v22 }
 0x28a   : > { %3582 = vmatmul.mubr.bf16.vlgmr.msra.gmra.mrb[4].mxu1 %v3251_v52 }
 0x35b   : > { %v4108_v54 = vpop.f32.mrb[4].mxu0 }
 0x35c   : > { %v4109_v55 = vpop.f32.mrb[5].mxu0 }
 0x35d   : > { %v4110_v56 = vadd.f32 %v4109_v55, %v4108_v54  ;;  %v4111_v57 = vpop.f32.mrb[6].mxu0  ;;  %v4130_v58 = vpop.f32.mrb[4].mxu1 }
 0x35e   : > { %v4112_v59 = vpop.f32.mrb[7].mxu0  ;;  %v4131_v50 = vpop.f32.mrb[5].mxu1 }
 0x35f   : > { %v4132_v60 = vadd.f32 %v4131_v50, %v4130_v58  ;;  %v4133_v61 = vpop.f32.mrb[6].mxu1 }
 0x360   : > { %v4134_v63 = vpop.f32.mrb[7].mxu1 }
 0x361   : > { %v3584_v0 = vadd.f32 %v4132_v60, %v4110_v56 }
 0x363   : > { %v3590_v1 = vadd.f32 %v3589_v62, %v3584_v0 }
 0x365   : > { %vm3591_vm3 = vcmp.ge.f32.partialorder %v3590_v1, 1.0  ;;  %3604 = sbr.rel (%p4087_p5) target bundleno = 884 (0x374), region = 40 }
 0x366   : > { %v4086_v3 = vsel %vm3591_vm3, 1.0, %v4869_v42 }
 0x367   : > { %v3594_v4 = vsub.f32 1.0, %v4086_v3  ;;  %v3599_v5 = vadd.f32 %v4086_v3, %v3598_v2 }
 0x369   : > { %v3595_v6 = vmul.f32 %v3594_v4, %v3590_v1  ;;  %3600 = vst.msk [vmem:[#allocation4] sm:$0x3] %vm3596_vm4, %v3599_v5 }
 0x36b   : > { %3597 = vst.msk [vmem:[#allocation3] sm:$0x3] %vm3596_vm4, %v3595_v6 }
 0x370   : > { %v3605_v7 = vld [vmem:[#allocation4] sm:$0x3] }
 0x371   : > { %v3606_v8 = vmul.f32 0.25, %v3605_v7 }
 0x373   : > { %3607 = vst.msk [vmem:[#allocation4] sm:$0x3] %vm3596_vm4, %v3606_v8 }
 0x374 PF: > { %p4189_p6 = scmp.eq.s32.totalorder %s4897_s13, 3  ;;  %s4870_s10 = smov [#allocation4]  }
 0x375   : > { %s3615_s11 = sshll.u32 %s4870_s10, 4  ;;  %s3616_s11 = int_to_ptr.vmem [resolvable:$true] %s3615_s11 }
 0x376   : > { %s4827_s14 = scalar_lea.vmem %s3616_s11, 32  ;;  %p4834_p10 = scmp.lt.s32.totalorder %s3616_s11, %s3616_s11 }
 0x377   : > { %p4828_p7 = scmp.ne.s32.totalorder %s3616_s11, %s4827_s14  ;;  %p4835_p11 = scmp.lt.s32.totalorder %s4827_s14, %s4827_s14 }
 0x379   : > { %p4829_p8 = pnand %p4828_p7, %p4189_p6  ;;  %p4836_p12 = por %p4835_p11, %p4834_p10 }
 0x37b   : > { %p4830_p9 = pneg %p4829_p8 }
 0x37d   : > { %p4837_p13 = pnand %p4836_p12, %p4830_p9 }
 0x37f   : > { %4840 = shalt.err (!%p4837_p13)
}
 0x380   : > { %s4841_s17 = scalar_lea.hbm %s6280_s3, 32 }
 0x381   : > { %p4842_p0 = scmp.ne.s32.totalorder %s6280_s3, %s4841_s17  ;;  %p4847_p3 = scmp.lt.u32.totalorder %s4841_s17, %s6280_s3 }
 0x383   : > { %p4843_p1 = pnand %p4842_p0, %p4189_p6 }
 0x385   : > { %p4844_p2 = pneg %p4843_p1 }
 0x387   : > { %p4849_p4 = pnand %p4847_p3, %p4844_p2 }
 0x389   : > { %4852 = shalt.err (!%p4849_p4)
}
 0x38a   : > { %4186 = dma.vmem_to_hbm [thread:$0]  (%p4189_p6), %s3616_s11, 32, %s6280_s3, [#allocation5]  }
 0x38b   : > { %4858 = dma.done.wait (%p4189_p6), [#allocation5], 32  }
 0x38c   : > { %4860 = vsyncadd (%p4189_p6), [#allocation5], 4294967264 }
 0x38d PF: > { %s14_s12 = sadd.s32 1, %s4863_s12  }
 0x38e   : > { %p11_p5 = scmp.ge.s32.totalorder %s14_s12, 6  }
 0x390   :  { %13 = sbr.rel (!%p11_p5) target bundleno = 1 (0x1), region = 67 }
 0x397   :  { %3628 = vsyncpa [#allocation5], 1 }
 0x398   :  { %3630 = vsyncpa [#allocation5 + $0x1], 1 }

</bundles_post_ra>
